<compile_context>
chip_gen: v7x
topology: tpu7x:2x2x1
jax: 0.10.0
libtpu: 0.0.40
codegen_flags: <defaults>
</compile_context>

<pallas_src>
import jax
import jax.numpy as jnp
import numpy as np
from jax.experimental import pallas as pl
from jax.experimental.pallas import tpu as pltpu


# ---------------------------------------------------------------------------
# Fused kernel: one grid step per batch element.
#   x_ref:      (1, H, W, Cin)      input tile (NHWC)
#   w1_ref:     (9*Cin, Cout)       conv1 weights, im2col layout
#   s1/b1_ref:  (1, Cout)           folded BN1 scale / bias
#   w2_ref:     (9*Cout, Cout)      conv2 weights, im2col layout
#   s2/b2_ref:  (1, Cout)           folded BN2 scale / bias
#   pooled_ref: (1, Cout, Ho*Wo)    NCHW-flattened pooled output (lane-dense)
#   idx_ref:    (1, Cout, Ho*Wo)    NCHW-flattened pooling indices (int32)
#   xpad1:      (H+2, W+2, Cin)     VMEM scratch, zero halo, conv1 input
#   xpad2:      (H+2, W+2, Cout)    VMEM scratch, zero halo, conv1 output
#                                   (its interior is reused for conv2 output)
# ---------------------------------------------------------------------------
def _encoder_fused_kernel(x_ref, w1_ref, s1_ref, b1_ref, w2_ref, s2_ref,
                          b2_ref, pooled_ref, idx_ref, xpad1, xpad2):
    H = x_ref.shape[1]
    W = x_ref.shape[2]
    Cin = x_ref.shape[3]
    C = pooled_ref.shape[1]
    Ho, Wo = H // 2, W // 2

    # Zero the padded scratches (cheap VMEM-only writes, safe on any core
    # assignment); only their interiors are rewritten below, so the zero halo
    # provides the conv "padding=1" without any HBM pad pass.
    xpad1[...] = jnp.zeros_like(xpad1)
    xpad2[...] = jnp.zeros_like(xpad2)
    xpad1[1:H + 1, 1:W + 1, :] = x_ref[0]

    def conv_bn_relu(src_pad, w_ref, s_ref, b_ref, cin):
        # Full im2col: 9 shifted Ref-window loads concatenated along the
        # channel axis -> ONE fat MXU matmul with K = 9*cin.
        cols = jnp.concatenate(
            [src_pad[dy:dy + H, dx:dx + W, :].reshape(H * W, cin)
             for dy in range(3) for dx in range(3)],
            axis=1)                                           # (H*W, 9*cin)
        # TODO(synk): cast cols / weights to bf16 here for full MXU rate on
        # v6e/v7x; kept f32 to preserve the module's f32 numerics exactly.
        acc = jnp.dot(cols, w_ref[...],
                      preferred_element_type=jnp.float32)     # (H*W, Cout)
        return jnp.maximum(acc * s_ref[...] + b_ref[...], 0.0)

    y1 = conv_bn_relu(xpad1, w1_ref, s1_ref, b1_ref, Cin)     # (H*W, C)
    xpad2[1:H + 1, 1:W + 1, :] = y1.reshape(H, W, C)
    y2 = conv_bn_relu(xpad2, w2_ref, s2_ref, b2_ref, C)       # (H*W, C)

    # Reuse xpad2's interior to hold the conv2 output so the 2x2 pool can use
    # cheap strided *Ref* loads (the zero halo is irrelevant for stride-2
    # windows starting at offset 1).
    xpad2[1:H + 1, 1:W + 1, :] = y2.reshape(H, W, C)

    oh = jax.lax.broadcasted_iota(jnp.int32, (Ho, Wo, C), 0)
    ow = jax.lax.broadcasted_iota(jnp.int32, (Ho, Wo, C), 1)

    best = xpad2[pl.ds(1, Ho, stride=2), pl.ds(1, Wo, stride=2), :]
    best_idx = (2 * oh) * W + (2 * ow)
    for dy, dx in ((0, 1), (1, 0), (1, 1)):
        v = xpad2[pl.ds(1 + dy, Ho, stride=2), pl.ds(1 + dx, Wo, stride=2), :]
        iv = (2 * oh + dy) * W + (2 * ow + dx)
        take = v > best                      # strict >  -> first max wins
        best = jnp.where(take, v, best)
        best_idx = jnp.where(take, iv, best_idx)

    # Emit NCHW directly (lane dim = Ho*Wo): lane-dense store, and the wrapper
    # needs no output transpose (only a free contiguous reshape).
    pooled_ref[0] = best.reshape(Ho * Wo, C).T                # (C, Ho*Wo)
    idx_ref[0] = best_idx.reshape(Ho * Wo, C).T


# ---------------------------------------------------------------------------
# Wrapper: NCHW in / NCHW out, exactly like the PyTorch module.
# ---------------------------------------------------------------------------
def encoder_forward(x_nchw, params):
    N, Cin, H, W = x_nchw.shape
    Cout = params["w1"].shape[-1]
    Ho, Wo = H // 2, W // 2

    # Single input relayout pass (NCHW -> NHWC); outputs need no transpose.
    x = jnp.transpose(x_nchw, (0, 2, 3, 1)).astype(jnp.float32)
    w1 = params["w1"].reshape(9 * Cin, Cout)          # HWIO -> im2col layout
    w2 = params["w2"].reshape(9 * Cout, Cout)

    # TODO(synk): for realistic VGG sizes, also tile H (2-row halo via manual
    # DMA) and Cout (128/256-wide) in the grid so blocks fit v7x's 64 MiB VMEM
    # and feed both TensorCores; whole-image blocks are fine at these shapes.
    pooled, idx = pl.pallas_call(
        _encoder_fused_kernel,
        out_shape=(
            jax.ShapeDtypeStruct((N, Cout, Ho * Wo), jnp.float32),
            jax.ShapeDtypeStruct((N, Cout, Ho * Wo), jnp.int32),
        ),
        grid=(N,),
        in_specs=[
            pl.BlockSpec((1, H, W, Cin), lambda n: (n, 0, 0, 0)),
            pl.BlockSpec((9 * Cin, Cout), lambda n: (0, 0)),
            pl.BlockSpec((1, Cout), lambda n: (0, 0)),
            pl.BlockSpec((1, Cout), lambda n: (0, 0)),
            pl.BlockSpec((9 * Cout, Cout), lambda n: (0, 0)),
            pl.BlockSpec((1, Cout), lambda n: (0, 0)),
            pl.BlockSpec((1, Cout), lambda n: (0, 0)),
        ],
        out_specs=(
            pl.BlockSpec((1, Cout, Ho * Wo), lambda n: (n, 0, 0)),
            pl.BlockSpec((1, Cout, Ho * Wo), lambda n: (n, 0, 0)),
        ),
        scratch_shapes=[
            pltpu.VMEM((H + 2, W + 2, Cin), jnp.float32),
            pltpu.VMEM((H + 2, W + 2, Cout), jnp.float32),
        ],
        compiler_params=pltpu.CompilerParams(
            dimension_semantics=("parallel",),
            vmem_limit_bytes=64 * 1024 * 1024),
    )(x, w1,
      params["scale1"].reshape(1, Cout), params["bias1"].reshape(1, Cout),
      w2,
      params["scale2"].reshape(1, Cout), params["bias2"].reshape(1, Cout))

    pooled_nchw = pooled.reshape(N, Cout, Ho, Wo)     # contiguous, free
    idx_nchw = idx.reshape(N, Cout, Ho, Wo)
    # TODO(synk): PyTorch returns int64 indices; kept int32 (JAX x64 disabled).
    return (pooled_nchw, idx_nchw), (N, Cout, H, W)


def make_params(key, n_in, n_out, eps=1e-5):
    ks = jax.random.split(key, 10)

    def fold_bn(gamma, beta, mean, var):
        scale = gamma / jnp.sqrt(var + eps)
        return scale, beta - mean * scale

    w1 = 0.1 * jax.random.normal(ks[0], (3, 3, n_in, n_out), jnp.float32)
    g1 = jax.random.uniform(ks[1], (n_out,), minval=0.5, maxval=1.5)
    b1 = 0.1 * jax.random.normal(ks[2], (n_out,))
    m1 = 0.1 * jax.random.normal(ks[3], (n_out,))
    v1 = jax.random.uniform(ks[4], (n_out,), minval=0.5, maxval=1.5)
    s1, bb1 = fold_bn(g1, b1, m1, v1)

    w2 = 0.1 * jax.random.normal(ks[5], (3, 3, n_out, n_out), jnp.float32)
    g2 = jax.random.uniform(ks[6], (n_out,), minval=0.5, maxval=1.5)
    b2 = 0.1 * jax.random.normal(ks[7], (n_out,))
    m2 = 0.1 * jax.random.normal(ks[8], (n_out,))
    v2 = jax.random.uniform(ks[9], (n_out,), minval=0.5, maxval=1.5)
    s2, bb2 = fold_bn(g2, b2, m2, v2)

    return {"w1": w1, "scale1": s1, "bias1": bb1,
            "w2": w2, "scale2": s2, "bias2": bb2}


def _reference_forward(x_nchw, params):
    """Pure-JAX reference (XLA conv) for the correctness sanity check."""
    x = jnp.transpose(x_nchw, (0, 2, 3, 1)).astype(jnp.float32)

    def block(x, w, s, b):
        y = jax.lax.conv_general_dilated(
            x, w, window_strides=(1, 1), padding="SAME",
            dimension_numbers=("NHWC", "HWIO", "NHWC"))
        return jnp.maximum(y * s + b, 0.0)

    y = block(x, params["w1"], params["scale1"], params["bias1"])
    y = block(y, params["w2"], params["scale2"], params["bias2"])
    N, H, W, C = y.shape
    yr = y.reshape(N, H // 2, 2, W // 2, 2, C)
    yr = jnp.transpose(yr, (0, 1, 3, 5, 2, 4)).reshape(N, H // 2, W // 2, C, 4)
    pooled = yr.max(-1)
    win = jnp.argmax(yr, -1).astype(jnp.int32)          # first max wins
    oh = jax.lax.broadcasted_iota(jnp.int32, win.shape, 1)
    ow = jax.lax.broadcasted_iota(jnp.int32, win.shape, 2)
    idx = (2 * oh + win // 2) * W + (2 * ow + win % 2)
    return (jnp.transpose(pooled, (0, 3, 1, 2)),
            jnp.transpose(idx, (0, 3, 1, 2)),
            jnp.transpose(y, (0, 3, 1, 2)).shape)


if __name__ == "__main__":
    key = jax.random.PRNGKey(0)
    k_x, k_p = jax.random.split(key)

    N, C_IN, C_OUT, H, W = 2, 4, 8, 16, 16
    x = jax.random.normal(k_x, (N, C_IN, H, W), jnp.float32)
    params = make_params(k_p, C_IN, C_OUT)

    (pooled, idx), out_size = encoder_forward(x, params)
    jax.block_until_ready((pooled, idx))

    # sanity check against pure-JAX reference
    ref_pooled, ref_idx, ref_size = _reference_forward(x, params)
    np.testing.assert_allclose(np.asarray(pooled), np.asarray(ref_pooled),
                               rtol=1e-5, atol=1e-5)
    np.testing.assert_array_equal(np.asarray(idx), np.asarray(ref_idx))
    assert tuple(out_size) == tuple(ref_size) == (N, C_OUT, H, W)
    assert pooled.shape == (N, C_OUT, H // 2, W // 2)
    assert idx.shape == (N, C_OUT, H // 2, W // 2)

    print("KERNEL_OK")
</pallas_src>

<mosaic_0001>
module attributes {stable_mosaic.version = 11 : i64} {
  func.func @_encoder_fused_kernel(%arg0: i32, %arg1: memref<1x16x16x4xf32, #tpu.memory_space<vmem>>, %arg2: memref<36x8xf32, #tpu.memory_space<vmem>>, %arg3: memref<1x8xf32, #tpu.memory_space<vmem>>, %arg4: memref<1x8xf32, #tpu.memory_space<vmem>>, %arg5: memref<72x8xf32, #tpu.memory_space<vmem>>, %arg6: memref<1x8xf32, #tpu.memory_space<vmem>>, %arg7: memref<1x8xf32, #tpu.memory_space<vmem>>, %arg8: memref<1x8x64xf32, #tpu.memory_space<vmem>>, %arg9: memref<1x8x64xi32, #tpu.memory_space<vmem>>, %arg10: memref<18x18x4xf32, #tpu.memory_space<vmem>>, %arg11: memref<18x18x8xf32, #tpu.memory_space<vmem>>) attributes {dimension_semantics = [#tpu.dimension_semantics<parallel>], iteration_bounds = array<i64: 2>, scalar_prefetch = 0 : i64, scratch_operands = 2 : i64, tpu.core_type = #tpu.core_type<tc>, window_params = [{transform_indices = @transform_0, window_bounds = array<i64: 1, 16, 16, 4>}, {pipeline_mode = #tpu.pipeline_mode<synchronous>, transform_indices = @transform_1, window_bounds = array<i64: 36, 8>}, {pipeline_mode = #tpu.pipeline_mode<synchronous>, transform_indices = @transform_2, window_bounds = array<i64: 1, 8>}, {pipeline_mode = #tpu.pipeline_mode<synchronous>, transform_indices = @transform_3, window_bounds = array<i64: 1, 8>}, {pipeline_mode = #tpu.pipeline_mode<synchronous>, transform_indices = @transform_4, window_bounds = array<i64: 72, 8>}, {pipeline_mode = #tpu.pipeline_mode<synchronous>, transform_indices = @transform_5, window_bounds = array<i64: 1, 8>}, {pipeline_mode = #tpu.pipeline_mode<synchronous>, transform_indices = @transform_6, window_bounds = array<i64: 1, 8>}, {transform_indices = @transform_7, window_bounds = array<i64: 1, 8, 64>}, {transform_indices = @transform_8, window_bounds = array<i64: 1, 8, 64>}]} {
    %cst = arith.constant 0.000000e+00 : f32
    %0 = vector.broadcast %cst : f32 to vector<18x18x4xf32>
    %c0 = arith.constant 0 : index
    %c0_0 = arith.constant 0 : index
    %c0_1 = arith.constant 0 : index
    %1 = vector.load %arg10[%c0, %c0_0, %c0_1] : memref<18x18x4xf32, #tpu.memory_space<vmem>>, vector<18x18x4xf32>
    tpu.vector_store %arg10[%c0, %c0_0, %c0_1], %0 {strides = array<i32>} : memref<18x18x4xf32, #tpu.memory_space<vmem>>, vector<18x18x4xf32>,
    %cst_2 = arith.constant 0.000000e+00 : f32
    %2 = vector.broadcast %cst_2 : f32 to vector<18x18x8xf32>
    %c0_3 = arith.constant 0 : index
    %c0_4 = arith.constant 0 : index
    %c0_5 = arith.constant 0 : index
    %3 = vector.load %arg11[%c0_3, %c0_4, %c0_5] : memref<18x18x8xf32, #tpu.memory_space<vmem>>, vector<18x18x8xf32>
    tpu.vector_store %arg11[%c0_3, %c0_4, %c0_5], %2 {strides = array<i32>} : memref<18x18x8xf32, #tpu.memory_space<vmem>>, vector<18x18x8xf32>,
    %c0_6 = arith.constant 0 : index
    %c0_7 = arith.constant 0 : index
    %c0_8 = arith.constant 0 : index
    %c0_9 = arith.constant 0 : index
    %4 = vector.load %arg1[%c0_6, %c0_7, %c0_8, %c0_9] : memref<1x16x16x4xf32, #tpu.memory_space<vmem>>, vector<1x16x16x4xf32>
    %5 = vector.shape_cast %4 : vector<1x16x16x4xf32> to vector<16x16x4xf32>
    %c1 = arith.constant 1 : index
    %c1_10 = arith.constant 1 : index
    %c0_11 = arith.constant 0 : index
    %6 = vector.load %arg10[%c1, %c1_10, %c0_11] : memref<18x18x4xf32, #tpu.memory_space<vmem>>, vector<16x16x4xf32>
    tpu.vector_store %arg10[%c1, %c1_10, %c0_11], %5 {strides = array<i32>} : memref<18x18x4xf32, #tpu.memory_space<vmem>>, vector<16x16x4xf32>,
    %c0_12 = arith.constant 0 : index
    %c0_13 = arith.constant 0 : index
    %c0_14 = arith.constant 0 : index
    %7 = vector.load %arg10[%c0_12, %c0_13, %c0_14] : memref<18x18x4xf32, #tpu.memory_space<vmem>>, vector<16x16x4xf32>
    %8 = vector.shape_cast %7 : vector<16x16x4xf32> to vector<256x4xf32>
    %c0_15 = arith.constant 0 : index
    %c1_16 = arith.constant 1 : index
    %c0_17 = arith.constant 0 : index
    %9 = vector.load %arg10[%c0_15, %c1_16, %c0_17] : memref<18x18x4xf32, #tpu.memory_space<vmem>>, vector<16x16x4xf32>
    %10 = vector.shape_cast %9 : vector<16x16x4xf32> to vector<256x4xf32>
    %c0_18 = arith.constant 0 : index
    %c2 = arith.constant 2 : index
    %c0_19 = arith.constant 0 : index
    %11 = vector.load %arg10[%c0_18, %c2, %c0_19] : memref<18x18x4xf32, #tpu.memory_space<vmem>>, vector<16x16x4xf32>
    %12 = vector.shape_cast %11 : vector<16x16x4xf32> to vector<256x4xf32>
    %c1_20 = arith.constant 1 : index
    %c0_21 = arith.constant 0 : index
    %c0_22 = arith.constant 0 : index
    %13 = vector.load %arg10[%c1_20, %c0_21, %c0_22] : memref<18x18x4xf32, #tpu.memory_space<vmem>>, vector<16x16x4xf32>
    %14 = vector.shape_cast %13 : vector<16x16x4xf32> to vector<256x4xf32>
    %c1_23 = arith.constant 1 : index
    %c1_24 = arith.constant 1 : index
    %c0_25 = arith.constant 0 : index
    %15 = vector.load %arg10[%c1_23, %c1_24, %c0_25] : memref<18x18x4xf32, #tpu.memory_space<vmem>>, vector<16x16x4xf32>
    %16 = vector.shape_cast %15 : vector<16x16x4xf32> to vector<256x4xf32>
    %c1_26 = arith.constant 1 : index
    %c2_27 = arith.constant 2 : index
    %c0_28 = arith.constant 0 : index
    %17 = vector.load %arg10[%c1_26, %c2_27, %c0_28] : memref<18x18x4xf32, #tpu.memory_space<vmem>>, vector<16x16x4xf32>
    %18 = vector.shape_cast %17 : vector<16x16x4xf32> to vector<256x4xf32>
    %c2_29 = arith.constant 2 : index
    %c0_30 = arith.constant 0 : index
    %c0_31 = arith.constant 0 : index
    %19 = vector.load %arg10[%c2_29, %c0_30, %c0_31] : memref<18x18x4xf32, #tpu.memory_space<vmem>>, vector<16x16x4xf32>
    %20 = vector.shape_cast %19 : vector<16x16x4xf32> to vector<256x4xf32>
    %c2_32 = arith.constant 2 : index
    %c1_33 = arith.constant 1 : index
    %c0_34 = arith.constant 0 : index
    %21 = vector.load %arg10[%c2_32, %c1_33, %c0_34] : memref<18x18x4xf32, #tpu.memory_space<vmem>>, vector<16x16x4xf32>
    %22 = vector.shape_cast %21 : vector<16x16x4xf32> to vector<256x4xf32>
    %c2_35 = arith.constant 2 : index
    %c2_36 = arith.constant 2 : index
    %c0_37 = arith.constant 0 : index
    %23 = vector.load %arg10[%c2_35, %c2_36, %c0_37] : memref<18x18x4xf32, #tpu.memory_space<vmem>>, vector<16x16x4xf32>
    %24 = vector.shape_cast %23 : vector<16x16x4xf32> to vector<256x4xf32>
    %25 = tpu.concatenate %8, %10, %12, %14, %16, %18, %20, %22, %24 in 1 : vector<256x4xf32>, vector<256x4xf32>, vector<256x4xf32>, vector<256x4xf32>, vector<256x4xf32>, vector<256x4xf32>, vector<256x4xf32>, vector<256x4xf32>, vector<256x4xf32> -> vector<256x36xf32>
    %c0_38 = arith.constant 0 : index
    %c0_39 = arith.constant 0 : index
    %26 = vector.load %arg2[%c0_38, %c0_39] : memref<36x8xf32, #tpu.memory_space<vmem>>, vector<36x8xf32>
    %cst_40 = arith.constant dense<0.000000e+00> : vector<256x8xf32>
    %27 = tpu.matmul %25, %26, %cst_40 {dimension_numbers = #tpu.dot_dimension_numbers<[1], [0], [0], [1], [0, 0, 1, 1], [], []>} : vector<256x36xf32>, vector<36x8xf32>, vector<256x8xf32> -> vector<256x8xf32>
    %c0_41 = arith.constant 0 : index
    %c0_42 = arith.constant 0 : index
    %28 = vector.load %arg3[%c0_41, %c0_42] : memref<1x8xf32, #tpu.memory_space<vmem>>, vector<1x8xf32>
    %29 = vector.broadcast %28 : vector<1x8xf32> to vector<256x8xf32>
    %30 = arith.mulf %27, %29 : vector<256x8xf32>
    %c0_43 = arith.constant 0 : index
    %c0_44 = arith.constant 0 : index
    %31 = vector.load %arg4[%c0_43, %c0_44] : memref<1x8xf32, #tpu.memory_space<vmem>>, vector<1x8xf32>
    %32 = vector.broadcast %31 : vector<1x8xf32> to vector<256x8xf32>
    %33 = arith.addf %30, %32 : vector<256x8xf32>
    %cst_45 = arith.constant 0.000000e+00 : f32
    %34 = vector.broadcast %cst_45 : f32 to vector<256x8xf32>
    %35 = arith.maximumf %33, %34 : vector<256x8xf32>
    %36 = vector.shape_cast %35 : vector<256x8xf32> to vector<16x16x8xf32>
    %c1_46 = arith.constant 1 : index
    %c1_47 = arith.constant 1 : index
    %c0_48 = arith.constant 0 : index
    %37 = vector.load %arg11[%c1_46, %c1_47, %c0_48] : memref<18x18x8xf32, #tpu.memory_space<vmem>>, vector<16x16x8xf32>
    tpu.vector_store %arg11[%c1_46, %c1_47, %c0_48], %36 {strides = array<i32>} : memref<18x18x8xf32, #tpu.memory_space<vmem>>, vector<16x16x8xf32>,
    %c0_49 = arith.constant 0 : index
    %c0_50 = arith.constant 0 : index
    %c0_51 = arith.constant 0 : index
    %38 = vector.load %arg11[%c0_49, %c0_50, %c0_51] : memref<18x18x8xf32, #tpu.memory_space<vmem>>, vector<16x16x8xf32>
    %39 = vector.shape_cast %38 : vector<16x16x8xf32> to vector<256x8xf32>
    %c0_52 = arith.constant 0 : index
    %c1_53 = arith.constant 1 : index
    %c0_54 = arith.constant 0 : index
    %40 = vector.load %arg11[%c0_52, %c1_53, %c0_54] : memref<18x18x8xf32, #tpu.memory_space<vmem>>, vector<16x16x8xf32>
    %41 = vector.shape_cast %40 : vector<16x16x8xf32> to vector<256x8xf32>
    %c0_55 = arith.constant 0 : index
    %c2_56 = arith.constant 2 : index
    %c0_57 = arith.constant 0 : index
    %42 = vector.load %arg11[%c0_55, %c2_56, %c0_57] : memref<18x18x8xf32, #tpu.memory_space<vmem>>, vector<16x16x8xf32>
    %43 = vector.shape_cast %42 : vector<16x16x8xf32> to vector<256x8xf32>
    %c1_58 = arith.constant 1 : index
    %c0_59 = arith.constant 0 : index
    %c0_60 = arith.constant 0 : index
    %44 = vector.load %arg11[%c1_58, %c0_59, %c0_60] : memref<18x18x8xf32, #tpu.memory_space<vmem>>, vector<16x16x8xf32>
    %45 = vector.shape_cast %44 : vector<16x16x8xf32> to vector<256x8xf32>
    %c1_61 = arith.constant 1 : index
    %c1_62 = arith.constant 1 : index
    %c0_63 = arith.constant 0 : index
    %46 = vector.load %arg11[%c1_61, %c1_62, %c0_63] : memref<18x18x8xf32, #tpu.memory_space<vmem>>, vector<16x16x8xf32>
    %47 = vector.shape_cast %46 : vector<16x16x8xf32> to vector<256x8xf32>
    %c1_64 = arith.constant 1 : index
    %c2_65 = arith.constant 2 : index
    %c0_66 = arith.constant 0 : index
    %48 = vector.load %arg11[%c1_64, %c2_65, %c0_66] : memref<18x18x8xf32, #tpu.memory_space<vmem>>, vector<16x16x8xf32>
    %49 = vector.shape_cast %48 : vector<16x16x8xf32> to vector<256x8xf32>
    %c2_67 = arith.constant 2 : index
    %c0_68 = arith.constant 0 : index
    %c0_69 = arith.constant 0 : index
    %50 = vector.load %arg11[%c2_67, %c0_68, %c0_69] : memref<18x18x8xf32, #tpu.memory_space<vmem>>, vector<16x16x8xf32>
    %51 = vector.shape_cast %50 : vector<16x16x8xf32> to vector<256x8xf32>
    %c2_70 = arith.constant 2 : index
    %c1_71 = arith.constant 1 : index
    %c0_72 = arith.constant 0 : index
    %52 = vector.load %arg11[%c2_70, %c1_71, %c0_72] : memref<18x18x8xf32, #tpu.memory_space<vmem>>, vector<16x16x8xf32>
    %53 = vector.shape_cast %52 : vector<16x16x8xf32> to vector<256x8xf32>
    %c2_73 = arith.constant 2 : index
    %c2_74 = arith.constant 2 : index
    %c0_75 = arith.constant 0 : index
    %54 = vector.load %arg11[%c2_73, %c2_74, %c0_75] : memref<18x18x8xf32, #tpu.memory_space<vmem>>, vector<16x16x8xf32>
    %55 = vector.shape_cast %54 : vector<16x16x8xf32> to vector<256x8xf32>
    %56 = tpu.concatenate %39, %41, %43, %45, %47, %49, %51, %53, %55 in 1 : vector<256x8xf32>, vector<256x8xf32>, vector<256x8xf32>, vector<256x8xf32>, vector<256x8xf32>, vector<256x8xf32>, vector<256x8xf32>, vector<256x8xf32>, vector<256x8xf32> -> vector<256x72xf32>
    %c0_76 = arith.constant 0 : index
    %c0_77 = arith.constant 0 : index
    %57 = vector.load %arg5[%c0_76, %c0_77] : memref<72x8xf32, #tpu.memory_space<vmem>>, vector<72x8xf32>
    %cst_78 = arith.constant dense<0.000000e+00> : vector<256x8xf32>
    %58 = tpu.matmul %56, %57, %cst_78 {dimension_numbers = #tpu.dot_dimension_numbers<[1], [0], [0], [1], [0, 0, 1, 1], [], []>} : vector<256x72xf32>, vector<72x8xf32>, vector<256x8xf32> -> vector<256x8xf32>
    %c0_79 = arith.constant 0 : index
    %c0_80 = arith.constant 0 : index
    %59 = vector.load %arg6[%c0_79, %c0_80] : memref<1x8xf32, #tpu.memory_space<vmem>>, vector<1x8xf32>
    %60 = vector.broadcast %59 : vector<1x8xf32> to vector<256x8xf32>
    %61 = arith.mulf %58, %60 : vector<256x8xf32>
    %c0_81 = arith.constant 0 : index
    %c0_82 = arith.constant 0 : index
    %62 = vector.load %arg7[%c0_81, %c0_82] : memref<1x8xf32, #tpu.memory_space<vmem>>, vector<1x8xf32>
    %63 = vector.broadcast %62 : vector<1x8xf32> to vector<256x8xf32>
    %64 = arith.addf %61, %63 : vector<256x8xf32>
    %cst_83 = arith.constant 0.000000e+00 : f32
    %65 = vector.broadcast %cst_83 : f32 to vector<256x8xf32>
    %66 = arith.maximumf %64, %65 : vector<256x8xf32>
    %67 = vector.shape_cast %66 : vector<256x8xf32> to vector<16x16x8xf32>
    %c1_84 = arith.constant 1 : index
    %c1_85 = arith.constant 1 : index
    %c0_86 = arith.constant 0 : index
    %68 = vector.load %arg11[%c1_84, %c1_85, %c0_86] : memref<18x18x8xf32, #tpu.memory_space<vmem>>, vector<16x16x8xf32>
    tpu.vector_store %arg11[%c1_84, %c1_85, %c0_86], %67 {strides = array<i32>} : memref<18x18x8xf32, #tpu.memory_space<vmem>>, vector<16x16x8xf32>,
    %69 = tpu.iota {dimensions = array<i32: 0>} : vector<8x8x8xi32>
    %70 = tpu.iota {dimensions = array<i32: 1>} : vector<8x8x8xi32>
    %c1_87 = arith.constant 1 : index
    %c1_88 = arith.constant 1 : index
    %c0_89 = arith.constant 0 : index
    %71 = tpu.strided_load %arg11[%c1_87, %c1_88, %c0_89] {strides = array<i32: 2, 2, 1>} : memref<18x18x8xf32, #tpu.memory_space<vmem>>, vector<8x8x8xf32>
    %c2_i32 = arith.constant 2 : i32
    %72 = vector.broadcast %c2_i32 : i32 to vector<8x8x8xi32>
    %73 = arith.muli %72, %69 : vector<8x8x8xi32>
    %c16_i32 = arith.constant 16 : i32
    %74 = vector.broadcast %c16_i32 : i32 to vector<8x8x8xi32>
    %75 = arith.muli %73, %74 : vector<8x8x8xi32>
    %c2_i32_90 = arith.constant 2 : i32
    %76 = vector.broadcast %c2_i32_90 : i32 to vector<8x8x8xi32>
    %77 = arith.muli %76, %70 : vector<8x8x8xi32>
    %78 = arith.addi %75, %77 : vector<8x8x8xi32>
    %c1_91 = arith.constant 1 : index
    %c2_92 = arith.constant 2 : index
    %c0_93 = arith.constant 0 : index
    %79 = tpu.strided_load %arg11[%c1_91, %c2_92, %c0_93] {strides = array<i32: 2, 2, 1>} : memref<18x18x8xf32, #tpu.memory_space<vmem>>, vector<8x8x8xf32>
    %c2_i32_94 = arith.constant 2 : i32
    %80 = vector.broadcast %c2_i32_94 : i32 to vector<8x8x8xi32>
    %81 = arith.muli %80, %69 : vector<8x8x8xi32>
    %c0_i32 = arith.constant 0 : i32
    %82 = vector.broadcast %c0_i32 : i32 to vector<8x8x8xi32>
    %83 = arith.addi %81, %82 : vector<8x8x8xi32>
    %c16_i32_95 = arith.constant 16 : i32
    %84 = vector.broadcast %c16_i32_95 : i32 to vector<8x8x8xi32>
    %85 = arith.muli %83, %84 : vector<8x8x8xi32>
    %c2_i32_96 = arith.constant 2 : i32
    %86 = vector.broadcast %c2_i32_96 : i32 to vector<8x8x8xi32>
    %87 = arith.muli %86, %70 : vector<8x8x8xi32>
    %c1_i32 = arith.constant 1 : i32
    %88 = vector.broadcast %c1_i32 : i32 to vector<8x8x8xi32>
    %89 = arith.addi %87, %88 : vector<8x8x8xi32>
    %90 = arith.addi %85, %89 : vector<8x8x8xi32>
    %91 = arith.cmpf ogt, %79, %71 : vector<8x8x8xf32>
    %92 = arith.select %91, %79, %71 : vector<8x8x8xi1>, vector<8x8x8xf32>
    %93 = arith.select %91, %90, %78 : vector<8x8x8xi1>, vector<8x8x8xi32>
    %c2_97 = arith.constant 2 : index
    %c1_98 = arith.constant 1 : index
    %c0_99 = arith.constant 0 : index
    %94 = tpu.strided_load %arg11[%c2_97, %c1_98, %c0_99] {strides = array<i32: 2, 2, 1>} : memref<18x18x8xf32, #tpu.memory_space<vmem>>, vector<8x8x8xf32>
    %c2_i32_100 = arith.constant 2 : i32
    %95 = vector.broadcast %c2_i32_100 : i32 to vector<8x8x8xi32>
    %96 = arith.muli %95, %69 : vector<8x8x8xi32>
    %c1_i32_101 = arith.constant 1 : i32
    %97 = vector.broadcast %c1_i32_101 : i32 to vector<8x8x8xi32>
    %98 = arith.addi %96, %97 : vector<8x8x8xi32>
    %c16_i32_102 = arith.constant 16 : i32
    %99 = vector.broadcast %c16_i32_102 : i32 to vector<8x8x8xi32>
    %100 = arith.muli %98, %99 : vector<8x8x8xi32>
    %c2_i32_103 = arith.constant 2 : i32
    %101 = vector.broadcast %c2_i32_103 : i32 to vector<8x8x8xi32>
    %102 = arith.muli %101, %70 : vector<8x8x8xi32>
    %c0_i32_104 = arith.constant 0 : i32
    %103 = vector.broadcast %c0_i32_104 : i32 to vector<8x8x8xi32>
    %104 = arith.addi %102, %103 : vector<8x8x8xi32>
    %105 = arith.addi %100, %104 : vector<8x8x8xi32>
    %106 = arith.cmpf ogt, %94, %92 : vector<8x8x8xf32>
    %107 = arith.select %106, %94, %92 : vector<8x8x8xi1>, vector<8x8x8xf32>
    %108 = arith.select %106, %105, %93 : vector<8x8x8xi1>, vector<8x8x8xi32>
    %c2_105 = arith.constant 2 : index
    %c2_106 = arith.constant 2 : index
    %c0_107 = arith.constant 0 : index
    %109 = tpu.strided_load %arg11[%c2_105, %c2_106, %c0_107] {strides = array<i32: 2, 2, 1>} : memref<18x18x8xf32, #tpu.memory_space<vmem>>, vector<8x8x8xf32>
    %c2_i32_108 = arith.constant 2 : i32
    %110 = vector.broadcast %c2_i32_108 : i32 to vector<8x8x8xi32>
    %111 = arith.muli %110, %69 : vector<8x8x8xi32>
    %c1_i32_109 = arith.constant 1 : i32
    %112 = vector.broadcast %c1_i32_109 : i32 to vector<8x8x8xi32>
    %113 = arith.addi %111, %112 : vector<8x8x8xi32>
    %c16_i32_110 = arith.constant 16 : i32
    %114 = vector.broadcast %c16_i32_110 : i32 to vector<8x8x8xi32>
    %115 = arith.muli %113, %114 : vector<8x8x8xi32>
    %c2_i32_111 = arith.constant 2 : i32
    %116 = vector.broadcast %c2_i32_111 : i32 to vector<8x8x8xi32>
    %117 = arith.muli %116, %70 : vector<8x8x8xi32>
    %c1_i32_112 = arith.constant 1 : i32
    %118 = vector.broadcast %c1_i32_112 : i32 to vector<8x8x8xi32>
    %119 = arith.addi %117, %118 : vector<8x8x8xi32>
    %120 = arith.addi %115, %119 : vector<8x8x8xi32>
    %121 = arith.cmpf ogt, %109, %107 : vector<8x8x8xf32>
    %122 = arith.select %121, %109, %107 : vector<8x8x8xi1>, vector<8x8x8xf32>
    %123 = arith.select %121, %120, %108 : vector<8x8x8xi1>, vector<8x8x8xi32>
    %124 = vector.shape_cast %122 : vector<8x8x8xf32> to vector<64x8xf32>
    %125 = tpu.transpose %124, [1, 0] : vector<64x8xf32> -> vector<8x64xf32>
    %c0_113 = arith.constant 0 : index
    %c0_114 = arith.constant 0 : index
    %c0_115 = arith.constant 0 : index
    %126 = vector.load %arg8[%c0_113, %c0_114, %c0_115] : memref<1x8x64xf32, #tpu.memory_space<vmem>>, vector<1x8x64xf32>
    %127 = vector.shape_cast %126 : vector<1x8x64xf32> to vector<8x64xf32>
    %128 = vector.shape_cast %125 : vector<8x64xf32> to vector<1x8x64xf32>
    tpu.vector_store %arg8[%c0_113, %c0_114, %c0_115], %128 {strides = array<i32>} : memref<1x8x64xf32, #tpu.memory_space<vmem>>, vector<1x8x64xf32>,
    %129 = vector.shape_cast %123 : vector<8x8x8xi32> to vector<64x8xi32>
    %130 = tpu.transpose %129, [1, 0] : vector<64x8xi32> -> vector<8x64xi32>
    %c0_116 = arith.constant 0 : index
    %c0_117 = arith.constant 0 : index
    %c0_118 = arith.constant 0 : index
    %131 = vector.load %arg9[%c0_116, %c0_117, %c0_118] : memref<1x8x64xi32, #tpu.memory_space<vmem>>, vector<1x8x64xi32>
    %132 = vector.shape_cast %131 : vector<1x8x64xi32> to vector<8x64xi32>
    %133 = vector.shape_cast %130 : vector<8x64xi32> to vector<1x8x64xi32>
    tpu.vector_store %arg9[%c0_116, %c0_117, %c0_118], %133 {strides = array<i32>} : memref<1x8x64xi32, #tpu.memory_space<vmem>>, vector<1x8x64xi32>,
    return
  }
  func.func @transform_0(%arg0: i32) -> (i32, i32, i32, i32) {
    %c0_i32 = arith.constant 0 : i32
    %c0_i32_0 = arith.constant 0 : i32
    %c0_i32_1 = arith.constant 0 : i32
    %c0_i32_2 = arith.constant 0 : i32
    return %arg0, %c0_i32, %c0_i32_0, %c0_i32_1 : i32, i32, i32, i32
  }
  func.func @transform_1(%arg0: i32) -> (i32, i32) {
    %c0_i32 = arith.constant 0 : i32
    %c0_i32_0 = arith.constant 0 : i32
    %c0_i32_1 = arith.constant 0 : i32
    return %c0_i32, %c0_i32_0 : i32, i32
  }
  func.func @transform_2(%arg0: i32) -> (i32, i32) {
    %c0_i32 = arith.constant 0 : i32
    %c0_i32_0 = arith.constant 0 : i32
    %c0_i32_1 = arith.constant 0 : i32
    return %c0_i32, %c0_i32_0 : i32, i32
  }
  func.func @transform_3(%arg0: i32) -> (i32, i32) {
    %c0_i32 = arith.constant 0 : i32
    %c0_i32_0 = arith.constant 0 : i32
    %c0_i32_1 = arith.constant 0 : i32
    return %c0_i32, %c0_i32_0 : i32, i32
  }
  func.func @transform_4(%arg0: i32) -> (i32, i32) {
    %c0_i32 = arith.constant 0 : i32
    %c0_i32_0 = arith.constant 0 : i32
    %c0_i32_1 = arith.constant 0 : i32
    return %c0_i32, %c0_i32_0 : i32, i32
  }
  func.func @transform_5(%arg0: i32) -> (i32, i32) {
    %c0_i32 = arith.constant 0 : i32
    %c0_i32_0 = arith.constant 0 : i32
    %c0_i32_1 = arith.constant 0 : i32
    return %c0_i32, %c0_i32_0 : i32, i32
  }
  func.func @transform_6(%arg0: i32) -> (i32, i32) {
    %c0_i32 = arith.constant 0 : i32
    %c0_i32_0 = arith.constant 0 : i32
    %c0_i32_1 = arith.constant 0 : i32
    return %c0_i32, %c0_i32_0 : i32, i32
  }
  func.func @transform_7(%arg0: i32) -> (i32, i32, i32) {
    %c0_i32 = arith.constant 0 : i32
    %c0_i32_0 = arith.constant 0 : i32
    %c0_i32_1 = arith.constant 0 : i32
    return %arg0, %c0_i32, %c0_i32_0 : i32, i32, i32
  }
  func.func @transform_8(%arg0: i32) -> (i32, i32, i32) {
    %c0_i32 = arith.constant 0 : i32
    %c0_i32_0 = arith.constant 0 : i32
    %c0_i32_1 = arith.constant 0 : i32
    return %arg0, %c0_i32, %c0_i32_0 : i32, i32, i32
  }
}

</mosaic_0001>

<bundles_post_ra>
// kernel: tpu_custom_call.1
= control target key start
LH: loop header
LB: loop body
LE: loop exit
PB: predicated region body
PF: predicated region fallthrough
CT: control target
= control target key end

     0   :  { %s9523_s0 = inlined_call_operand.hbm [shape: f32[2,16,16,4], index: 0, kind: input, shape index: {}]   ;;  %s9524_s1 = inlined_call_operand.hbm [shape: f32[36,8], index: 1, kind: input, shape index: {}]   ;;  %s9525_s2 = inlined_call_operand.hbm [shape: f32[1,8], index: 2, kind: input, shape index: {}]   ;;  %s9526_s3 = inlined_call_operand.hbm [shape: f32[1,8], index: 3, kind: input, shape index: {}]   ;;  %s9527_s4 = inlined_call_operand.hbm [shape: f32[72,8], index: 4, kind: input, shape index: {}]   ;;  %s9528_s5 = inlined_call_operand.hbm [shape: f32[1,8], index: 5, kind: input, shape index: {}]   ;;  %s9529_s6 = inlined_call_operand.hbm [shape: f32[1,8], index: 6, kind: input, shape index: {}]   ;;  %s9530_s7 = inlined_call_operand.hbm [shape: f32[2,8,64], index: 7, kind: output, shape index: {0}]   ;;  %s9531_s8 = inlined_call_operand.hbm [shape: s32[2,8,64], index: 8, kind: output, shape index: {1}]  }
   0x1   :  { %9577 = sst [smem:[#allocation171_spill]] %s9524_s1 }
   0x2   :  { %14 = vsyncpa [#allocation5], 0 }
   0x3   :  { %16 = vsyncpa [#allocation5 + $0x1], 0 }
   0x4   :  { %17 = vsyncpa [#allocation8], 0 }
   0x5   :  { %18 = vsyncpa [#allocation11], 0 }
   0x6   :  { %19 = vsyncpa [#allocation14], 0 }
   0x7   :  { %20 = vsyncpa [#allocation6], 0 }
   0x8   :  { %22 = vsyncpa [#allocation6 + $0x1], 0 }
   0x9   :  { %23 = vsyncpa [#allocation18], 0 }
   0xa   :  { %25 = vsyncpa [#allocation18 + $0x1], 0  ;;  %s6020_s27 = smov 0   ;;  %s6022_s28 = smov 0  }
   0xb   :  { %s6024_s29 = smov 0   ;;  %s6026_s30 = smov 0  }
   0xc LB: > { %s5951_s9 = smov [#allocation7]   ;;  %s6041_s11 = sadd.s32 4294967295, %s5949_s30   ;;  %s5949_s30 = sphi %s6026_s30, %s10080_s30   ;;  %s5945_s29 = sphi %s6024_s29, %s10079_s29   ;;  %s5941_s28 = sphi %s6022_s28, %s10078_s28   ;;  %s5937_s27 = sphi %s6020_s27, %s10077_s27  }
   0xd   : > { %s252_s10 = sshll.u32 %s5951_s9, 4  ;;  %p5146_p0 = scmp.ge.s32.totalorder %s5949_s30, 1  ;;  %s6046_s10 = int_to_ptr.vmem [resolvable:$true] %s252_s10 }
   0xe   : > { %p9534_p1 = scmp.eq.s32.totalorder %s6041_s11, 0  ;;  %p240_p2 = scmp.lt.s32.totalorder %s5949_s30, 3 }
   0xf   : > { %s5952_s13 = smov [#allocation10]   ;;  %s5953_s16 = smov [#allocation13]  }
  0x10   : > { %p6048_p3 = pnand %p5146_p0, %p240_p2  ;;  %s277_s14 = sshll.u32 %s5952_s13, 4  ;;  %s6061_s14 = int_to_ptr.vmem [resolvable:$true] %s277_s14 }
  0x11   : > { %s301_s17 = sshll.u32 %s5953_s16, 4  ;;  %s9580_s1 = sld [smem:[#allocation171_spill]]  ;;  %s6063_s17 = int_to_ptr.vmem [resolvable:$true] %s301_s17 }
  0x12   : > { %s9578_s12 = scalar_select %p6048_p3, 1, 0 }
  0x13   : > { %p5509_p5 = pneg %p6048_p3 }
  0x15   : > { %p6057_p6 = pnand %p5509_p5, %p9534_p1 }
  0x17   : > { %s5641_s20 = scalar_lea.hbm %s9580_s1, 640  ;;  %p6073_p8 = pneg %p6057_p6 }
  0x18   : > { %p5642_p7 = scmp.ne.s32.totalorder %s9580_s1, %s5641_s20  ;;  %p5648_p11 = scmp.lt.u32.totalorder %s5641_s20, %s9580_s1 }
  0x1a   : > { %p5644_p9 = pnand %p6073_p8, %p5642_p7 }
  0x1c   : > { %p5645_p10 = pneg %p5644_p9 }
  0x1e   : > { %p5650_p12 = pnand %p5648_p11, %p5645_p10 }
  0x20   : > { %5653 = shalt.err (!%p5650_p12)
}
  0x21   : > { %s5654_s26 = scalar_lea.vmem %s6046_s10, 640  ;;  %p5662_p5 = scmp.lt.s32.totalorder %s6046_s10, %s6046_s10 }
  0x22   : > { %p5655_p13 = scmp.ne.s32.totalorder %s6046_s10, %s5654_s26  ;;  %p5663_p4 = scmp.lt.s32.totalorder %s5654_s26, %s5654_s26 }
  0x24   : > { %p5657_p0 = pnand %p5655_p13, %p6073_p8  ;;  %p5664_p7 = por %p5663_p4, %p5662_p5 }
  0x26   : > { %p5658_p2 = pneg %p5657_p0 }
  0x28   : > { %p5665_p9 = pnand %p5664_p7, %p5658_p2 }
  0x2a   : > { %5668 = shalt.err (!%p5665_p9)
}
  0x2b   : > { %s9532_s9 = smov 128   ;;  %s9536_s13 = smov 8  }
  0x2c   : > { %5512 = dma.hbm_to_vmem [thread:$0]  (!%p6057_p6), %s9580_s1, 640, %s6046_s10, [#allocation8], %s9532_s9, %s9532_s9, %s9536_s13  }
  0x2d   : > { %s5669_s21 = scalar_lea.hbm %s9526_s3, 16 }
  0x2e   : > { %p5670_p4 = scmp.ne.s32.totalorder %s9526_s3, %s5669_s21  ;;  %p5676_p12 = scmp.lt.u32.totalorder %s5669_s21, %s9526_s3 }
  0x30   : > { %p5672_p10 = pnand %p5670_p4, %p6073_p8 }
  0x32   : > { %p5673_p11 = pneg %p5672_p10 }
  0x34   : > { %p5678_p13 = pnand %p5676_p12, %p5673_p11 }
  0x36   : > { %5681 = shalt.err (!%p5678_p13)
}
  0x37   : > { %s5682_s10 = scalar_lea.vmem %s6061_s14, 16  ;;  %s5689_s16 = scalar_lea.vmem %s6061_s14, 32 }
  0x38   : > { %p5683_p0 = scmp.ne.s32.totalorder %s6061_s14, %s5682_s10  ;;  %p5690_p7 = scmp.lt.s32.totalorder %s6061_s14, %s6061_s14 }
  0x39   : > { %p5691_p9 = scmp.lt.s32.totalorder %s5689_s16, %s5682_s10 }
  0x3a   : > { %p5685_p2 = pnand %p5683_p0, %p6073_p8 }
  0x3b   : > { %p5692_p4 = por %p5691_p9, %p5690_p7 }
  0x3c   : > { %p5686_p5 = pneg %p5685_p2 }
  0x3e   : > { %p5693_p10 = pnand %p5692_p4, %p5686_p5 }
  0x40   : > { %5696 = shalt.err (!%p5693_p10)
}
  0x41   : > { %5518 = dma.hbm_to_vmem [thread:$0]  (!%p6057_p6), %s9526_s3, 16, %s6061_s14, [#allocation11]  }
  0x42   : > { %s5697_s22 = scalar_lea.hbm %s9528_s5, 16 }
  0x43   : > { %p5698_p11 = scmp.ne.s32.totalorder %s9528_s5, %s5697_s22  ;;  %p5704_p0 = scmp.lt.u32.totalorder %s5697_s22, %s9528_s5 }
  0x45   : > { %p5700_p12 = pnand %p5698_p11, %p6073_p8 }
  0x47   : > { %p5701_p13 = pneg %p5700_p12 }
  0x49   : > { %p5706_p2 = pnand %p5704_p0, %p5701_p13 }
  0x4b   : > { %5709 = shalt.err (!%p5706_p2)
}
  0x4c   : > { %s5710_s14 = scalar_lea.vmem %s6063_s17, 16  ;;  %s5717_s16 = scalar_lea.vmem %s6063_s17, 32 }
  0x4d   : > { %p5711_p5 = scmp.ne.s32.totalorder %s6063_s17, %s5710_s14  ;;  %p5718_p4 = scmp.lt.s32.totalorder %s6063_s17, %s6063_s17 }
  0x4e   : > { %p5719_p10 = scmp.lt.s32.totalorder %s5717_s16, %s5710_s14 }
  0x4f   : > { %p5713_p7 = pnand %p5711_p5, %p6073_p8 }
  0x50   : > { %p5720_p11 = por %p5719_p10, %p5718_p4 }
  0x51   : > { %p5714_p9 = pneg %p5713_p7 }
  0x53   : > { %p5721_p12 = pnand %p5720_p11, %p5714_p9 }
  0x55   : > { %5724 = shalt.err (!%p5721_p12)
}
  0x56   : > { %5524 = dma.hbm_to_vmem [thread:$0]  (!%p6057_p6), %s9528_s5, 16, %s6063_s17, [#allocation14]  }
  0x57   : > { %s5956_s20 = smov [#allocation9]   ;;  %s5957_s22 = smov [#allocation12]  }
  0x58   : > { %s266_s21 = sshll.u32 %s5956_s20, 4  ;;  %s287_s24 = sshll.u32 %s5957_s22, 4  ;;  %s267_s21 = int_to_ptr.vmem [resolvable:$true] %s266_s21  ;;  %s288_s24 = int_to_ptr.vmem [resolvable:$true] %s287_s24 }
  0x59   : > { %s5725_s10 = scalar_lea.hbm %s9525_s2, 16 }
  0x5a   : > { %p5726_p13 = scmp.ne.s32.totalorder %s9525_s2, %s5725_s10  ;;  %p5732_p5 = scmp.lt.u32.totalorder %s5725_s10, %s9525_s2 }
  0x5c   : > { %p5728_p0 = pnand %p5726_p13, %p6073_p8 }
  0x5e   : > { %p5729_p2 = pneg %p5728_p0 }
  0x60   : > { %p5734_p7 = pnand %p5732_p5, %p5729_p2 }
  0x62   : > { %5737 = shalt.err (!%p5734_p7)
}
  0x63   : > { %s5738_s17 = scalar_lea.vmem %s267_s21, 16  ;;  %s5745_s19 = scalar_lea.vmem %s267_s21, 32 }
  0x64   : > { %p5739_p9 = scmp.ne.s32.totalorder %s267_s21, %s5738_s17  ;;  %p5746_p11 = scmp.lt.s32.totalorder %s267_s21, %s267_s21 }
  0x65   : > { %p5747_p12 = scmp.lt.s32.totalorder %s5745_s19, %s5738_s17 }
  0x66   : > { %p5741_p4 = pnand %p5739_p9, %p6073_p8 }
  0x67   : > { %p5748_p1 = por %p5747_p12, %p5746_p11 }
  0x68   : > { %p5742_p10 = pneg %p5741_p4 }
  0x6a   : > { %p5749_p3 = pnand %p5748_p1, %p5742_p10 }
  0x6c   : > { %5752 = shalt.err (!%p5749_p3)
}
  0x6d   : > { %5515 = dma.hbm_to_vmem [thread:$0]  (!%p6057_p6), %s9525_s2, 16, %s267_s21, [#allocation8]  }
  0x6e   : > { %s5753_s26 = scalar_lea.hbm %s9527_s4, 1152 }
  0x6f   : > { %p5754_p13 = scmp.ne.s32.totalorder %s9527_s4, %s5753_s26  ;;  %p5760_p3 = scmp.lt.u32.totalorder %s5753_s26, %s9527_s4 }
  0x71   : > { %p5756_p0 = pnand %p5754_p13, %p6073_p8 }
  0x73   : > { %p5757_p1 = pneg %p5756_p0 }
  0x75   : > { %p5762_p2 = pnand %p5760_p3, %p5757_p1 }
  0x77   : > { %5765 = shalt.err (!%p5762_p2)
}
  0x78   : > { %s5766_s17 = scalar_lea.vmem %s288_s24, 1152  ;;  %p5774_p4 = scmp.lt.s32.totalorder %s288_s24, %s288_s24 }
  0x79   : > { %p5767_p5 = scmp.ne.s32.totalorder %s288_s24, %s5766_s17  ;;  %p5775_p10 = scmp.lt.s32.totalorder %s5766_s17, %s5766_s17 }
  0x7b   : > { %p5769_p7 = pnand %p5767_p5, %p6073_p8  ;;  %p5776_p11 = por %p5775_p10, %p5774_p4 }
  0x7d   : > { %p5770_p9 = pneg %p5769_p7 }
  0x7f   : > { %p5777_p12 = pnand %p5776_p11, %p5770_p9 }
  0x81   : > { %5780 = shalt.err (!%p5777_p12)
}
  0x82   : > { %s9582_s21 = smov 128   ;;  %s5958_s22 = smov [#allocation15]  }
  0x83   : > { %5521 = dma.hbm_to_vmem [thread:$0]  (!%p6057_p6), %s9527_s4, 1152, %s288_s24, [#allocation11], %s9582_s21, %s9582_s21, %s9536_s13  }
  0x84   : > { %s312_s9 = sshll.u32 %s5958_s22, 4  ;;  %s5781_s10 = scalar_lea.hbm %s9529_s6, 16  ;;  %s313_s9 = int_to_ptr.vmem [resolvable:$true] %s312_s9 }
  0x85   : > { %p5782_p13 = scmp.ne.s32.totalorder %s9529_s6, %s5781_s10  ;;  %p5788_p3 = scmp.lt.u32.totalorder %s5781_s10, %s9529_s6 }
  0x87   : > { %p5784_p0 = pnand %p5782_p13, %p6073_p8 }
  0x89   : > { %p5785_p1 = pneg %p5784_p0 }
  0x8b   : > { %p5790_p2 = pnand %p5788_p3, %p5785_p1 }
  0x8d   : > { %5793 = shalt.err (!%p5790_p2)
}
  0x8e   : > { %s5794_s24 = scalar_lea.vmem %s313_s9, 16  ;;  %s5801_s19 = scalar_lea.vmem %s313_s9, 32 }
  0x8f   : > { %p5795_p5 = scmp.ne.s32.totalorder %s313_s9, %s5794_s24  ;;  %p5802_p4 = scmp.lt.s32.totalorder %s313_s9, %s313_s9 }
  0x90   : > { %p5803_p10 = scmp.lt.s32.totalorder %s5801_s19, %s5794_s24 }
  0x91   : > { %p5797_p7 = pnand %p5795_p5, %p6073_p8 }
  0x92   : > { %p5804_p11 = por %p5803_p10, %p5802_p4 }
  0x93   : > { %p5798_p9 = pneg %p5797_p7 }
  0x95   : > { %p5805_p12 = pnand %p5804_p11, %p5798_p9 }
  0x97   : > { %5808 = shalt.err (!%p5805_p12)
}
  0x98   : > { %5527 = dma.hbm_to_vmem [thread:$0]  (!%p6057_p6), %s9529_s6, 16, %s313_s9, [#allocation14]  }
  0x99   : > { %s5145_s23 = sadd.s32 4294967294, %s5949_s30   ;;  %s6204_s15 = sadd.s32 1, %s5949_s30  }
  0x9a   : > { %s35_s25 = ssub.s32 %s5949_s30, %s6204_s15  ;;  %s38_s26 = sadd.s32 1, %s5945_s29 }
  0x9b   : > { %p36_p8 = scmp.eq.s32.totalorder %s35_s25, 0  ;;  %p45_p13 = scmp.ne.s32.totalorder %s5945_s29, %s5941_s28 }
  0x9c   : > { %p46_p0 = scmp.eq.s32.totalorder %s5949_s30, 0  ;;  %p51_p1 = scmp.ne.s32.totalorder %s5941_s28, %s5937_s27 }
  0x9d   : > { %s6215_s10 = scalar_select %p36_p8, %s5945_s29, %s38_s26  }
  0x9e   : > { %p6217_p3 = por %p46_p0, %p45_p13  ;;  %p9584_p2 = scmp.eq.s32.totalorder %s6041_s11, 0 }
  0x9f   : > { %p201_p5 = scmp.eq.s32.totalorder %s6041_s11, 1  ;;  %p207_p7 = scmp.eq.s32.totalorder %s5145_s23, 1 }
  0xa0   : > { %p6223_p6 = por %p9584_p2, %p51_p1  ;;  %p5545_p9 = scmp.lt.s32.totalorder %s5949_s30, 2 }
  0xa1   : > { %s323_s16 = sand.u32 1, %s5945_s29   ;;  %p6230_p4 = por %p201_p5, %p45_p13 }
  0xa2   : > { %p6234_p10 = por %p207_p7, %p51_p1  ;;  %s5154_s24 = sshll.u32 %s323_s16, 8 }
  0xa3   : > { %s9586_s18 = scalar_select %p6230_p4, 1, 0 }
  0xa4   : > { %s9587_s17 = scalar_select %p6234_p10, 1, 0 }
  0xa5   : > { %s5242_s19 = sshll.u32 %s5949_s30, 12  ;;  %s327_s23 = scalar_lea.vmem [#allocation4], %s5154_s24 }
  0xa6   : > { %s6242_s25 = scalar_lea.hbm %s9523_s0, %s5242_s19  ;;  %s334_s26 = sshll.u32 %s327_s23, 4  ;;  %s6244_s26 = int_to_ptr.vmem [resolvable:$true] %s334_s26 }
  0xa7   : > { %p6248_p11 = pnand %p5545_p9, %p6217_p3  ;;  %s6252_s1 = scalar_lea.sflag [#allocation5], %s323_s16 }
  0xa8   : > { %s5809_s20 = scalar_lea.hbm %s6242_s25, 4096  ;;  %s5814_s14 = scalar_lea.hbm %s9523_s0, 8192 }
  0xa9   : > { %p5810_p12 = scmp.ne.s32.totalorder %s6242_s25, %s5809_s20  ;;  %p5811_p8 = pneg %p6248_p11 }
  0xaa   : > { %p5815_p1 = scmp.lt.u32.totalorder %s6242_s25, %s9523_s0  ;;  %p5816_p3 = scmp.lt.u32.totalorder %s5814_s14, %s5809_s20 }
  0xab   : > { %p5812_p13 = pnand %p5811_p8, %p5810_p12  ;;  %p5818_p5 = scmp.lt.u32.totalorder %s5809_s20, %s6242_s25 }
  0xac   : > { %p5817_p2 = por %p5816_p3, %p5815_p1 }
  0xad   : > { %p5813_p0 = pneg %p5812_p13 }
  0xae   : > { %p5819_p7 = por %p5818_p5, %p5817_p2 }
  0xb0   : > { %p5820_p9 = pnand %p5819_p7, %p5813_p0 }
  0xb2   : > { %5823 = shalt.err (!%p5820_p9)
}
  0xb3   : > { %s5824_s16 = scalar_lea.vmem %s6244_s26, 4096  ;;  %s5959_s24 = smov [#allocation4]  }
  0xb4   : > { %p5825_p12 = scmp.ne.s32.totalorder %s6244_s26, %s5824_s16  ;;  %s5829_s19 = sshll.u32 %s5959_s24, 4  ;;  %s5830_s19 = int_to_ptr.vmem [resolvable:$false] %s5829_s19 }
  0xb5   : > { %s5831_s22 = scalar_lea.vmem %s5830_s19, 8192  ;;  %p5832_p4 = scmp.lt.s32.totalorder %s6244_s26, %s5830_s19 }
  0xb6   : > { %p5827_p13 = pnand %p5825_p12, %p5811_p8  ;;  %p5833_p1 = scmp.lt.s32.totalorder %s5831_s22, %s5824_s16 }
  0xb8   : > { %p5828_p10 = pneg %p5827_p13  ;;  %p5834_p3 = por %p5833_p1, %p5832_p4 }
  0xba   : > { %p5835_p2 = pnand %p5834_p3, %p5828_p10 }
  0xbc   : > { %5838 = shalt.err (!%p5835_p2)
}
  0xbd   : > { %s9589_s20 = smov 8   ;;  %p9590_p8 = scmp.ne.s32.totalorder %s9578_s12, 0 }
  0xbe   : > { %5531 = dma.hbm_to_vmem [thread:$0]  (!%p6248_p11), %s6242_s25, 4096, %s6244_s26, %s6252_s1, %s9582_s21, %s9582_s21, %s9589_s20  }
  0xbf   : > { %346 = sbr.rel (%p9590_p8) target bundleno = 2025 (0x7e9), region = 48 }
  0xc6   : > { %s6286_s14 = sand.u32 1, %s5941_s28  }
  0xc7   : > { %s5158_s23 = sshll.u32 %s6286_s14, 8  ;;  %s349_s16 = scalar_lea.sflag [#allocation5], %s6286_s14 }
  0xc8   : > { %s6290_s24 = scalar_lea.vmem [#allocation4], %s5158_s23 }
  0xc9   : > { %5912 = dma.done.wait (%p6223_p6), %s349_s16, 4096  }
  0xca   : > { %5914 = vsyncadd (%p6223_p6), %s349_s16, 4294963200  ;;  %p9591_p4 = scmp.eq.s32.totalorder %s6041_s11, 0 }
  0xcc   : > { %5916 = dma.done.wait (%p9591_p4), [#allocation8], 656   ;;  %p9592_p10 = pmov %p9591_p4 }
  0xcd   : > { %p9593_p11 = pmov %p9591_p4 }
  0xce   : > { %5918 = vsyncadd (%p9592_p10), [#allocation8], 4294966640 }
  0xcf   : > { %5920 = dma.done.wait (%p9593_p11), [#allocation11], 1168   ;;  %p9594_p0 = pmov %p9591_p4 }
  0xd1   : > { %5922 = vsyncadd (%p9594_p0), [#allocation11], 4294966128  ;;  %p9595_p5 = pmov %p9594_p0 }
  0xd2   : > { %p9596_p7 = pmov %p9594_p0 }
  0xd3   : > { %5924 = dma.done.wait (%p9595_p5), [#allocation14], 32  }
  0xd4   : > { %5926 = vsyncadd (%p9596_p7), [#allocation14], 4294967264  ;;  %vm414_vm0 = vcmask 31744   ;;  %vm417_vm1 = vcmask 25600   ;;  %v9538_v0 = vmov 0.0   ;;  %v526_v1 = vld [vmem:[%s6290_s24] sm:$0xff] }
  0xd5   : > { %415 = vst.msk [vmem:[#allocation2] sm:$0xff] %vm414_vm0, %v9538_v0  ;;  %416 = vst.msk [vmem:[#allocation2 + $0x8] sm:$0xff] %vm414_vm0, %v9538_v0  ;;  %v528_v2 = vld [vmem:[%s6290_s24 + $0x10] sm:$0xff]  ;;  %v527_v3 = vld [vmem:[%s6290_s24 + $0x8] sm:$0xff]  ;;  %s5961_s1 = smov 4   ;;  %vm470_vm2 = vcmask 64512  }
  0xd6   : > { %419 = vst.msk [vmem:[#allocation2 + $0x18] sm:$0xff] %vm414_vm0, %v9538_v0  ;;  %420 = vst.msk [vmem:[#allocation2 + $0x20] sm:$0xff] %vm414_vm0, %v9538_v0  ;;  %v530_v6 = vld [vmem:[%s6290_s24 + $0x20] sm:$0xff]  ;;  %v529_v7 = vld [vmem:[%s6290_s24 + $0x18] sm:$0xff]  ;;  %s5962_s12 = smov 8   ;;  %s5963_s13 = smov 12  }
  0xd7   : > { %422 = vst.msk [vmem:[#allocation2 + $0x30] sm:$0xff] %vm414_vm0, %v9538_v0  ;;  %423 = vst.msk [vmem:[#allocation2 + $0x38] sm:$0xff] %vm414_vm0, %v9538_v0  ;;  %v532_v8 = vld [vmem:[%s6290_s24 + $0x30] sm:$0xff]  ;;  %v531_v9 = vld [vmem:[%s6290_s24 + $0x28] sm:$0xff]  ;;  %s5964_s21 = smov 16   ;;  %s5965_s9 = smov 20  }
  0xd8   : > { %425 = vst.msk [vmem:[#allocation2 + $0x48] sm:$0xff] %vm414_vm0, %v9538_v0  ;;  %426 = vst.msk [vmem:[#allocation2 + $0x50] sm:$0xff] %vm414_vm0, %v9538_v0  ;;  %v534_v10 = vld [vmem:[%s6290_s24 + $0x40] sm:$0xff]  ;;  %v533_v11 = vld [vmem:[%s6290_s24 + $0x38] sm:$0xff]  ;;  %s5966_s25 = smov 24   ;;  %vm2268_vm3 = vcmask 1043456  }
  0xd9   : > { %428 = vst.msk [vmem:[#allocation2 + $0x60] sm:$0xff] %vm414_vm0, %v9538_v0  ;;  %429 = vst.msk [vmem:[#allocation2 + $0x68] sm:$0xff] %vm414_vm0, %v9538_v0  ;;  %v536_v12 = vld [vmem:[%s6290_s24 + $0x50] sm:$0xff]  ;;  %v535_v13 = vld [vmem:[%s6290_s24 + $0x48] sm:$0xff]  ;;  %s5967_s26 = smov 28   ;;  %s5968_s19 = smov 32  }
  0xda   : > { %431 = vst.msk [vmem:[#allocation2 + $0x78] sm:$0xff] %vm414_vm0, %v9538_v0  ;;  %432 = vst.msk [vmem:[#allocation2 + $0x80] sm:$0xff] %vm414_vm0, %v9538_v0  ;;  %v538_v14 = vld [vmem:[%s6290_s24 + $0x60] sm:$0xff]  ;;  %v537_v15 = vld [vmem:[%s6290_s24 + $0x58] sm:$0xff]  ;;  %vm1968_vm4 = vcmask 97280   ;;  %vm2001_vm5 = vcmask 130048  }
  0xdb   : > { %434 = vst.msk [vmem:[#allocation2 + $0x90] sm:$0xff] %vm414_vm0, %v9538_v0  ;;  %435 = vst.msk [vmem:[#allocation2 + $0x98] sm:$0xff] %vm414_vm0, %v9538_v0  ;;  %v540_v16 = vld [vmem:[%s6290_s24 + $0x70] sm:$0xff]  ;;  %v539_v17 = vld [vmem:[%s6290_s24 + $0x68] sm:$0xff]  ;;  %vm473_vm6 = vcmask 58368   ;;  %vm2034_vm7 = vcmask 162816  }
  0xdc   : > { %437 = vst.msk [vmem:[#allocation2 + $0xa8] sm:$0xff] %vm414_vm0, %v9538_v0  ;;  %438 = vst.msk [vmem:[#allocation2 + $0xb0] sm:$0xff] %vm414_vm0, %v9538_v0  ;;  %v623_v4 = vld [vmem:[#allocation2 + $0x1] sm:$0xff]  ;;  %v541_v19 = vld [vmem:[%s6290_s24 + $0x78] sm:$0xff]  ;;  %vm2067_vm8 = vcmask 195584   ;;  %vm2100_vm9 = vcmask 228352  }
  0xdd   : > { %440 = vst.msk [vmem:[#allocation2 + $0xc0] sm:$0xff] %vm414_vm0, %v9538_v0  ;;  %441 = vst.msk [vmem:[#allocation2 + $0xc8] sm:$0xff] %vm414_vm0, %v9538_v0  ;;  %912 = vrot.lane.b32.xlu0 %v623_v4, %s5961_s1  ;;  %v542_v18 = vld [vmem:[%s6290_s24 + $0x80] sm:$0xff]  ;;  %v544_v20 = vld [vmem:[%s6290_s24 + $0x90] sm:$0xff]  ;;  %vm2133_vm10 = vcmask 261120   ;;  %vm2171_vm11 = vcmask 293888  }
  0xde   : > { %443 = vst.msk [vmem:[#allocation2 + $0xd8] sm:$0xff] %vm414_vm0, %v9538_v0  ;;  %444 = vst.msk [vmem:[#allocation2 + $0xe0] sm:$0xff] %vm414_vm0, %v9538_v0  ;;  %v543_v21 = vld [vmem:[%s6290_s24 + $0x88] sm:$0xff]  ;;  %v546_v22 = vld [vmem:[%s6290_s24 + $0xa0] sm:$0xff]  ;;  %s5969_s22 = smov 40   ;;  %s5970_s20 = smov 48  }
  0xdf   : > { %446 = vst.msk [vmem:[#allocation2 + $0xf0] sm:$0xff] %vm414_vm0, %v9538_v0  ;;  %447 = vst.msk [vmem:[#allocation2 + $0xf8] sm:$0xff] %vm414_vm0, %v9538_v0  ;;  %v545_v23 = vld [vmem:[%s6290_s24 + $0x98] sm:$0xff]  ;;  %v548_v24 = vld [vmem:[%s6290_s24 + $0xb0] sm:$0xff]  ;;  %s5971_s23 = smov 56   ;;  %s5972_s16 = smov 64  }
  0xe0   : > { %449 = vst.msk [vmem:[#allocation2 + $0x108] sm:$0xff] %vm414_vm0, %v9538_v0  ;;  %450 = vst.msk [vmem:[#allocation2 + $0x110] sm:$0xff] %vm414_vm0, %v9538_v0  ;;  %v547_v27 = vld [vmem:[%s6290_s24 + $0xa8] sm:$0xff]  ;;  %v550_v28 = vld [vmem:[%s6290_s24 + $0xc0] sm:$0xff]  ;;  %vm4081_vm12 = vcmask 326656   ;;  %vm4114_vm13 = vcmask 392192  }
  0xe1   : > { %452 = vst.msk [vmem:[#allocation2 + $0x120] sm:$0xff] %vm414_vm0, %v9538_v0  ;;  %453 = vst.msk [vmem:[#allocation2 + $0x128] sm:$0xff] %vm414_vm0, %v9538_v0  ;;  %v549_v33 = vld [vmem:[%s6290_s24 + $0xb8] sm:$0xff]  ;;  %v552_v34 = vld [vmem:[%s6290_s24 + $0xd0] sm:$0xff]  ;;  %vm4147_vm14 = vcmask 457728   ;;  %vm4180_vm15 = vcmask 523264  }
  0xe2   : > { %455 = vst.msk [vmem:[#allocation2 + $0x138] sm:$0xff] %vm414_vm0, %v9538_v0  ;;  %456 = vst.msk [vmem:[#allocation2 + $0x140] sm:$0xff] %vm414_vm0, %v9538_v0  ;;  %v551_v35 = vld [vmem:[%s6290_s24 + $0xc8] sm:$0xff]  ;;  %v554_v36 = vld [vmem:[%s6290_s24 + $0xe0] sm:$0xff]  ;;  %p10074_p9 = scmp.ne.s32.totalorder %s9586_s18, 0 }
  0xe3   : > { %458 = vst.msk [vmem:[#allocation2 + $0x150] sm:$0xff] %vm414_vm0, %v9538_v0  ;;  %459 = vst.msk [vmem:[#allocation2 + $0x158] sm:$0xff] %vm414_vm0, %v9538_v0  ;;  %v553_v38 = vld [vmem:[%s6290_s24 + $0xd8] sm:$0xff]  ;;  %v555_v39 = vld [vmem:[%s6290_s24 + $0xe8] sm:$0xff] }
  0xe4   : > { %461 = vst.msk [vmem:[#allocation2 + $0x168] sm:$0xff] %vm414_vm0, %v9538_v0  ;;  %462 = vst.msk [vmem:[#allocation2 + $0x170] sm:$0xff] %vm414_vm0, %v9538_v0  ;;  %v556_v57 = vld [vmem:[%s6290_s24 + $0xf0] sm:$0xff]  ;;  %v557_v62 = vld [vmem:[%s6290_s24 + $0xf8] sm:$0xff]  ;;  %s5165_s24 = sshll.u32 %s6286_s14, 3 }
  0xe5   : > { %464 = vst.msk [vmem:[#allocation2 + $0x180] sm:$0xff] %vm414_vm0, %v9538_v0  ;;  %465 = vst.msk [vmem:[#allocation2 + $0x188] sm:$0xff] %vm414_vm0, %v9538_v0 }
  0xe6   : > { %467 = vst.msk [vmem:[#allocation2 + $0x198] sm:$0xff] %vm414_vm0, %v9538_v0  ;;  %468 = vst.msk [vmem:[#allocation2 + $0x1a0] sm:$0xff] %vm414_vm0, %v9538_v0 }
  0xe7   : > { %418 = vst.msk [vmem:[#allocation2 + $0x10] sm:$0x3] %vm417_vm1, %v9538_v0  ;;  %421 = vst.msk [vmem:[#allocation2 + $0x28] sm:$0x3] %vm417_vm1, %v9538_v0 }
  0xe8   : > { %424 = vst.msk [vmem:[#allocation2 + $0x40] sm:$0x3] %vm417_vm1, %v9538_v0  ;;  %427 = vst.msk [vmem:[#allocation2 + $0x58] sm:$0x3] %vm417_vm1, %v9538_v0 }
  0xe9   : > { %430 = vst.msk [vmem:[#allocation2 + $0x70] sm:$0x3] %vm417_vm1, %v9538_v0  ;;  %433 = vst.msk [vmem:[#allocation2 + $0x88] sm:$0x3] %vm417_vm1, %v9538_v0 }
  0xea   : > { %436 = vst.msk [vmem:[#allocation2 + $0xa0] sm:$0x3] %vm417_vm1, %v9538_v0  ;;  %439 = vst.msk [vmem:[#allocation2 + $0xb8] sm:$0x3] %vm417_vm1, %v9538_v0 }
  0xeb   : > { %442 = vst.msk [vmem:[#allocation2 + $0xd0] sm:$0x3] %vm417_vm1, %v9538_v0  ;;  %445 = vst.msk [vmem:[#allocation2 + $0xe8] sm:$0x3] %vm417_vm1, %v9538_v0 }
  0xec   : > { %448 = vst.msk [vmem:[#allocation2 + $0x100] sm:$0x3] %vm417_vm1, %v9538_v0  ;;  %451 = vst.msk [vmem:[#allocation2 + $0x118] sm:$0x3] %vm417_vm1, %v9538_v0 }
  0xed   : > { %454 = vst.msk [vmem:[#allocation2 + $0x130] sm:$0x3] %vm417_vm1, %v9538_v0  ;;  %457 = vst.msk [vmem:[#allocation2 + $0x148] sm:$0x3] %vm417_vm1, %v9538_v0 }
  0xee   : > { %460 = vst.msk [vmem:[#allocation2 + $0x160] sm:$0x3] %vm417_vm1, %v9538_v0  ;;  %463 = vst.msk [vmem:[#allocation2 + $0x178] sm:$0x3] %vm417_vm1, %v9538_v0  ;;  %v624_v5 = vld [vmem:[#allocation2 + $0x9] sm:$0xff] }
  0xef   : > { %466 = vst.msk [vmem:[#allocation2 + $0x190] sm:$0x3] %vm417_vm1, %v9538_v0  ;;  %469 = vst.msk [vmem:[#allocation2 + $0x1a8] sm:$0x3] %vm417_vm1, %v9538_v0  ;;  %914 = vrot.lane.b32.xlu0 %v624_v5, %s5961_s1  ;;  %v656_v4 = vld [vmem:[#allocation2 + $0xa] sm:$0xff] }
  0xf0   : > { %559 = vst.msk [vmem:[#allocation2 + $0x19] sm:$0xff] %vm414_vm0, %v526_v1  ;;  %561 = vst.msk [vmem:[#allocation2 + $0x31] sm:$0xff] %vm414_vm0, %v528_v2  ;;  %v655_v1 = vld [vmem:[#allocation2 + $0x2] sm:$0xff] }
  0xf1   : > { %560 = vst.msk [vmem:[#allocation2 + $0x21] sm:$0xff] %vm414_vm0, %v527_v3  ;;  %563 = vst.msk [vmem:[#allocation2 + $0x49] sm:$0xff] %vm414_vm0, %v530_v6 }
  0xf2   : > { %562 = vst.msk [vmem:[#allocation2 + $0x39] sm:$0xff] %vm414_vm0, %v529_v7  ;;  %565 = vst.msk [vmem:[#allocation2 + $0x61] sm:$0xff] %vm414_vm0, %v532_v8 }
  0xf3   : > { %564 = vst.msk [vmem:[#allocation2 + $0x51] sm:$0xff] %vm414_vm0, %v531_v9  ;;  %567 = vst.msk [vmem:[#allocation2 + $0x79] sm:$0xff] %vm414_vm0, %v534_v10 }
  0xf4   : > { %566 = vst.msk [vmem:[#allocation2 + $0x69] sm:$0xff] %vm414_vm0, %v533_v11  ;;  %569 = vst.msk [vmem:[#allocation2 + $0x91] sm:$0xff] %vm414_vm0, %v536_v12 }
  0xf5   : > { %568 = vst.msk [vmem:[#allocation2 + $0x81] sm:$0xff] %vm414_vm0, %v535_v13  ;;  %571 = vst.msk [vmem:[#allocation2 + $0xa9] sm:$0xff] %vm414_vm0, %v538_v14 }
  0xf6   : > { %570 = vst.msk [vmem:[#allocation2 + $0x99] sm:$0xff] %vm414_vm0, %v537_v15  ;;  %573 = vst.msk [vmem:[#allocation2 + $0xc1] sm:$0xff] %vm414_vm0, %v540_v16 }
  0xf7   : > { %572 = vst.msk [vmem:[#allocation2 + $0xb1] sm:$0xff] %vm414_vm0, %v539_v17  ;;  %575 = vst.msk [vmem:[#allocation2 + $0xd9] sm:$0xff] %vm414_vm0, %v542_v18  ;;  %v6459_v25 = vld [vmem:[#allocation2 + $0x19] sm:$0xff]  ;;  %v6461_v26 = vld [vmem:[#allocation2 + $0x31] sm:$0xff] }
  0xf8   : > { %574 = vst.msk [vmem:[#allocation2 + $0xc9] sm:$0xff] %vm414_vm0, %v541_v19  ;;  %577 = vst.msk [vmem:[#allocation2 + $0xf1] sm:$0xff] %vm414_vm0, %v544_v20  ;;  %916 = vrot.lane.b32.xlu1 %v6459_v25, %s5961_s1  ;;  %920 = vrot.lane.b32.xlu0 %v6461_v26, %s5961_s1  ;;  %v6472_v29 = vld [vmem:[#allocation2 + $0x21] sm:$0xff]  ;;  %v6476_v30 = vld [vmem:[#allocation2 + $0x49] sm:$0xff] }
  0xf9   : > { %576 = vst.msk [vmem:[#allocation2 + $0xe1] sm:$0xff] %vm414_vm0, %v543_v21  ;;  %579 = vst.msk [vmem:[#allocation2 + $0x109] sm:$0xff] %vm414_vm0, %v546_v22  ;;  %v6482_v31 = vld [vmem:[#allocation2 + $0x39] sm:$0xff]  ;;  %v6484_v32 = vld [vmem:[#allocation2 + $0x61] sm:$0xff] }
  0xfa   : > { %578 = vst.msk [vmem:[#allocation2 + $0xf9] sm:$0xff] %vm414_vm0, %v545_v23  ;;  %581 = vst.msk [vmem:[#allocation2 + $0x121] sm:$0xff] %vm414_vm0, %v548_v24  ;;  %v6497_v37 = vld [vmem:[#allocation2 + $0x51] sm:$0xff]  ;;  %v6502_v40 = vld [vmem:[#allocation2 + $0x79] sm:$0xff] }
  0xfb   : > { %580 = vst.msk [vmem:[#allocation2 + $0x111] sm:$0xff] %vm414_vm0, %v547_v27  ;;  %583 = vst.msk [vmem:[#allocation2 + $0x139] sm:$0xff] %vm414_vm0, %v550_v28  ;;  %v6510_v41 = vld [vmem:[#allocation2 + $0x69] sm:$0xff]  ;;  %v6512_v42 = vld [vmem:[#allocation2 + $0x91] sm:$0xff] }
  0xfc   : > { %918 = vrot.lane.b32.xlu1 %v6472_v29, %s5961_s1  ;;  %924 = vrot.lane.b32.xlu0 %v6476_v30, %s5961_s1  ;;  %582 = vst.msk [vmem:[#allocation2 + $0x129] sm:$0xff] %vm414_vm0, %v549_v33  ;;  %585 = vst.msk [vmem:[#allocation2 + $0x151] sm:$0xff] %vm414_vm0, %v552_v34  ;;  %v6518_v43 = vld [vmem:[#allocation2 + $0x81] sm:$0xff]  ;;  %v6520_v44 = vld [vmem:[#allocation2 + $0xa9] sm:$0xff] }
  0xfd   : > { %584 = vst.msk [vmem:[#allocation2 + $0x141] sm:$0xff] %vm414_vm0, %v551_v35  ;;  %587 = vst.msk [vmem:[#allocation2 + $0x169] sm:$0xff] %vm414_vm0, %v554_v36  ;;  %v6526_v45 = vld [vmem:[#allocation2 + $0x99] sm:$0xff]  ;;  %v6528_v46 = vld [vmem:[#allocation2 + $0xc1] sm:$0xff] }
  0xfe   : > { %586 = vst.msk [vmem:[#allocation2 + $0x159] sm:$0xff] %vm414_vm0, %v553_v38  ;;  %588 = vst.msk [vmem:[#allocation2 + $0x171] sm:$0xff] %vm414_vm0, %v555_v39  ;;  %v6534_v47 = vld [vmem:[#allocation2 + $0xb1] sm:$0xff]  ;;  %v6536_v48 = vld [vmem:[#allocation2 + $0xd9] sm:$0xff] }
  0xff   : > { %v6542_v49 = vld [vmem:[#allocation2 + $0xc9] sm:$0xff]  ;;  %v6544_v50 = vld [vmem:[#allocation2 + $0xf1] sm:$0xff]  ;;  %471 = vst.msk [vmem:[#allocation3] sm:$0xff] %vm470_vm2, %v9538_v0  ;;  %472 = vst.msk [vmem:[#allocation3 + $0x8] sm:$0xff] %vm470_vm2, %v9538_v0 }
 0x100   : > { %922 = vrot.lane.b32.xlu1 %v6482_v31, %s5961_s1  ;;  %928 = vrot.lane.b32.xlu0 %v6484_v32, %s5961_s1  ;;  %v6550_v51 = vld [vmem:[#allocation2 + $0xe1] sm:$0xff]  ;;  %v6552_v52 = vld [vmem:[#allocation2 + $0x109] sm:$0xff]  ;;  %475 = vst.msk [vmem:[#allocation3 + $0x18] sm:$0xff] %vm470_vm2, %v9538_v0  ;;  %476 = vst.msk [vmem:[#allocation3 + $0x20] sm:$0xff] %vm470_vm2, %v9538_v0 }
 0x101   : > { %v6558_v53 = vld [vmem:[#allocation2 + $0xf9] sm:$0xff]  ;;  %v6560_v54 = vld [vmem:[#allocation2 + $0x121] sm:$0xff]  ;;  %478 = vst.msk [vmem:[#allocation3 + $0x30] sm:$0xff] %vm470_vm2, %v9538_v0  ;;  %479 = vst.msk [vmem:[#allocation3 + $0x38] sm:$0xff] %vm470_vm2, %v9538_v0 }
 0x102   : > { %v6566_v55 = vld [vmem:[#allocation2 + $0x111] sm:$0xff]  ;;  %v6568_v56 = vld [vmem:[#allocation2 + $0x139] sm:$0xff]  ;;  %481 = vst.msk [vmem:[#allocation3 + $0x48] sm:$0xff] %vm470_vm2, %v9538_v0  ;;  %482 = vst.msk [vmem:[#allocation3 + $0x50] sm:$0xff] %vm470_vm2, %v9538_v0 }
 0x103   : > { %484 = vst.msk [vmem:[#allocation3 + $0x60] sm:$0xff] %vm470_vm2, %v9538_v0  ;;  %485 = vst.msk [vmem:[#allocation3 + $0x68] sm:$0xff] %vm470_vm2, %v9538_v0  ;;  %v6647_v58 = vld [vmem:[#allocation2 + $0x129] sm:$0xff]  ;;  %v6650_v59 = vld [vmem:[#allocation2 + $0x151] sm:$0xff] }
 0x104   : > { %926 = vrot.lane.b32.xlu1 %v6497_v37, %s5961_s1  ;;  %932 = vrot.lane.b32.xlu0 %v6502_v40, %s5961_s1  ;;  %487 = vst.msk [vmem:[#allocation3 + $0x78] sm:$0xff] %vm470_vm2, %v9538_v0  ;;  %488 = vst.msk [vmem:[#allocation3 + $0x80] sm:$0xff] %vm470_vm2, %v9538_v0  ;;  %v6656_v60 = vld [vmem:[#allocation2 + $0x141] sm:$0xff]  ;;  %v6658_v61 = vld [vmem:[#allocation2 + $0x169] sm:$0xff] }
 0x105   : > { %490 = vst.msk [vmem:[#allocation3 + $0x90] sm:$0xff] %vm470_vm2, %v9538_v0  ;;  %491 = vst.msk [vmem:[#allocation3 + $0x98] sm:$0xff] %vm470_vm2, %v9538_v0  ;;  %v6666_v63 = vld [vmem:[#allocation2 + $0x159] sm:$0xff]  ;;  %v6671_v2 = vld [vmem:[#allocation2 + $0x171] sm:$0xff] }
 0x106   : > { %493 = vst.msk [vmem:[#allocation3 + $0xa8] sm:$0xff] %vm470_vm2, %v9538_v0  ;;  %494 = vst.msk [vmem:[#allocation3 + $0xb0] sm:$0xff] %vm470_vm2, %v9538_v0  ;;  %v6673_v3 = vld [vmem:[#allocation2 + $0x1a] sm:$0xff]  ;;  %v6679_v5 = vld [vmem:[#allocation2 + $0x32] sm:$0xff] }
 0x107   : > { %496 = vst.msk [vmem:[#allocation3 + $0xc0] sm:$0xff] %vm470_vm2, %v9538_v0  ;;  %497 = vst.msk [vmem:[#allocation3 + $0xc8] sm:$0xff] %vm470_vm2, %v9538_v0  ;;  %v6684_v6 = vld [vmem:[#allocation2 + $0x22] sm:$0xff]  ;;  %v6686_v7 = vld [vmem:[#allocation2 + $0x4a] sm:$0xff] }
 0x108   : > { %930 = vrot.lane.b32.xlu1 %v6510_v41, %s5961_s1  ;;  %936 = vrot.lane.b32.xlu0 %v6512_v42, %s5961_s1  ;;  %499 = vst.msk [vmem:[#allocation3 + $0xd8] sm:$0xff] %vm470_vm2, %v9538_v0  ;;  %500 = vst.msk [vmem:[#allocation3 + $0xe0] sm:$0xff] %vm470_vm2, %v9538_v0  ;;  %v6692_v8 = vld [vmem:[#allocation2 + $0x3a] sm:$0xff]  ;;  %v6694_v9 = vld [vmem:[#allocation2 + $0x62] sm:$0xff] }
 0x109   : > { %502 = vst.msk [vmem:[#allocation3 + $0xf0] sm:$0xff] %vm470_vm2, %v9538_v0  ;;  %503 = vst.msk [vmem:[#allocation3 + $0xf8] sm:$0xff] %vm470_vm2, %v9538_v0  ;;  %v6700_v10 = vld [vmem:[#allocation2 + $0x52] sm:$0xff]  ;;  %v6702_v11 = vld [vmem:[#allocation2 + $0x7a] sm:$0xff] }
 0x10a   : > { %505 = vst.msk [vmem:[#allocation3 + $0x108] sm:$0xff] %vm470_vm2, %v9538_v0  ;;  %506 = vst.msk [vmem:[#allocation3 + $0x110] sm:$0xff] %vm470_vm2, %v9538_v0  ;;  %v6708_v12 = vld [vmem:[#allocation2 + $0x6a] sm:$0xff]  ;;  %v6710_v13 = vld [vmem:[#allocation2 + $0x92] sm:$0xff] }
 0x10b   : > { %508 = vst.msk [vmem:[#allocation3 + $0x120] sm:$0xff] %vm470_vm2, %v9538_v0  ;;  %509 = vst.msk [vmem:[#allocation3 + $0x128] sm:$0xff] %vm470_vm2, %v9538_v0  ;;  %v6716_v14 = vld [vmem:[#allocation2 + $0x82] sm:$0xff]  ;;  %v6718_v15 = vld [vmem:[#allocation2 + $0xaa] sm:$0xff] }
 0x10c   : > { %934 = vrot.lane.b32.xlu1 %v6518_v43, %s5961_s1  ;;  %940 = vrot.lane.b32.xlu0 %v6520_v44, %s5961_s1  ;;  %511 = vst.msk [vmem:[#allocation3 + $0x138] sm:$0xff] %vm470_vm2, %v9538_v0  ;;  %512 = vst.msk [vmem:[#allocation3 + $0x140] sm:$0xff] %vm470_vm2, %v9538_v0  ;;  %v6724_v16 = vld [vmem:[#allocation2 + $0x9a] sm:$0xff]  ;;  %v6726_v17 = vld [vmem:[#allocation2 + $0xc2] sm:$0xff] }
 0x10d   : > { %514 = vst.msk [vmem:[#allocation3 + $0x150] sm:$0xff] %vm470_vm2, %v9538_v0  ;;  %515 = vst.msk [vmem:[#allocation3 + $0x158] sm:$0xff] %vm470_vm2, %v9538_v0  ;;  %v6732_v18 = vld [vmem:[#allocation2 + $0xb2] sm:$0xff]  ;;  %v6734_v19 = vld [vmem:[#allocation2 + $0xda] sm:$0xff] }
 0x10e   : > { %517 = vst.msk [vmem:[#allocation3 + $0x168] sm:$0xff] %vm470_vm2, %v9538_v0  ;;  %518 = vst.msk [vmem:[#allocation3 + $0x170] sm:$0xff] %vm470_vm2, %v9538_v0  ;;  %v6740_v20 = vld [vmem:[#allocation2 + $0xca] sm:$0xff]  ;;  %v6742_v21 = vld [vmem:[#allocation2 + $0xf2] sm:$0xff] }
 0x10f   : > { %520 = vst.msk [vmem:[#allocation3 + $0x180] sm:$0xff] %vm470_vm2, %v9538_v0  ;;  %521 = vst.msk [vmem:[#allocation3 + $0x188] sm:$0xff] %vm470_vm2, %v9538_v0  ;;  %v6748_v22 = vld [vmem:[#allocation2 + $0xe2] sm:$0xff]  ;;  %v6750_v23 = vld [vmem:[#allocation2 + $0x10a] sm:$0xff] }
 0x110   : > { %938 = vrot.lane.b32.xlu1 %v6526_v45, %s5961_s1  ;;  %944 = vrot.lane.b32.xlu0 %v6528_v46, %s5961_s1  ;;  %523 = vst.msk [vmem:[#allocation3 + $0x198] sm:$0xff] %vm470_vm2, %v9538_v0  ;;  %524 = vst.msk [vmem:[#allocation3 + $0x1a0] sm:$0xff] %vm470_vm2, %v9538_v0  ;;  %v6756_v24 = vld [vmem:[#allocation2 + $0xfa] sm:$0xff]  ;;  %v6758_v27 = vld [vmem:[#allocation2 + $0x122] sm:$0xff] }
 0x111   : > { %589 = vst.msk [vmem:[#allocation2 + $0x181] sm:$0xff] %vm414_vm0, %v556_v57  ;;  %590 = vst.msk [vmem:[#allocation2 + $0x189] sm:$0xff] %vm414_vm0, %v557_v62  ;;  %v6764_v28 = vld [vmem:[#allocation2 + $0x112] sm:$0xff]  ;;  %v6766_v33 = vld [vmem:[#allocation2 + $0x13a] sm:$0xff] }
 0x112   : > { %v6774_v35 = vld [vmem:[#allocation2 + $0x12a] sm:$0xff]  ;;  %v6776_v36 = vld [vmem:[#allocation2 + $0x152] sm:$0xff]  ;;  %v6784_v39 = vld [vmem:[#allocation2 + $0x142] sm:$0xff] }
 0x113   : > { %9598 = vst [vmem:[#allocation26_spill] sm:$0xff] %v6776_v36  ;;  %9600 = vst [vmem:[#allocation28_spill] sm:$0xff] %v6784_v39  ;;  %v6788_v62 = vld [vmem:[#allocation2 + $0x16a] sm:$0xff] }
 0x114   : > { %942 = vrot.lane.b32.xlu1 %v6534_v47, %s5961_s1  ;;  %948 = vrot.lane.b32.xlu0 %v6536_v48, %s5961_s1  ;;  %9602 = vst [vmem:[#allocation30_spill] sm:$0xff] %v6788_v62 }
 0x118   : > { %946 = vrot.lane.b32.xlu1 %v6542_v49, %s5961_s1  ;;  %952 = vrot.lane.b32.xlu0 %v6544_v50, %s5961_s1 }
 0x11c   : > { %950 = vrot.lane.b32.xlu1 %v6550_v51, %s5961_s1  ;;  %956 = vrot.lane.b32.xlu0 %v6552_v52, %s5961_s1 }
 0x120   : > { %954 = vrot.lane.b32.xlu1 %v6558_v53, %s5961_s1  ;;  %960 = vrot.lane.b32.xlu0 %v6560_v54, %s5961_s1 }
 0x124   : > { %958 = vrot.lane.b32.xlu1 %v6566_v55, %s5961_s1  ;;  %964 = vrot.lane.b32.xlu0 %v6568_v56, %s5961_s1 }
 0x128   : > { %962 = vrot.lane.b32.xlu1 %v6647_v58, %s5961_s1  ;;  %968 = vrot.lane.b32.xlu0 %v6650_v59, %s5961_s1 }
 0x12c   : > { %966 = vrot.lane.b32.xlu1 %v6656_v60, %s5961_s1  ;;  %972 = vrot.lane.b32.xlu0 %v6658_v61, %s5961_s1 }
 0x130   : > { %970 = vrot.lane.b32.xlu1 %v6666_v63, %s5961_s1  ;;  %1040 = vrot.lane.b32.xlu0 %v655_v1, %s5962_s12 }
 0x134   : > { %974 = vrot.lane.b32.xlu1 %v6671_v2, %s5961_s1  ;;  %1044 = vrot.lane.b32.xlu0 %v6673_v3, %s5962_s12  ;;  %s5238_s1 = sshll.u32 %s6041_s11, 7 }
 0x135   : > { %s9455_s11 = scalar_lea.hbm %s9531_s8, %s5238_s1 }
 0x138   : > { %1042 = vrot.lane.b32.xlu1 %v656_v4, %s5962_s12  ;;  %1048 = vrot.lane.b32.xlu0 %v6679_v5, %s5962_s12  ;;  %v6796_v4 = vld [vmem:[#allocation2 + $0x15a] sm:$0xff] }
 0x139   : > { %9604 = vst [vmem:[#allocation32_spill] sm:$0xff] %v6796_v4 }
 0x13c   : > { %1046 = vrot.lane.b32.xlu1 %v6684_v6, %s5962_s12  ;;  %1052 = vrot.lane.b32.xlu0 %v6686_v7, %s5962_s12 }
 0x140   : > { %1050 = vrot.lane.b32.xlu1 %v6692_v8, %s5962_s12  ;;  %1056 = vrot.lane.b32.xlu0 %v6694_v9, %s5962_s12 }
 0x144   : > { %1054 = vrot.lane.b32.xlu1 %v6700_v10, %s5962_s12  ;;  %1060 = vrot.lane.b32.xlu0 %v6702_v11, %s5962_s12 }
 0x148   : > { %1058 = vrot.lane.b32.xlu1 %v6708_v12, %s5962_s12  ;;  %1064 = vrot.lane.b32.xlu0 %v6710_v13, %s5962_s12 }
 0x14c   : > { %1062 = vrot.lane.b32.xlu1 %v6716_v14, %s5962_s12  ;;  %1068 = vrot.lane.b32.xlu0 %v6718_v15, %s5962_s12 }
 0x14f   : > { %v6768_v34 = vpop.permute.xlu0 %912 }
 0x150   : > { %1066 = vrot.lane.b32.xlu1 %v6724_v16, %s5962_s12  ;;  %1072 = vrot.lane.b32.xlu0 %v6726_v17, %s5962_s12  ;;  %9597 = vst [vmem:[#allocation25_spill] sm:$0xff] %v6768_v34  ;;  %v6802_v34 = vld [vmem:[#allocation2 + $0x18] sm:$0xff] }
 0x151   : > { %9607 = vst [vmem:[#allocation35_spill] sm:$0xff] %v6802_v34 }
 0x154   : > { %1070 = vrot.lane.b32.xlu1 %v6732_v18, %s5962_s12  ;;  %1076 = vrot.lane.b32.xlu0 %v6734_v19, %s5962_s12 }
 0x158   : > { %1074 = vrot.lane.b32.xlu1 %v6740_v20, %s5962_s12  ;;  %1080 = vrot.lane.b32.xlu0 %v6742_v21, %s5962_s12 }
 0x15c   : > { %1078 = vrot.lane.b32.xlu1 %v6748_v22, %s5962_s12  ;;  %1084 = vrot.lane.b32.xlu0 %v6750_v23, %s5962_s12 }
 0x160   : > { %1082 = vrot.lane.b32.xlu1 %v6756_v24, %s5962_s12  ;;  %1088 = vrot.lane.b32.xlu0 %v6758_v27, %s5962_s12 }
 0x161   : > { %v6778_v38 = vpop.permute.xlu0 %914 }
 0x162   : > { %9599 = vst [vmem:[#allocation27_spill] sm:$0xff] %v6778_v38 }
 0x164   : > { %1086 = vrot.lane.b32.xlu1 %v6764_v28, %s5962_s12  ;;  %1092 = vrot.lane.b32.xlu0 %v6766_v33, %s5962_s12 }
 0x168   : > { %1090 = vrot.lane.b32.xlu1 %v6774_v35, %s5962_s12  ;;  %1096 = vrot.lane.b32.xlu0 %v6776_v36, %s5962_s12  ;;  %v6835_v36 = vld [vmem:[#allocation2 + $0x60] sm:$0xff] }
 0x169   : > { %9617 = vst [vmem:[#allocation45_spill] sm:$0xff] %v6835_v36 }
 0x16a   : > { %v6786_v57 = vpop.permute.xlu1 %916  ;;  %v6790_v1 = vpop.permute.xlu0 %920 }
 0x16b   : > { %9601 = vst [vmem:[#allocation29_spill] sm:$0xff] %v6786_v57  ;;  %9603 = vst [vmem:[#allocation31_spill] sm:$0xff] %v6790_v1  ;;  %v6808_v1 = vld [vmem:[#allocation2 + $0x172] sm:$0xff] }
 0x16c   : > { %1094 = vrot.lane.b32.xlu1 %v6784_v39, %s5962_s12  ;;  %1100 = vrot.lane.b32.xlu0 %v6788_v62, %s5962_s12  ;;  %9608 = vst [vmem:[#allocation36_spill] sm:$0xff] %v6808_v1  ;;  %v6814_v39 = vld [vmem:[#allocation2 + $0x30] sm:$0xff] }
 0x16e   : > { %v6798_v0 = vpop.permute.xlu1 %918  ;;  %v6800_v38 = vpop.permute.xlu0 %924 }
 0x16f   : > { %9605 = vst [vmem:[#allocation33_spill] sm:$0xff] %v6798_v0  ;;  %9606 = vst [vmem:[#allocation34_spill] sm:$0xff] %v6800_v38  ;;  %v594_v0 = vld [vmem:[#allocation2 + $0x20] sm:$0xff] }
 0x170   : > { %1098 = vrot.lane.b32.xlu1 %v6796_v4, %s5962_s12  ;;  %1168 = vrot.lane.b32.xlu0 %v6802_v34, %s5963_s13  ;;  %v6824_v34 = vld [vmem:[#allocation2 + $0x48] sm:$0xff] }
 0x171   : > { %9613 = vst [vmem:[#allocation41_spill] sm:$0xff] %v6824_v34 }
 0x172   : > { %v6810_v57 = vpop.permute.xlu1 %922  ;;  %v6812_v62 = vpop.permute.xlu0 %928 }
 0x173   : > { %9609 = vst [vmem:[#allocation37_spill] sm:$0xff] %v6810_v57  ;;  %9610 = vst [vmem:[#allocation38_spill] sm:$0xff] %v6812_v62  ;;  %v6831_v57 = vld [vmem:[#allocation2 + $0x38] sm:$0xff] }
 0x174   : > { %1102 = vrot.lane.b32.xlu1 %v6808_v1, %s5962_s12  ;;  %1172 = vrot.lane.b32.xlu0 %v6814_v39, %s5963_s13  ;;  %9615 = vst [vmem:[#allocation43_spill] sm:$0xff] %v6831_v57 }
 0x176   : > { %v6820_v38 = vpop.permute.xlu1 %926  ;;  %v6822_v4 = vpop.permute.xlu0 %932 }
 0x177   : > { %9611 = vst [vmem:[#allocation39_spill] sm:$0xff] %v6820_v38  ;;  %9612 = vst [vmem:[#allocation40_spill] sm:$0xff] %v6822_v4 }
 0x178   : > { %1170 = vrot.lane.b32.xlu1 %v594_v0, %s5963_s13  ;;  %1176 = vrot.lane.b32.xlu0 %v6824_v34, %s5963_s13  ;;  %v6843_v0 = vld [vmem:[#allocation2 + $0x50] sm:$0xff]  ;;  %v6847_v34 = vld [vmem:[#allocation2 + $0x78] sm:$0xff] }
 0x179   : > { %9619 = vst [vmem:[#allocation47_spill] sm:$0xff] %v6843_v0  ;;  %9621 = vst [vmem:[#allocation49_spill] sm:$0xff] %v6847_v34 }
 0x17a   : > { %v6829_v62 = vpop.permute.xlu1 %930  ;;  %v6833_v1 = vpop.permute.xlu0 %936 }
 0x17b   : > { %9614 = vst [vmem:[#allocation42_spill] sm:$0xff] %v6829_v62  ;;  %9616 = vst [vmem:[#allocation44_spill] sm:$0xff] %v6833_v1  ;;  %v6855_v62 = vld [vmem:[#allocation2 + $0x68] sm:$0xff] }
 0x17c   : > { %1174 = vrot.lane.b32.xlu1 %v6831_v57, %s5963_s13  ;;  %1180 = vrot.lane.b32.xlu0 %v6835_v36, %s5963_s13  ;;  %9623 = vst [vmem:[#allocation51_spill] sm:$0xff] %v6855_v62  ;;  %v6859_v36 = vld [vmem:[#allocation2 + $0x90] sm:$0xff] }
 0x17d   : > { %9625 = vst [vmem:[#allocation53_spill] sm:$0xff] %v6859_v36 }
 0x17e   : > { %v6841_v4 = vpop.permute.xlu1 %934  ;;  %v6845_v38 = vpop.permute.xlu0 %940 }
 0x17f   : > { %9618 = vst [vmem:[#allocation46_spill] sm:$0xff] %v6841_v4  ;;  %9620 = vst [vmem:[#allocation48_spill] sm:$0xff] %v6845_v38  ;;  %v6867_v4 = vld [vmem:[#allocation2 + $0x80] sm:$0xff] }
 0x180   : > { %1178 = vrot.lane.b32.xlu1 %v6843_v0, %s5963_s13  ;;  %1184 = vrot.lane.b32.xlu0 %v6847_v34, %s5963_s13  ;;  %9627 = vst [vmem:[#allocation55_spill] sm:$0xff] %v6867_v4  ;;  %v6871_v34 = vld [vmem:[#allocation2 + $0xa8] sm:$0xff] }
 0x181   : > { %9629 = vst [vmem:[#allocation57_spill] sm:$0xff] %v6871_v34 }
 0x182   : > { %v6853_v1 = vpop.permute.xlu1 %938  ;;  %v6857_v57 = vpop.permute.xlu0 %944 }
 0x183   : > { %9622 = vst [vmem:[#allocation50_spill] sm:$0xff] %v6853_v1  ;;  %9624 = vst [vmem:[#allocation52_spill] sm:$0xff] %v6857_v57  ;;  %v6879_v1 = vld [vmem:[#allocation2 + $0x98] sm:$0xff] }
 0x184   : > { %1182 = vrot.lane.b32.xlu1 %v6855_v62, %s5963_s13  ;;  %1188 = vrot.lane.b32.xlu0 %v6859_v36, %s5963_s13  ;;  %9631 = vst [vmem:[#allocation59_spill] sm:$0xff] %v6879_v1  ;;  %v6883_v36 = vld [vmem:[#allocation2 + $0xc0] sm:$0xff] }
 0x185   : > { %9633 = vst [vmem:[#allocation61_spill] sm:$0xff] %v6883_v36 }
 0x186   : > { %v6865_v38 = vpop.permute.xlu1 %942  ;;  %v6869_v0 = vpop.permute.xlu0 %948 }
 0x187   : > { %9626 = vst [vmem:[#allocation54_spill] sm:$0xff] %v6865_v38  ;;  %9628 = vst [vmem:[#allocation56_spill] sm:$0xff] %v6869_v0  ;;  %v6891_v38 = vld [vmem:[#allocation2 + $0xb0] sm:$0xff] }
 0x188   : > { %1186 = vrot.lane.b32.xlu1 %v6867_v4, %s5963_s13  ;;  %1192 = vrot.lane.b32.xlu0 %v6871_v34, %s5963_s13  ;;  %9635 = vst [vmem:[#allocation63_spill] sm:$0xff] %v6891_v38  ;;  %v6895_v34 = vld [vmem:[#allocation2 + $0xd8] sm:$0xff] }
 0x189   : > { %9637 = vst [vmem:[#allocation65_spill] sm:$0xff] %v6895_v34 }
 0x18a   : > { %v6877_v57 = vpop.permute.xlu1 %946  ;;  %v6881_v62 = vpop.permute.xlu0 %952 }
 0x18b   : > { %9630 = vst [vmem:[#allocation58_spill] sm:$0xff] %v6877_v57  ;;  %9632 = vst [vmem:[#allocation60_spill] sm:$0xff] %v6881_v62  ;;  %v6903_v57 = vld [vmem:[#allocation2 + $0xc8] sm:$0xff] }
 0x18c   : > { %1190 = vrot.lane.b32.xlu1 %v6879_v1, %s5963_s13  ;;  %1196 = vrot.lane.b32.xlu0 %v6883_v36, %s5963_s13  ;;  %9639 = vst [vmem:[#allocation67_spill] sm:$0xff] %v6903_v57  ;;  %v6907_v36 = vld [vmem:[#allocation2 + $0xf0] sm:$0xff] }
 0x18d   : > { %9641 = vst [vmem:[#allocation69_spill] sm:$0xff] %v6907_v36 }
 0x18e   : > { %v6889_v0 = vpop.permute.xlu1 %950  ;;  %v6893_v4 = vpop.permute.xlu0 %956 }
 0x18f   : > { %9634 = vst [vmem:[#allocation62_spill] sm:$0xff] %v6889_v0  ;;  %9636 = vst [vmem:[#allocation64_spill] sm:$0xff] %v6893_v4  ;;  %v6915_v0 = vld [vmem:[#allocation2 + $0xe0] sm:$0xff] }
 0x190   : > { %1194 = vrot.lane.b32.xlu1 %v6891_v38, %s5963_s13  ;;  %1200 = vrot.lane.b32.xlu0 %v6895_v34, %s5963_s13  ;;  %9643 = vst [vmem:[#allocation71_spill] sm:$0xff] %v6915_v0  ;;  %v6919_v34 = vld [vmem:[#allocation2 + $0x108] sm:$0xff] }
 0x191   : > { %9645 = vst [vmem:[#allocation73_spill] sm:$0xff] %v6919_v34 }
 0x192   : > { %v6901_v62 = vpop.permute.xlu1 %954  ;;  %v6905_v1 = vpop.permute.xlu0 %960 }
 0x193   : > { %9638 = vst [vmem:[#allocation66_spill] sm:$0xff] %v6901_v62  ;;  %9640 = vst [vmem:[#allocation68_spill] sm:$0xff] %v6905_v1  ;;  %v6927_v62 = vld [vmem:[#allocation2 + $0xf8] sm:$0xff] }
 0x194   : > { %1198 = vrot.lane.b32.xlu1 %v6903_v57, %s5963_s13  ;;  %1204 = vrot.lane.b32.xlu0 %v6907_v36, %s5963_s13  ;;  %9647 = vst [vmem:[#allocation75_spill] sm:$0xff] %v6927_v62  ;;  %v6931_v36 = vld [vmem:[#allocation2 + $0x120] sm:$0xff] }
 0x195   : > { %9649 = vst [vmem:[#allocation77_spill] sm:$0xff] %v6931_v36 }
 0x196   : > { %v6913_v4 = vpop.permute.xlu1 %958  ;;  %v6917_v38 = vpop.permute.xlu0 %964 }
 0x197   : > { %9642 = vst [vmem:[#allocation70_spill] sm:$0xff] %v6913_v4  ;;  %9644 = vst [vmem:[#allocation72_spill] sm:$0xff] %v6917_v38  ;;  %v6939_v4 = vld [vmem:[#allocation2 + $0x110] sm:$0xff] }
 0x198   : > { %1202 = vrot.lane.b32.xlu1 %v6915_v0, %s5963_s13  ;;  %1208 = vrot.lane.b32.xlu0 %v6919_v34, %s5963_s13  ;;  %9651 = vst [vmem:[#allocation79_spill] sm:$0xff] %v6939_v4  ;;  %v6943_v34 = vld [vmem:[#allocation2 + $0x138] sm:$0xff] }
 0x199   : > { %9653 = vst [vmem:[#allocation81_spill] sm:$0xff] %v6943_v34 }
 0x19a   : > { %v6925_v1 = vpop.permute.xlu1 %962  ;;  %v6929_v57 = vpop.permute.xlu0 %968 }
 0x19b   : > { %9646 = vst [vmem:[#allocation74_spill] sm:$0xff] %v6925_v1  ;;  %9648 = vst [vmem:[#allocation76_spill] sm:$0xff] %v6929_v57  ;;  %v6951_v1 = vld [vmem:[#allocation2 + $0x128] sm:$0xff] }
 0x19c   : > { %1206 = vrot.lane.b32.xlu1 %v6927_v62, %s5963_s13  ;;  %1212 = vrot.lane.b32.xlu0 %v6931_v36, %s5963_s13  ;;  %9655 = vst [vmem:[#allocation83_spill] sm:$0xff] %v6951_v1  ;;  %v6955_v36 = vld [vmem:[#allocation2 + $0x150] sm:$0xff] }
 0x19d   : > { %9657 = vst [vmem:[#allocation85_spill] sm:$0xff] %v6955_v36 }
 0x19e   : > { %v6937_v38 = vpop.permute.xlu1 %966  ;;  %v6941_v0 = vpop.permute.xlu0 %972 }
 0x19f   : > { %9650 = vst [vmem:[#allocation78_spill] sm:$0xff] %v6937_v38  ;;  %9652 = vst [vmem:[#allocation80_spill] sm:$0xff] %v6941_v0  ;;  %v6963_v38 = vld [vmem:[#allocation2 + $0x140] sm:$0xff] }
 0x1a0   : > { %1210 = vrot.lane.b32.xlu1 %v6939_v4, %s5963_s13  ;;  %1216 = vrot.lane.b32.xlu0 %v6943_v34, %s5963_s13  ;;  %9659 = vst [vmem:[#allocation87_spill] sm:$0xff] %v6963_v38  ;;  %v6967_v34 = vld [vmem:[#allocation2 + $0x168] sm:$0xff] }
 0x1a2   : > { %v6949_v57 = vpop.permute.xlu1 %970  ;;  %v6953_v62 = vpop.permute.xlu0 %1040 }
 0x1a3   : > { %9654 = vst [vmem:[#allocation82_spill] sm:$0xff] %v6949_v57  ;;  %9656 = vst [vmem:[#allocation84_spill] sm:$0xff] %v6953_v62  ;;  %v6975_v62 = vld [vmem:[#allocation2 + $0x180] sm:$0xff] }
 0x1a4   : > { %1214 = vrot.lane.b32.xlu1 %v6951_v1, %s5963_s13  ;;  %1220 = vrot.lane.b32.xlu0 %v6955_v36, %s5963_s13  ;;  %v6977_v1 = vld [vmem:[#allocation2 + $0x158] sm:$0xff] }
 0x1a5   : > { %9662 = vst [vmem:[#allocation90_spill] sm:$0xff] %v6977_v1 }
 0x1a6   : > { %v6961_v0 = vpop.permute.xlu1 %974  ;;  %v6965_v4 = vpop.permute.xlu0 %1044 }
 0x1a7   : > { %9658 = vst [vmem:[#allocation86_spill] sm:$0xff] %v6961_v0  ;;  %9660 = vst [vmem:[#allocation88_spill] sm:$0xff] %v6965_v4  ;;  %v6987_v4 = vld [vmem:[#allocation2 + $0x170] sm:$0xff] }
 0x1a8   : > { %1218 = vrot.lane.b32.xlu1 %v6963_v38, %s5963_s13  ;;  %1224 = vrot.lane.b32.xlu0 %v6967_v34, %s5963_s13 }
 0x1aa   : > { %v6973_v57 = vpop.permute.xlu1 %1042  ;;  %v6979_v36 = vpop.permute.xlu0 %1048 }
 0x1ab   : > { %9661 = vst [vmem:[#allocation89_spill] sm:$0xff] %v6973_v57  ;;  %9663 = vst [vmem:[#allocation91_spill] sm:$0xff] %v6979_v36  ;;  %v6995_v36 = vld [vmem:[#allocation2 + $0x188] sm:$0xff] }
 0x1ac   : > { %1222 = vrot.lane.b32.xlu1 %v6977_v1, %s5963_s13  ;;  %1228 = vrot.lane.b32.xlu0 %v6975_v62, %s5963_s13 }
 0x1ae   : > { %v6985_v0 = vpop.permute.xlu1 %1046  ;;  %v6989_v38 = vpop.permute.xlu0 %1052 }
 0x1af   : > { %9664 = vst [vmem:[#allocation92_spill] sm:$0xff] %v6985_v0  ;;  %9665 = vst [vmem:[#allocation93_spill] sm:$0xff] %v6989_v38 }
 0x1b0   : > { %1226 = vrot.lane.b32.xlu1 %v6987_v4, %s5963_s13  ;;  %1296 = vrot.lane.b32.xlu0 %v6459_v25, %s5964_s21 }
 0x1b2   : > { %v6997_v57 = vpop.permute.xlu1 %1050  ;;  %v6999_v1 = vpop.permute.xlu0 %1056 }
 0x1b3   : > { %9666 = vst [vmem:[#allocation94_spill] sm:$0xff] %v6997_v57  ;;  %9667 = vst [vmem:[#allocation95_spill] sm:$0xff] %v6999_v1 }
 0x1b4   : > { %1230 = vrot.lane.b32.xlu1 %v6995_v36, %s5963_s13  ;;  %1300 = vrot.lane.b32.xlu0 %v6461_v26, %s5964_s21 }
 0x1b6   : > { %v7005_v38 = vpop.permute.xlu1 %1054  ;;  %v7007_v0 = vpop.permute.xlu0 %1060 }
 0x1b8   : > { %1298 = vrot.lane.b32.xlu1 %v6472_v29, %s5964_s21  ;;  %1304 = vrot.lane.b32.xlu0 %v6476_v30, %s5964_s21 }
 0x1ba   : > { %v7013_v25 = vpop.permute.xlu1 %1058  ;;  %v7015_v57 = vpop.permute.xlu0 %1064 }
 0x1bb   : > { %9668 = vst [vmem:[#allocation96_spill] sm:$0xff] %v7015_v57  ;;  %v9806_v57 = vld [vmem:[#allocation35_spill] sm:$0xff] }
 0x1bc   : > { %1302 = vrot.lane.b32.xlu1 %v6482_v31, %s5964_s21  ;;  %1308 = vrot.lane.b32.xlu0 %v6484_v32, %s5964_s21 }
 0x1be   : > { %v7021_v26 = vpop.permute.xlu1 %1062  ;;  %v7023_v1 = vpop.permute.xlu0 %1068 }
 0x1bf   : > { %9669 = vst [vmem:[#allocation97_spill] sm:$0xff] %v7021_v26  ;;  %9670 = vst [vmem:[#allocation98_spill] sm:$0xff] %v7023_v1  ;;  %v834_v1 = vld [vmem:[#allocation2 + $0x109] sm:$0xff] }
 0x1c0   : > { %1306 = vrot.lane.b32.xlu1 %v6497_v37, %s5964_s21  ;;  %1312 = vrot.lane.b32.xlu0 %v6502_v40, %s5964_s21 }
 0x1c2   : > { %v7029_v29 = vpop.permute.xlu1 %1066  ;;  %v7031_v30 = vpop.permute.xlu0 %1072 }
 0x1c3   : > { %9671 = vst [vmem:[#allocation99_spill] sm:$0xff] %v7029_v29  ;;  %9672 = vst [vmem:[#allocation100_spill] sm:$0xff] %v7031_v30 }
 0x1c4   : > { %1310 = vrot.lane.b32.xlu1 %v6510_v41, %s5964_s21  ;;  %1316 = vrot.lane.b32.xlu0 %v6512_v42, %s5964_s21 }
 0x1c6   : > { %v7037_v31 = vpop.permute.xlu1 %1070  ;;  %v7039_v32 = vpop.permute.xlu0 %1076 }
 0x1c7   : > { %9673 = vst [vmem:[#allocation101_spill] sm:$0xff] %v7037_v31  ;;  %9674 = vst [vmem:[#allocation102_spill] sm:$0xff] %v7039_v32  ;;  %v814_v32 = vld [vmem:[#allocation2 + $0x198] sm:$0xff] }
 0x1c8   : > { %1314 = vrot.lane.b32.xlu1 %v6518_v43, %s5964_s21  ;;  %1320 = vrot.lane.b32.xlu0 %v6520_v44, %s5964_s21  ;;  %v822_v31 = vld [vmem:[#allocation2 + $0x79] sm:$0xff] }
 0x1ca   : > { %v7045_v37 = vpop.permute.xlu1 %1074  ;;  %v7047_v40 = vpop.permute.xlu0 %1080 }
 0x1cb   : > { %9675 = vst [vmem:[#allocation103_spill] sm:$0xff] %v7045_v37  ;;  %9676 = vst [vmem:[#allocation104_spill] sm:$0xff] %v7047_v40  ;;  %v9735_v40 = vld [vmem:[#allocation63_spill] sm:$0xff] }
 0x1cc   : > { %1318 = vrot.lane.b32.xlu1 %v6526_v45, %s5964_s21  ;;  %1324 = vrot.lane.b32.xlu0 %v6528_v46, %s5964_s21 }
 0x1ce   : > { %v7053_v41 = vpop.permute.xlu1 %1078  ;;  %v7055_v42 = vpop.permute.xlu0 %1084 }
 0x1cf   : > { %9677 = vst [vmem:[#allocation105_spill] sm:$0xff] %v7053_v41  ;;  %9678 = vst [vmem:[#allocation106_spill] sm:$0xff] %v7055_v42  ;;  %v9727_v42 = vld [vmem:[#allocation55_spill] sm:$0xff] }
 0x1d0   : > { %1322 = vrot.lane.b32.xlu1 %v6534_v47, %s5964_s21  ;;  %1328 = vrot.lane.b32.xlu0 %v6536_v48, %s5964_s21 }
 0x1d2   : > { %v7061_v43 = vpop.permute.xlu1 %1082  ;;  %v7063_v44 = vpop.permute.xlu0 %1088 }
 0x1d3   : > { %9679 = vst [vmem:[#allocation107_spill] sm:$0xff] %v7061_v43  ;;  %9680 = vst [vmem:[#allocation108_spill] sm:$0xff] %v7063_v44  ;;  %v9720_v44 = vld [vmem:[#allocation49_spill] sm:$0xff] }
 0x1d4   : > { %1326 = vrot.lane.b32.xlu1 %v6542_v49, %s5964_s21  ;;  %1332 = vrot.lane.b32.xlu0 %v6544_v50, %s5964_s21 }
 0x1d6   : > { %v7069_v45 = vpop.permute.xlu1 %1086  ;;  %v7071_v46 = vpop.permute.xlu0 %1092 }
 0x1d7   : > { %9681 = vst [vmem:[#allocation109_spill] sm:$0xff] %v7069_v45  ;;  %9682 = vst [vmem:[#allocation110_spill] sm:$0xff] %v7071_v46 }
 0x1d8   : > { %1330 = vrot.lane.b32.xlu1 %v6550_v51, %s5964_s21  ;;  %1336 = vrot.lane.b32.xlu0 %v6552_v52, %s5964_s21 }
 0x1da   : > { %v7077_v47 = vpop.permute.xlu1 %1090  ;;  %v7079_v48 = vpop.permute.xlu0 %1096 }
 0x1db   : > { %9683 = vst [vmem:[#allocation111_spill] sm:$0xff] %v7077_v47  ;;  %9684 = vst [vmem:[#allocation112_spill] sm:$0xff] %v7079_v48 }
 0x1dc   : > { %1334 = vrot.lane.b32.xlu1 %v6558_v53, %s5964_s21  ;;  %1340 = vrot.lane.b32.xlu0 %v6560_v54, %s5964_s21 }
 0x1de   : > { %v7085_v49 = vpop.permute.xlu1 %1094  ;;  %v7087_v50 = vpop.permute.xlu0 %1100 }
 0x1df   : > { %9685 = vst [vmem:[#allocation113_spill] sm:$0xff] %v7085_v49  ;;  %9686 = vst [vmem:[#allocation114_spill] sm:$0xff] %v7087_v50 }
 0x1e0   : > { %1338 = vrot.lane.b32.xlu1 %v6566_v55, %s5964_s21  ;;  %1344 = vrot.lane.b32.xlu0 %v6568_v56, %s5964_s21  ;;  %v7111_v56 = vld [vmem:[#allocation2 + $0x181] sm:$0xff] }
 0x1e2   : > { %v7093_v51 = vpop.permute.xlu1 %1098  ;;  %v7095_v52 = vpop.permute.xlu0 %1168 }
 0x1e3   : > { %9687 = vst [vmem:[#allocation115_spill] sm:$0xff] %v7093_v51 }
 0x1e4   : > { %1342 = vrot.lane.b32.xlu1 %v6647_v58, %s5964_s21  ;;  %1348 = vrot.lane.b32.xlu0 %v6650_v59, %s5964_s21 }
 0x1e6   : > { %v7101_v53 = vpop.permute.xlu1 %1102  ;;  %v7103_v54 = vpop.permute.xlu0 %1172 }
 0x1e7   : > { %9688 = vst [vmem:[#allocation116_spill] sm:$0xff] %v7101_v53 }
 0x1e8   : > { %1346 = vrot.lane.b32.xlu1 %v6656_v60, %s5964_s21  ;;  %1352 = vrot.lane.b32.xlu0 %v6658_v61, %s5964_s21  ;;  %v7127_v60 = vld [vmem:[#allocation2 + $0x189] sm:$0xff] }
 0x1ea   : > { %v7109_v55 = vpop.permute.xlu1 %1170  ;;  %v7113_v50 = vpop.permute.xlu0 %1176 }
 0x1ec   : > { %1350 = vrot.lane.b32.xlu1 %v6666_v63, %s5964_s21  ;;  %1356 = vrot.lane.b32.xlu0 %v7111_v56, %s5964_s21 }
 0x1ee   : > { %v7119_v58 = vpop.permute.xlu1 %1174  ;;  %v7121_v59 = vpop.permute.xlu0 %1180 }
 0x1f0   : > { %1354 = vrot.lane.b32.xlu1 %v6671_v2, %s5964_s21  ;;  %1424 = vrot.lane.b32.xlu0 %v6673_v3, %s5965_s9 }
 0x1f2   : > { %v7129_v61 = vpop.permute.xlu1 %1178  ;;  %v7131_v53 = vpop.permute.xlu0 %1184 }
 0x1f4   : > { %1358 = vrot.lane.b32.xlu1 %v7127_v60, %s5964_s21  ;;  %1428 = vrot.lane.b32.xlu0 %v6679_v5, %s5965_s9 }
 0x1f6   : > { %v7137_v63 = vpop.permute.xlu1 %1182  ;;  %v7139_v51 = vpop.permute.xlu0 %1188 }
 0x1f8   : > { %1426 = vrot.lane.b32.xlu1 %v6684_v6, %s5965_s9  ;;  %1432 = vrot.lane.b32.xlu0 %v6686_v7, %s5965_s9 }
 0x1fa   : > { %v7145_v2 = vpop.permute.xlu1 %1186  ;;  %v7147_v3 = vpop.permute.xlu0 %1192 }
 0x1fb   : > { %9689 = vst [vmem:[#allocation117_spill] sm:$0xff] %v7147_v3  ;;  %v868_v3 = vld [vmem:[#allocation2 + $0x122] sm:$0xff] }
 0x1fc   : > { %1430 = vrot.lane.b32.xlu1 %v6692_v8, %s5965_s9  ;;  %1436 = vrot.lane.b32.xlu0 %v6694_v9, %s5965_s9 }
 0x1fe   : > { %v7153_v5 = vpop.permute.xlu1 %1190  ;;  %v7155_v48 = vpop.permute.xlu0 %1196 }
 0x1ff   : > { %9690 = vst [vmem:[#allocation118_spill] sm:$0xff] %v7153_v5  ;;  %9691 = vst [vmem:[#allocation119_spill] sm:$0xff] %v7155_v48  ;;  %v864_v48 = vld [vmem:[#allocation2 + $0xf2] sm:$0xff] }
 0x200   : > { %1434 = vrot.lane.b32.xlu1 %v6700_v10, %s5965_s9  ;;  %1440 = vrot.lane.b32.xlu0 %v6702_v11, %s5965_s9 }
 0x202   : > { %v7161_v6 = vpop.permute.xlu1 %1194  ;;  %v7163_v7 = vpop.permute.xlu0 %1200 }
 0x203   : > { %9692 = vst [vmem:[#allocation120_spill] sm:$0xff] %v7161_v6  ;;  %9693 = vst [vmem:[#allocation121_spill] sm:$0xff] %v7163_v7 }
 0x204   : > { %1438 = vrot.lane.b32.xlu1 %v6708_v12, %s5965_s9  ;;  %1444 = vrot.lane.b32.xlu0 %v6710_v13, %s5965_s9 }
 0x206   : > { %v7169_v8 = vpop.permute.xlu1 %1198  ;;  %v7171_v9 = vpop.permute.xlu0 %1204 }
 0x207   : > { %9694 = vst [vmem:[#allocation122_spill] sm:$0xff] %v7169_v8  ;;  %9695 = vst [vmem:[#allocation123_spill] sm:$0xff] %v7171_v9  ;;  %v2167_v9 = vld [vmem:[#allocation7 + $0x8] sm:$0xff] }
 0x208   : > { %1442 = vrot.lane.b32.xlu1 %v6716_v14, %s5965_s9  ;;  %1448 = vrot.lane.b32.xlu0 %v6718_v15, %s5965_s9  ;;  %v852_v8 = vld [vmem:[#allocation2 + $0x62] sm:$0xff] }
 0x20a   : > { %v7177_v10 = vpop.permute.xlu1 %1202  ;;  %v7179_v11 = vpop.permute.xlu0 %1208 }
 0x20b   : > { %9696 = vst [vmem:[#allocation124_spill] sm:$0xff] %v7177_v10  ;;  %9697 = vst [vmem:[#allocation125_spill] sm:$0xff] %v7179_v11  ;;  %v9731_v11 = vld [vmem:[#allocation59_spill] sm:$0xff] }
 0x20c   : > { %1446 = vrot.lane.b32.xlu1 %v6724_v16, %s5965_s9  ;;  %1452 = vrot.lane.b32.xlu0 %v6726_v17, %s5965_s9 }
 0x20e   : > { %v7185_v12 = vpop.permute.xlu1 %1206  ;;  %v7187_v13 = vpop.permute.xlu0 %1212 }
 0x20f   : > { %9698 = vst [vmem:[#allocation126_spill] sm:$0xff] %v7185_v12  ;;  %9699 = vst [vmem:[#allocation127_spill] sm:$0xff] %v7187_v13  ;;  %v9723_v13 = vld [vmem:[#allocation51_spill] sm:$0xff] }
 0x210   : > { %1450 = vrot.lane.b32.xlu1 %v6732_v18, %s5965_s9  ;;  %1456 = vrot.lane.b32.xlu0 %v6734_v19, %s5965_s9 }
 0x212   : > { %v7193_v14 = vpop.permute.xlu1 %1210  ;;  %v7195_v15 = vpop.permute.xlu0 %1216 }
 0x213   : > { %9700 = vst [vmem:[#allocation128_spill] sm:$0xff] %v7193_v14  ;;  %9701 = vst [vmem:[#allocation129_spill] sm:$0xff] %v7195_v15 }
 0x214   : > { %1454 = vrot.lane.b32.xlu1 %v6740_v20, %s5965_s9  ;;  %1460 = vrot.lane.b32.xlu0 %v6742_v21, %s5965_s9 }
 0x216   : > { %v7201_v16 = vpop.permute.xlu1 %1214  ;;  %v7203_v17 = vpop.permute.xlu0 %1220 }
 0x217   : > { %9702 = vst [vmem:[#allocation130_spill] sm:$0xff] %v7201_v16  ;;  %9703 = vst [vmem:[#allocation131_spill] sm:$0xff] %v7203_v17  ;;  %v9719_v16 = vld [vmem:[#allocation47_spill] sm:$0xff] }
 0x218   : > { %1458 = vrot.lane.b32.xlu1 %v6748_v22, %s5965_s9  ;;  %1464 = vrot.lane.b32.xlu0 %v6750_v23, %s5965_s9 }
 0x21a   : > { %v7209_v18 = vpop.permute.xlu1 %1218  ;;  %v7211_v19 = vpop.permute.xlu0 %1224 }
 0x21b   : > { %9704 = vst [vmem:[#allocation132_spill] sm:$0xff] %v7209_v18  ;;  %9705 = vst [vmem:[#allocation133_spill] sm:$0xff] %v7211_v19 }
 0x21c   : > { %1462 = vrot.lane.b32.xlu1 %v6756_v24, %s5965_s9  ;;  %1468 = vrot.lane.b32.xlu0 %v6758_v27, %s5965_s9  ;;  %v9709_v24 = vld [vmem:[#allocation26_spill] sm:$0xff] }
 0x21e   : > { %v7217_v20 = vpop.permute.xlu1 %1222  ;;  %v7219_v21 = vpop.permute.xlu0 %1228 }
 0x21f   : > { %9706 = vst [vmem:[#allocation134_spill] sm:$0xff] %v7217_v20  ;;  %9707 = vst [vmem:[#allocation135_spill] sm:$0xff] %v7219_v21  ;;  %v9711_v21 = vld [vmem:[#allocation28_spill] sm:$0xff] }
 0x220   : > { %1466 = vrot.lane.b32.xlu1 %v6764_v28, %s5965_s9  ;;  %1472 = vrot.lane.b32.xlu0 %v6766_v33, %s5965_s9  ;;  %v9712_v28 = vld [vmem:[#allocation30_spill] sm:$0xff] }
 0x222   : > { %v7225_v22 = vpop.permute.xlu1 %1226  ;;  %v7227_v23 = vpop.permute.xlu0 %1296 }
 0x223   : > { %9708 = vst [vmem:[#allocation136_spill] sm:$0xff] %v7225_v22  ;;  %v7243_v22 = vld [vmem:[#allocation2 + $0x182] sm:$0xff] }
 0x224   : > { %1470 = vrot.lane.b32.xlu1 %v6774_v35, %s5965_s9  ;;  %1476 = vrot.lane.b32.xlu0 %v9709_v24, %s5965_s9  ;;  %v9713_v35 = vld [vmem:[#allocation32_spill] sm:$0xff] }
 0x226   : > { %v7233_v27 = vpop.permute.xlu1 %1230  ;;  %v7235_v19 = vpop.permute.xlu0 %1300 }
 0x227   : > { %9710 = vst [vmem:[#allocation26_spill] sm:$0xff] %v7233_v27 }
 0x228   : > { %1474 = vrot.lane.b32.xlu1 %v9711_v21, %s5965_s9  ;;  %1480 = vrot.lane.b32.xlu0 %v9712_v28, %s5965_s9  ;;  %v9714_v21 = vld [vmem:[#allocation36_spill] sm:$0xff] }
 0x229   : > { %v7259_v28 = vld [vmem:[#allocation2 + $0x18a] sm:$0xff] }
 0x22a   : > { %v7241_v33 = vpop.permute.xlu1 %1298  ;;  %v7245_v20 = vpop.permute.xlu0 %1304 }
 0x22c   : > { %1478 = vrot.lane.b32.xlu1 %v9713_v35, %s5965_s9  ;;  %1484 = vrot.lane.b32.xlu0 %v7243_v22, %s5965_s9  ;;  %v9715_v35 = vld [vmem:[#allocation41_spill] sm:$0xff] }
 0x22e   : > { %v7251_v24 = vpop.permute.xlu1 %1302  ;;  %v7253_v27 = vpop.permute.xlu0 %1308 }
 0x230   : > { %1482 = vrot.lane.b32.xlu1 %v9714_v21, %s5965_s9  ;;  %1552 = vrot.lane.b32.xlu0 %v6814_v39, %s5966_s25  ;;  %v9716_v21 = vld [vmem:[#allocation43_spill] sm:$0xff]  ;;  %v9717_v39 = vld [vmem:[#allocation45_spill] sm:$0xff] }
 0x232   : > { %v7261_v49 = vpop.permute.xlu1 %1306  ;;  %v7263_v17 = vpop.permute.xlu0 %1312 }
 0x234   : > { %1486 = vrot.lane.b32.xlu1 %v7259_v28, %s5965_s9  ;;  %1556 = vrot.lane.b32.xlu0 %v9715_v35, %s5966_s25 }
 0x236   : > { %v7269_v18 = vpop.permute.xlu1 %1310  ;;  %v7271_v46 = vpop.permute.xlu0 %1316 }
 0x238   : > { %1554 = vrot.lane.b32.xlu1 %v9716_v21, %s5966_s25  ;;  %1560 = vrot.lane.b32.xlu0 %v9717_v39, %s5966_s25  ;;  %v9724_v21 = vld [vmem:[#allocation53_spill] sm:$0xff] }
 0x23a   : > { %v7277_v47 = vpop.permute.xlu1 %1314  ;;  %v7279_v15 = vpop.permute.xlu0 %1320 }
 0x23b   : > { %9718 = vst [vmem:[#allocation28_spill] sm:$0xff] %v7279_v15  ;;  %v836_v15 = vld [vmem:[#allocation2 + $0x121] sm:$0xff] }
 0x23c   : > { %1558 = vrot.lane.b32.xlu1 %v9719_v16, %s5966_s25  ;;  %1564 = vrot.lane.b32.xlu0 %v9720_v44, %s5966_s25  ;;  %v9728_v16 = vld [vmem:[#allocation57_spill] sm:$0xff] }
 0x23e   : > { %v7285_v35 = vpop.permute.xlu1 %1318  ;;  %v7287_v45 = vpop.permute.xlu0 %1324 }
 0x23f   : > { %9721 = vst [vmem:[#allocation30_spill] sm:$0xff] %v7285_v35  ;;  %9722 = vst [vmem:[#allocation32_spill] sm:$0xff] %v7287_v45 }
 0x240   : > { %1562 = vrot.lane.b32.xlu1 %v9723_v13, %s5966_s25  ;;  %1568 = vrot.lane.b32.xlu0 %v9724_v21, %s5966_s25  ;;  %v9732_v13 = vld [vmem:[#allocation61_spill] sm:$0xff] }
 0x242   : > { %v7293_v39 = vpop.permute.xlu1 %1322  ;;  %v7295_v14 = vpop.permute.xlu0 %1328 }
 0x243   : > { %9725 = vst [vmem:[#allocation36_spill] sm:$0xff] %v7293_v39  ;;  %9726 = vst [vmem:[#allocation41_spill] sm:$0xff] %v7295_v14 }
 0x244   : > { %1566 = vrot.lane.b32.xlu1 %v9727_v42, %s5966_s25  ;;  %1572 = vrot.lane.b32.xlu0 %v9728_v16, %s5966_s25  ;;  %v9736_v42 = vld [vmem:[#allocation65_spill] sm:$0xff] }
 0x246   : > { %v7301_v44 = vpop.permute.xlu1 %1326  ;;  %v7303_v43 = vpop.permute.xlu0 %1332 }
 0x247   : > { %9729 = vst [vmem:[#allocation43_spill] sm:$0xff] %v7301_v44  ;;  %9730 = vst [vmem:[#allocation45_spill] sm:$0xff] %v7303_v43  ;;  %v9739_v43 = vld [vmem:[#allocation67_spill] sm:$0xff] }
 0x248   : > { %1570 = vrot.lane.b32.xlu1 %v9731_v11, %s5966_s25  ;;  %1576 = vrot.lane.b32.xlu0 %v9732_v13, %s5966_s25  ;;  %v9740_v11 = vld [vmem:[#allocation69_spill] sm:$0xff]  ;;  %v820_v44 = vld [vmem:[#allocation2 + $0x61] sm:$0xff] }
 0x24a   : > { %v7309_v21 = vpop.permute.xlu1 %1330  ;;  %v7311_v12 = vpop.permute.xlu0 %1336 }
 0x24b   : > { %9733 = vst [vmem:[#allocation47_spill] sm:$0xff] %v7309_v21  ;;  %9734 = vst [vmem:[#allocation49_spill] sm:$0xff] %v7311_v12  ;;  %v9743_v12 = vld [vmem:[#allocation71_spill] sm:$0xff] }
 0x24c   : > { %1574 = vrot.lane.b32.xlu1 %v9735_v40, %s5966_s25  ;;  %1580 = vrot.lane.b32.xlu0 %v9736_v42, %s5966_s25  ;;  %v9744_v40 = vld [vmem:[#allocation73_spill] sm:$0xff] }
 0x24e   : > { %v7317_v16 = vpop.permute.xlu1 %1334  ;;  %v7319_v41 = vpop.permute.xlu0 %1340 }
 0x24f   : > { %9737 = vst [vmem:[#allocation51_spill] sm:$0xff] %v7317_v16  ;;  %9738 = vst [vmem:[#allocation53_spill] sm:$0xff] %v7319_v41  ;;  %v9747_v41 = vld [vmem:[#allocation75_spill] sm:$0xff] }
 0x250   : > { %1578 = vrot.lane.b32.xlu1 %v9739_v43, %s5966_s25  ;;  %1584 = vrot.lane.b32.xlu0 %v9740_v11, %s5966_s25  ;;  %v9748_v43 = vld [vmem:[#allocation77_spill] sm:$0xff] }
 0x252   : > { %v7325_v13 = vpop.permute.xlu1 %1338  ;;  %v7327_v21 = vpop.permute.xlu0 %1344 }
 0x253   : > { %9741 = vst [vmem:[#allocation55_spill] sm:$0xff] %v7325_v13  ;;  %9742 = vst [vmem:[#allocation57_spill] sm:$0xff] %v7327_v21  ;;  %v9751_v21 = vld [vmem:[#allocation79_spill] sm:$0xff] }
 0x254   : > { %1582 = vrot.lane.b32.xlu1 %v9743_v12, %s5966_s25  ;;  %1588 = vrot.lane.b32.xlu0 %v9744_v40, %s5966_s25  ;;  %v9752_v12 = vld [vmem:[#allocation81_spill] sm:$0xff] }
 0x256   : > { %v7333_v42 = vpop.permute.xlu1 %1342  ;;  %v7335_v16 = vpop.permute.xlu0 %1348 }
 0x257   : > { %9745 = vst [vmem:[#allocation59_spill] sm:$0xff] %v7333_v42  ;;  %9746 = vst [vmem:[#allocation61_spill] sm:$0xff] %v7335_v16  ;;  %v9755_v16 = vld [vmem:[#allocation83_spill] sm:$0xff] }
 0x258   : > { %1586 = vrot.lane.b32.xlu1 %v9747_v41, %s5966_s25  ;;  %1592 = vrot.lane.b32.xlu0 %v9748_v43, %s5966_s25  ;;  %v9756_v41 = vld [vmem:[#allocation85_spill] sm:$0xff] }
 0x25a   : > { %v7341_v11 = vpop.permute.xlu1 %1346  ;;  %v7343_v13 = vpop.permute.xlu0 %1352 }
 0x25b   : > { %9749 = vst [vmem:[#allocation63_spill] sm:$0xff] %v7341_v11  ;;  %9750 = vst [vmem:[#allocation65_spill] sm:$0xff] %v7343_v13  ;;  %v9758_v13 = vld [vmem:[#allocation87_spill] sm:$0xff] }
 0x25c   : > { %1590 = vrot.lane.b32.xlu1 %v9751_v21, %s5966_s25  ;;  %1596 = vrot.lane.b32.xlu0 %v9752_v12, %s5966_s25  ;;  %v2166_v21 = vld [vmem:[#allocation7] sm:$0xff] }
 0x25d   : > { %v5445_v12 = vpack.c.bf16 %v2167_v9, %v2166_v21  ;;  %v816_v21 = vld [vmem:[#allocation2 + $0x31] sm:$0xff] }
 0x25e   : > { %v7349_v40 = vpop.permute.xlu1 %1350  ;;  %v7351_v42 = vpop.permute.xlu0 %1356 }
 0x25f   : > { %9753 = vst [vmem:[#allocation67_spill] sm:$0xff] %v7349_v40  ;;  %9754 = vst [vmem:[#allocation69_spill] sm:$0xff] %v7351_v42  ;;  %5446 = vmatprep.subr.bf16.mxu0 %v5445_v12 }
 0x260   : > { %1594 = vrot.lane.b32.xlu1 %v9755_v16, %s5966_s25  ;;  %1600 = vrot.lane.b32.xlu0 %v9756_v41, %s5966_s25  ;;  %v9760_v16 = vld [vmem:[#allocation90_spill] sm:$0xff]  ;;  %v2168_v41 = vld [vmem:[#allocation7 + $0x10] sm:$0xff] }
 0x261   : > { %5448 = vmatpush3.bf16.msra.mxu0 %v5445_v12  ;;  %v2170_v12 = vld [vmem:[#allocation7 + $0x20] sm:$0xf] }
 0x262   : > { %v7357_v43 = vpop.permute.xlu1 %1354  ;;  %v7359_v11 = vpop.permute.xlu0 %1424 }
 0x263   : > { %9757 = vst [vmem:[#allocation71_spill] sm:$0xff] %v7357_v43  ;;  %v2169_v43 = vld [vmem:[#allocation7 + $0x18] sm:$0xff] }
 0x264   : > { %1598 = vrot.lane.b32.xlu1 %v9758_v13, %s5966_s25  ;;  %1604 = vrot.lane.b32.xlu0 %v6967_v34, %s5966_s25  ;;  %v5449_v13 = vpack.c.bf16 %v2169_v43, %v2168_v41  ;;  %v818_v43 = vld [vmem:[#allocation2 + $0x49] sm:$0xff]  ;;  %v817_v41 = vld [vmem:[#allocation2 + $0x39] sm:$0xff] }
 0x266   : > { %v7365_v42 = vpop.permute.xlu1 %1358  ;;  %v7367_v40 = vpop.permute.xlu0 %1428  ;;  %5450 = vmatprep.subr.bf16.mxu0 %v5449_v13 }
 0x267   : > { %9759 = vst [vmem:[#allocation73_spill] sm:$0xff] %v7365_v42  ;;  %5452 = vmatpush3.bf16.msra.mxu0 %v5449_v13  ;;  %v849_v42 = vld [vmem:[#allocation2 + $0x3a] sm:$0xff] }
 0x268   : > { %1602 = vrot.lane.b32.xlu1 %v9760_v16, %s5966_s25  ;;  %1608 = vrot.lane.b32.xlu0 %v6975_v62, %s5966_s25  ;;  %v815_v62 = vld [vmem:[#allocation2 + $0x1a0] sm:$0xff] }
 0x269   : > { %5329 = vmatprep.subr.msk.mxu0 %vm2268_vm3, %v2170_v12 }
 0x26a   : > { %v7373_v10 = vpop.permute.xlu1 %1426  ;;  %v7375_v34 = vpop.permute.xlu0 %1432 }
 0x26b   : > { %5330 = vmatpush3.msk.msra.mxu0 %vm2268_vm3, %v2170_v12  ;;  %v850_v12 = vld [vmem:[#allocation2 + $0x4a] sm:$0xff] }
 0x26c   : > { %1606 = vrot.lane.b32.xlu1 %v6987_v4, %s5966_s25  ;;  %1612 = vrot.lane.b32.xlu0 %v814_v32, %s5966_s25 }
 0x26e   : > { %v7380_v9 = vpop.permute.xlu1 %1430  ;;  %v7382_v16 = vpop.permute.xlu0 %1436 }
 0x270   : > { %1610 = vrot.lane.b32.xlu1 %v6995_v36, %s5966_s25  ;;  %1680 = vrot.lane.b32.xlu0 %v816_v21, %s5967_s26  ;;  %v848_v36 = vld [vmem:[#allocation2 + $0x32] sm:$0xff] }
 0x272   : > { %v7387_v4 = vpop.permute.xlu1 %1434  ;;  %v7389_v32 = vpop.permute.xlu0 %1440 }
 0x274   : > { %1614 = vrot.lane.b32.xlu1 %v815_v62, %s5966_s25  ;;  %1684 = vrot.lane.b32.xlu0 %v818_v43, %s5967_s26  ;;  %v819_v62 = vld [vmem:[#allocation2 + $0x51] sm:$0xff] }
 0x276   : > { %v7393_v13 = vpop.permute.xlu1 %1438  ;;  %v7395_v37 = vpop.permute.xlu0 %1444 }
 0x278   : > { %1682 = vrot.lane.b32.xlu1 %v817_v41, %s5967_s26  ;;  %1810 = vrot.lane.b32.xlu0 %v849_v42, %s5968_s19  ;;  %v851_v42 = vld [vmem:[#allocation2 + $0x52] sm:$0xff] }
 0x27a   : > { %v7399_v21 = vpop.permute.xlu1 %1442  ;;  %v7401_v14 = vpop.permute.xlu0 %1448 }
 0x27b   : > { %9761 = vst [vmem:[#allocation75_spill] sm:$0xff] %v7401_v14  ;;  %v866_v14 = vld [vmem:[#allocation2 + $0x10a] sm:$0xff] }
 0x27c   : > { %1808 = vrot.lane.b32.xlu1 %v848_v36, %s5968_s19  ;;  %1812 = vrot.lane.b32.xlu0 %v850_v12, %s5968_s19  ;;  %v821_v36 = vld [vmem:[#allocation2 + $0x69] sm:$0xff] }
 0x27e   : > { %v7405_v43 = vpop.permute.xlu1 %1446  ;;  %v7407_v7 = vpop.permute.xlu0 %1452 }
 0x27f   : > { %9762 = vst [vmem:[#allocation77_spill] sm:$0xff] %v7405_v43  ;;  %9763 = vst [vmem:[#allocation79_spill] sm:$0xff] %v7407_v7  ;;  %v854_v7 = vld [vmem:[#allocation2 + $0x7a] sm:$0xff] }
 0x280   : > { %1686 = vrot.lane.b32.xlu1 %v819_v62, %s5967_s26  ;;  %1688 = vrot.lane.b32.xlu0 %v820_v44, %s5967_s26  ;;  %v853_v44 = vld [vmem:[#allocation2 + $0x6a] sm:$0xff] }
 0x282   : > { %v7411_v41 = vpop.permute.xlu1 %1450  ;;  %v7413_v30 = vpop.permute.xlu0 %1456 }
 0x283   : > { %9764 = vst [vmem:[#allocation81_spill] sm:$0xff] %v7411_v41  ;;  %9765 = vst [vmem:[#allocation83_spill] sm:$0xff] %v7413_v30  ;;  %v824_v30 = vld [vmem:[#allocation2 + $0x91] sm:$0xff] }
 0x284   : > { %1814 = vrot.lane.b32.xlu1 %v851_v42, %s5968_s19  ;;  %1816 = vrot.lane.b32.xlu0 %v852_v8, %s5968_s19  ;;  %v823_v8 = vld [vmem:[#allocation2 + $0x81] sm:$0xff] }
 0x286   : > { %v7417_v12 = vpop.permute.xlu1 %1454  ;;  %v7419_v45 = vpop.permute.xlu0 %1460 }
 0x287   : > { %9766 = vst [vmem:[#allocation85_spill] sm:$0xff] %v7417_v12  ;;  %9767 = vst [vmem:[#allocation87_spill] sm:$0xff] %v7419_v45  ;;  %v856_v45 = vld [vmem:[#allocation2 + $0x92] sm:$0xff] }
 0x288   : > { %1690 = vrot.lane.b32.xlu1 %v821_v36, %s5967_s26  ;;  %1692 = vrot.lane.b32.xlu0 %v822_v31, %s5967_s26  ;;  %v855_v31 = vld [vmem:[#allocation2 + $0x82] sm:$0xff] }
 0x28a   : > { %v7423_v62 = vpop.permute.xlu1 %1458  ;;  %v7425_v41 = vpop.permute.xlu0 %1464 }
 0x28b   : > { %9768 = vst [vmem:[#allocation90_spill] sm:$0xff] %v7423_v62  ;;  %9769 = vst [vmem:[#allocation137_spill] sm:$0xff] %v7425_v41  ;;  %v826_v41 = vld [vmem:[#allocation2 + $0xa9] sm:$0xff] }
 0x28c   : > { %1818 = vrot.lane.b32.xlu1 %v853_v44, %s5968_s19  ;;  %1820 = vrot.lane.b32.xlu0 %v854_v7, %s5968_s19  ;;  %v825_v7 = vld [vmem:[#allocation2 + $0x99] sm:$0xff] }
 0x28e   : > { %v7429_v42 = vpop.permute.xlu1 %1462  ;;  %v7431_v12 = vpop.permute.xlu0 %1468 }
 0x28f   : > { %9770 = vst [vmem:[#allocation138_spill] sm:$0xff] %v7429_v42  ;;  %9771 = vst [vmem:[#allocation139_spill] sm:$0xff] %v7431_v12  ;;  %v858_v12 = vld [vmem:[#allocation2 + $0xaa] sm:$0xff] }
 0x290   : > { %1694 = vrot.lane.b32.xlu1 %v823_v8, %s5967_s26  ;;  %1696 = vrot.lane.b32.xlu0 %v824_v30, %s5967_s26  ;;  %v857_v30 = vld [vmem:[#allocation2 + $0x9a] sm:$0xff] }
 0x292   : > { %v7435_v36 = vpop.permute.xlu1 %1466  ;;  %v7437_v62 = vpop.permute.xlu0 %1472 }
 0x293   : > { %9772 = vst [vmem:[#allocation140_spill] sm:$0xff] %v7435_v36  ;;  %9773 = vst [vmem:[#allocation141_spill] sm:$0xff] %v7437_v62  ;;  %v828_v62 = vld [vmem:[#allocation2 + $0xc1] sm:$0xff] }
 0x294   : > { %1822 = vrot.lane.b32.xlu1 %v855_v31, %s5968_s19  ;;  %1824 = vrot.lane.b32.xlu0 %v856_v45, %s5968_s19  ;;  %v827_v45 = vld [vmem:[#allocation2 + $0xb1] sm:$0xff] }
 0x296   : > { %v7441_v44 = vpop.permute.xlu1 %1470  ;;  %v7443_v42 = vpop.permute.xlu0 %1476 }
 0x297   : > { %9774 = vst [vmem:[#allocation142_spill] sm:$0xff] %v7441_v44  ;;  %9775 = vst [vmem:[#allocation143_spill] sm:$0xff] %v7443_v42  ;;  %v860_v42 = vld [vmem:[#allocation2 + $0xc2] sm:$0xff] }
 0x298   : > { %1698 = vrot.lane.b32.xlu1 %v825_v7, %s5967_s26  ;;  %1700 = vrot.lane.b32.xlu0 %v826_v41, %s5967_s26  ;;  %v859_v41 = vld [vmem:[#allocation2 + $0xb2] sm:$0xff] }
 0x29a   : > { %v7447_v8 = vpop.permute.xlu1 %1474  ;;  %v7449_v36 = vpop.permute.xlu0 %1480 }
 0x29b   : > { %9776 = vst [vmem:[#allocation144_spill] sm:$0xff] %v7447_v8  ;;  %9777 = vst [vmem:[#allocation145_spill] sm:$0xff] %v7449_v36  ;;  %v830_v36 = vld [vmem:[#allocation2 + $0xd9] sm:$0xff] }
 0x29c   : > { %1826 = vrot.lane.b32.xlu1 %v857_v30, %s5968_s19  ;;  %1828 = vrot.lane.b32.xlu0 %v858_v12, %s5968_s19  ;;  %v829_v12 = vld [vmem:[#allocation2 + $0xc9] sm:$0xff] }
 0x29e   : > { %v7453_v31 = vpop.permute.xlu1 %1478  ;;  %v7455_v44 = vpop.permute.xlu0 %1484 }
 0x29f   : > { %9778 = vst [vmem:[#allocation146_spill] sm:$0xff] %v7453_v31  ;;  %9779 = vst [vmem:[#allocation147_spill] sm:$0xff] %v7455_v44  ;;  %v862_v44 = vld [vmem:[#allocation2 + $0xda] sm:$0xff] }
 0x2a0   : > { %1702 = vrot.lane.b32.xlu1 %v827_v45, %s5967_s26  ;;  %1704 = vrot.lane.b32.xlu0 %v828_v62, %s5967_s26  ;;  %v861_v62 = vld [vmem:[#allocation2 + $0xca] sm:$0xff] }
 0x2a2   : > { %v7459_v7 = vpop.permute.xlu1 %1482  ;;  %v7461_v8 = vpop.permute.xlu0 %1552 }
 0x2a3   : > { %9780 = vst [vmem:[#allocation148_spill] sm:$0xff] %v7459_v7 }
 0x2a4   : > { %1830 = vrot.lane.b32.xlu1 %v859_v41, %s5968_s19  ;;  %1832 = vrot.lane.b32.xlu0 %v860_v42, %s5968_s19  ;;  %v831_v42 = vld [vmem:[#allocation2 + $0xe1] sm:$0xff] }
 0x2a6   : > { %v7465_v30 = vpop.permute.xlu1 %1486  ;;  %v7467_v31 = vpop.permute.xlu0 %1556 }
 0x2a7   : > { %9781 = vst [vmem:[#allocation149_spill] sm:$0xff] %v7465_v30  ;;  %v832_v30 = vld [vmem:[#allocation2 + $0xf1] sm:$0xff] }
 0x2a8   : > { %1706 = vrot.lane.b32.xlu1 %v829_v12, %s5967_s26  ;;  %1708 = vrot.lane.b32.xlu0 %v830_v36, %s5967_s26  ;;  %v863_v36 = vld [vmem:[#allocation2 + $0xe2] sm:$0xff] }
 0x2aa   : > { %v7471_v45 = vpop.permute.xlu1 %1554  ;;  %v7473_v7 = vpop.permute.xlu0 %1560 }
 0x2ac   : > { %1834 = vrot.lane.b32.xlu1 %v861_v62, %s5968_s19  ;;  %1836 = vrot.lane.b32.xlu0 %v862_v44, %s5968_s19  ;;  %v833_v44 = vld [vmem:[#allocation2 + $0xf9] sm:$0xff] }
 0x2ae   : > { %v7477_v41 = vpop.permute.xlu1 %1558  ;;  %v7479_v39 = vpop.permute.xlu0 %1564 }
 0x2b0   : > { %1710 = vrot.lane.b32.xlu1 %v831_v42, %s5967_s26  ;;  %1712 = vrot.lane.b32.xlu0 %v832_v30, %s5967_s26  ;;  %v865_v30 = vld [vmem:[#allocation2 + $0xfa] sm:$0xff] }
 0x2b2   : > { %v7483_v12 = vpop.permute.xlu1 %1562  ;;  %v7485_v6 = vpop.permute.xlu0 %1568 }
 0x2b4   : > { %1838 = vrot.lane.b32.xlu1 %v863_v36, %s5968_s19  ;;  %1840 = vrot.lane.b32.xlu0 %v864_v48, %s5968_s19  ;;  %v835_v48 = vld [vmem:[#allocation2 + $0x111] sm:$0xff] }
 0x2b6   : > { %v7489_v62 = vpop.permute.xlu1 %1566  ;;  %v7491_v29 = vpop.permute.xlu0 %1572 }
 0x2b7   : > { %9782 = vst [vmem:[#allocation150_spill] sm:$0xff] %v7491_v29  ;;  %v9807_v29 = vld [vmem:[#allocation89_spill] sm:$0xff] }
 0x2b8   : > { %1714 = vrot.lane.b32.xlu1 %v833_v44, %s5967_s26  ;;  %1716 = vrot.lane.b32.xlu0 %v834_v1, %s5967_s26  ;;  %v867_v1 = vld [vmem:[#allocation2 + $0x112] sm:$0xff] }
 0x2ba   : > { %v7495_v42 = vpop.permute.xlu1 %1570  ;;  %v7497_v43 = vpop.permute.xlu0 %1576 }
 0x2bb   : > { %9783 = vst [vmem:[#allocation151_spill] sm:$0xff] %v7497_v43  ;;  %v838_v43 = vld [vmem:[#allocation2 + $0x139] sm:$0xff] }
 0x2bc   : > { %1842 = vrot.lane.b32.xlu1 %v865_v30, %s5968_s19  ;;  %1844 = vrot.lane.b32.xlu0 %v866_v14, %s5968_s19  ;;  %v837_v14 = vld [vmem:[#allocation2 + $0x129] sm:$0xff] }
 0x2be   : > { %v7501_v36 = vpop.permute.xlu1 %1574  ;;  %v7503_v35 = vpop.permute.xlu0 %1580 }
 0x2bf   : > { %9784 = vst [vmem:[#allocation152_spill] sm:$0xff] %v7501_v36  ;;  %9785 = vst [vmem:[#allocation153_spill] sm:$0xff] %v7503_v35  ;;  %v870_v35 = vld [vmem:[#allocation2 + $0x13a] sm:$0xff] }
 0x2c0   : > { %1718 = vrot.lane.b32.xlu1 %v835_v48, %s5967_s26  ;;  %1720 = vrot.lane.b32.xlu0 %v836_v15, %s5967_s26  ;;  %v869_v15 = vld [vmem:[#allocation2 + $0x12a] sm:$0xff] }
 0x2c2   : > { %v7507_v44 = vpop.permute.xlu1 %1578  ;;  %v7509_v5 = vpop.permute.xlu0 %1584 }
 0x2c3   : > { %9786 = vst [vmem:[#allocation154_spill] sm:$0xff] %v7507_v44  ;;  %9787 = vst [vmem:[#allocation155_spill] sm:$0xff] %v7509_v5  ;;  %v840_v5 = vld [vmem:[#allocation2 + $0x151] sm:$0xff] }
 0x2c4   : > { %1846 = vrot.lane.b32.xlu1 %v867_v1, %s5968_s19  ;;  %1848 = vrot.lane.b32.xlu0 %v868_v3, %s5968_s19  ;;  %v839_v3 = vld [vmem:[#allocation2 + $0x141] sm:$0xff] }
 0x2c6   : > { %v7513_v30 = vpop.permute.xlu1 %1582  ;;  %v7515_v36 = vpop.permute.xlu0 %1588 }
 0x2c7   : > { %9788 = vst [vmem:[#allocation156_spill] sm:$0xff] %v7513_v30  ;;  %9789 = vst [vmem:[#allocation157_spill] sm:$0xff] %v7515_v36  ;;  %v872_v36 = vld [vmem:[#allocation2 + $0x152] sm:$0xff] }
 0x2c8   : > { %1722 = vrot.lane.b32.xlu1 %v837_v14, %s5967_s26  ;;  %1724 = vrot.lane.b32.xlu0 %v838_v43, %s5967_s26  ;;  %v871_v43 = vld [vmem:[#allocation2 + $0x142] sm:$0xff] }
 0x2ca   : > { %v7519_v48 = vpop.permute.xlu1 %1586  ;;  %v7521_v44 = vpop.permute.xlu0 %1592 }
 0x2cb   : > { %9790 = vst [vmem:[#allocation158_spill] sm:$0xff] %v7519_v48  ;;  %9791 = vst [vmem:[#allocation159_spill] sm:$0xff] %v7521_v44  ;;  %v842_v44 = vld [vmem:[#allocation2 + $0x169] sm:$0xff] }
 0x2cc   : > { %1850 = vrot.lane.b32.xlu1 %v869_v15, %s5968_s19  ;;  %1852 = vrot.lane.b32.xlu0 %v870_v35, %s5968_s19  ;;  %v841_v35 = vld [vmem:[#allocation2 + $0x159] sm:$0xff] }
 0x2ce   : > { %v7525_v1 = vpop.permute.xlu1 %1590  ;;  %v7527_v30 = vpop.permute.xlu0 %1596 }
 0x2cf   : > { %9792 = vst [vmem:[#allocation160_spill] sm:$0xff] %v7525_v1  ;;  %9793 = vst [vmem:[#allocation161_spill] sm:$0xff] %v7527_v30  ;;  %v874_v30 = vld [vmem:[#allocation2 + $0x16a] sm:$0xff] }
 0x2d0   : > { %1726 = vrot.lane.b32.xlu1 %v839_v3, %s5967_s26  ;;  %1728 = vrot.lane.b32.xlu0 %v840_v5, %s5967_s26  ;;  %v873_v5 = vld [vmem:[#allocation2 + $0x15a] sm:$0xff] }
 0x2d2   : > { %v7531_v14 = vpop.permute.xlu1 %1594  ;;  %v7533_v48 = vpop.permute.xlu0 %1600 }
 0x2d3   : > { %9794 = vst [vmem:[#allocation162_spill] sm:$0xff] %v7531_v14  ;;  %9795 = vst [vmem:[#allocation163_spill] sm:$0xff] %v7533_v48 }
 0x2d4   : > { %1854 = vrot.lane.b32.xlu1 %v871_v43, %s5968_s19  ;;  %1856 = vrot.lane.b32.xlu0 %v872_v36, %s5968_s19  ;;  %v843_v36 = vld [vmem:[#allocation2 + $0x171] sm:$0xff] }
 0x2d6   : > { %v7537_v15 = vpop.permute.xlu1 %1598  ;;  %v7539_v1 = vpop.permute.xlu0 %1604 }
 0x2d7   : > { %9796 = vst [vmem:[#allocation164_spill] sm:$0xff] %v7537_v15  ;;  %9797 = vst [vmem:[#allocation165_spill] sm:$0xff] %v7539_v1 }
 0x2d8   : > { %1730 = vrot.lane.b32.xlu1 %v841_v35, %s5967_s26  ;;  %1732 = vrot.lane.b32.xlu0 %v842_v44, %s5967_s26  ;;  %v875_v44 = vld [vmem:[#allocation2 + $0x172] sm:$0xff] }
 0x2da   : > { %v7543_v3 = vpop.permute.xlu1 %1602  ;;  %v7545_v14 = vpop.permute.xlu0 %1608 }
 0x2db   : > { %9798 = vst [vmem:[#allocation166_spill] sm:$0xff] %v7543_v3  ;;  %9799 = vst [vmem:[#allocation167_spill] sm:$0xff] %v7545_v14  ;;  %v591_v3 = vld [vmem:[#allocation2] sm:$0xff]  ;;  %v592_v14 = vld [vmem:[#allocation2 + $0x8] sm:$0xff] }
 0x2dc   : > { %1858 = vrot.lane.b32.xlu1 %v873_v5, %s5968_s19  ;;  %1860 = vrot.lane.b32.xlu0 %v874_v30, %s5968_s19  ;;  %v846_v5 = vld [vmem:[#allocation2 + $0x199] sm:$0xff] }
 0x2de   : > { %v7549_v43 = vpop.permute.xlu1 %1606  ;;  %v7551_v48 = vpop.permute.xlu0 %1612 }
 0x2df   : > { %9800 = vst [vmem:[#allocation168_spill] sm:$0xff] %v7549_v43  ;;  %9801 = vst [vmem:[#allocation169_spill] sm:$0xff] %v7551_v48  ;;  %v9803_v48 = vld [vmem:[#allocation25_spill] sm:$0xff]  ;;  %v9804_v43 = vld [vmem:[#allocation27_spill] sm:$0xff] }
 0x2e0   : > { %1734 = vrot.lane.b32.xlu1 %v843_v36, %s5967_s26  ;;  %1736 = vrot.lane.b32.xlu0 %v7111_v56, %s5967_s26  ;;  %v1904_v36 = vsel %vm414_vm0, %v591_v3, %v9803_v48  ;;  %v1905_v56 = vsel %vm414_vm0, %v592_v14, %v9804_v43  ;;  %v9809_v3 = vld [vmem:[#allocation88_spill] sm:$0xff] }
 0x2e2   : > { %v7556_v35 = vpop.permute.xlu1 %1610  ;;  %v1681_v1 = vpop.permute.xlu0 %1680 }
 0x2e3   : > { %9802 = vst [vmem:[#allocation170_spill] sm:$0xff] %v7556_v35  ;;  %v9805_v35 = vld [vmem:[#allocation29_spill] sm:$0xff] }
 0x2e4   : > { %1862 = vrot.lane.b32.xlu1 %v875_v44, %s5968_s19  ;;  %1864 = vrot.lane.b32.xlu0 %v7243_v22, %s5968_s19  ;;  %v1906_v26 = vsel %vm414_vm0, %v9806_v57, %v9805_v35  ;;  %v1937_v44 = vsel %vm470_vm2, %v1905_v56, %v9807_v29  ;;  %v9808_v22 = vld [vmem:[#allocation84_spill] sm:$0xff]  ;;  %v9810_v57 = vmov 0.0   ;;  %v878_v35 = vld [vmem:[#allocation2 + $0x19a] sm:$0xff] }
 0x2e5   : > { %v1936_v48 = vsel %vm470_vm2, %v1904_v36, %v9808_v22  ;;  %v1938_v14 = vsel %vm470_vm2, %v1906_v26, %v9809_v3  ;;  %v1970_v43 = vsel %vm1968_vm4, %v1937_v44, %v7109_v55  ;;  %477 = vst.msk [vmem:[#allocation3 + $0x28] sm:$0x3] %vm473_vm6, %v9810_v57  ;;  %474 = vst.msk [vmem:[#allocation3 + $0x10] sm:$0x3] %vm473_vm6, %v9810_v57  ;;  %v5607_v3 = vld [vmem:[#allocation2 + $0x20] sm:$0xff] }
 0x2e6   : > { %v7561_v30 = vpop.permute.xlu1 %1614  ;;  %v1685_v15 = vpop.permute.xlu0 %1684  ;;  %480 = vst.msk [vmem:[#allocation3 + $0x40] sm:$0x3] %vm473_vm6, %v9810_v57  ;;  %483 = vst.msk [vmem:[#allocation3 + $0x58] sm:$0x3] %vm473_vm6, %v9810_v57  ;;  %v1969_v26 = vsel %vm1968_vm4, %v1936_v48, %v7095_v52  ;;  %v1971_v29 = vsel %vm1968_vm4, %v1938_v14, %v7103_v54  ;;  %v2003_v55 = vsel %vm2001_vm5, %v1970_v43, %v7241_v33 }
 0x2e7   : > { %486 = vst.msk [vmem:[#allocation3 + $0x70] sm:$0x3] %vm473_vm6, %v9810_v57  ;;  %489 = vst.msk [vmem:[#allocation3 + $0x88] sm:$0x3] %vm473_vm6, %v9810_v57  ;;  %v2004_v36 = vsel %vm2001_vm5, %v1971_v29, %v7235_v19  ;;  %v2036_v56 = vsel %vm2034_vm7, %v2003_v55, %v7373_v10  ;;  %v847_v10 = vld [vmem:[#allocation2 + $0x1a1] sm:$0xff] }
 0x2e8   : > { %1738 = vrot.lane.b32.xlu1 %v7127_v60, %s5967_s26  ;;  %1740 = vrot.lane.b32.xlu0 %v846_v5, %s5967_s26  ;;  %492 = vst.msk [vmem:[#allocation3 + $0xa0] sm:$0x3] %vm473_vm6, %v9810_v57  ;;  %495 = vst.msk [vmem:[#allocation3 + $0xb8] sm:$0x3] %vm473_vm6, %v9810_v57  ;;  %v2002_v5 = vsel %vm2001_vm5, %v1969_v26, %v7227_v23  ;;  %v2037_v33 = vsel %vm2034_vm7, %v2004_v36, %v7367_v40  ;;  %v879_v55 = vld [vmem:[#allocation2 + $0x1a2] sm:$0xff] }
 0x2e9   : > { %498 = vst.msk [vmem:[#allocation3 + $0xd0] sm:$0x3] %vm473_vm6, %v9810_v57  ;;  %501 = vst.msk [vmem:[#allocation3 + $0xe8] sm:$0x3] %vm473_vm6, %v9810_v57  ;;  %v2035_v54 = vsel %vm2034_vm7, %v2002_v5, %v7359_v11  ;;  %v2069_v44 = vsel %vm2067_vm8, %v2036_v56, %v7471_v45  ;;  %v2070_v11 = vsel %vm2067_vm8, %v2037_v33, %v7467_v31  ;;  %v5608_v31 = vld [vmem:[#allocation2 + $0x30] sm:$0xff] }
 0x2ea   : > { %504 = vst.msk [vmem:[#allocation3 + $0x100] sm:$0x3] %vm473_vm6, %v9810_v57  ;;  %507 = vst.msk [vmem:[#allocation3 + $0x118] sm:$0x3] %vm473_vm6, %v9810_v57  ;;  %v1683_v60 = vpop.permute.xlu1 %1682  ;;  %v1811_v52 = vpop.permute.xlu0 %1810  ;;  %v2068_v19 = vsel %vm2067_vm8, %v2035_v54, %v7461_v8  ;;  %v2103_v45 = vsel %vm2100_vm9, %v2070_v11, %v1685_v15  ;;  %v9811_v8 = vld [vmem:[#allocation33_spill] sm:$0xff]  ;;  %v9813_v15 = vld [vmem:[#allocation92_spill] sm:$0xff] }
 0x2eb   : > { %510 = vst.msk [vmem:[#allocation3 + $0x130] sm:$0x3] %vm473_vm6, %v9810_v57  ;;  %513 = vst.msk [vmem:[#allocation3 + $0x148] sm:$0x3] %vm473_vm6, %v9810_v57  ;;  %v2102_v23 = vsel %vm2100_vm9, %v2069_v44, %v1683_v60  ;;  %v2101_v40 = vsel %vm2100_vm9, %v2068_v19, %v1681_v1  ;;  %v1907_v14 = vsel %vm414_vm0, %v5607_v3, %v9811_v8  ;;  %v9812_v1 = vld [vmem:[#allocation31_spill] sm:$0xff]  ;;  %v9818_v3 = vld [vmem:[#allocation93_spill] sm:$0xff] }
 0x2ec   : > { %516 = vst.msk [vmem:[#allocation3 + $0x160] sm:$0x3] %vm473_vm6, %v9810_v57  ;;  %519 = vst.msk [vmem:[#allocation3 + $0x178] sm:$0x3] %vm473_vm6, %v9810_v57  ;;  %1866 = vrot.lane.b32.xlu1 %v7259_v28, %s5968_s19  ;;  %1868 = vrot.lane.b32.xlu0 %v878_v35, %s5968_s19  ;;  %v2135_v43 = vsel %vm2133_vm10, %v2102_v23, %v1811_v52  ;;  %v1908_v26 = vsel %vm414_vm0, %v5608_v31, %v9812_v1  ;;  %v9814_v60 = vld [vmem:[#allocation91_spill] sm:$0xff] }
 0x2ed   : > { %522 = vst.msk [vmem:[#allocation3 + $0x190] sm:$0x3] %vm473_vm6, %v9810_v57  ;;  %525 = vst.msk [vmem:[#allocation3 + $0x1a8] sm:$0x3] %vm473_vm6, %v9810_v57  ;;  %v1939_v29 = vsel %vm470_vm2, %v1907_v14, %v9813_v15  ;;  %v1940_v35 = vsel %vm470_vm2, %v1908_v26, %v9814_v60 }
 0x2ee   : > { %v1809_v22 = vpop.permute.xlu1 %1808  ;;  %v1813_v48 = vpop.permute.xlu0 %1812  ;;  %v1972_v5 = vsel %vm1968_vm4, %v1939_v29, %v7119_v58  ;;  %v1973_v56 = vsel %vm1968_vm4, %v1940_v35, %v7113_v50 }
 0x2ef   : > { %v2134_v28 = vsel %vm2133_vm10, %v2101_v40, %v1809_v22  ;;  %v2136_v57 = vsel %vm2133_vm10, %v2103_v45, %v1813_v48  ;;  %v2005_v52 = vsel %vm2001_vm5, %v1972_v5, %v7251_v24  ;;  %v2006_v33 = vsel %vm2001_vm5, %v1973_v56, %v7245_v20  ;;  %v9815_v40 = vld [vmem:[#allocation37_spill] sm:$0xff]  ;;  %v9816_v45 = vld [vmem:[#allocation34_spill] sm:$0xff]  ;;  %v5611_v5 = vld [vmem:[#allocation2 + $0x50] sm:$0xff] }
 0x2f0   : > { %1742 = vrot.lane.b32.xlu1 %v847_v10, %s5967_s26  ;;  %5331 = vmatprep.mubr.msk.f32.mxu0 %vm2171_vm11, %v2134_v28  ;;  %v2038_v44 = vsel %vm2034_vm7, %v2005_v52, %v7380_v9  ;;  %v2039_v58 = vsel %vm2034_vm7, %v2006_v33, %v7375_v34  ;;  %v5609_v9 = vld [vmem:[#allocation2 + $0x38] sm:$0xff]  ;;  %v9817_v48 = vld [vmem:[#allocation94_spill] sm:$0xff] }
 0x2f1   : > { %5332 = vmatmul.mubr.msk.f32.vlgmr.msra.gmra.mrb[0].mxu0 %vm2171_vm11, %v2135_v43  ;;  %v2071_v19 = vsel %vm2067_vm8, %v2038_v44, %v7477_v41  ;;  %v2072_v50 = vsel %vm2067_vm8, %v2039_v58, %v7473_v7  ;;  %v1909_v22 = vsel %vm414_vm0, %v5609_v9, %v9815_v40  ;;  %v5610_v41 = vld [vmem:[#allocation2 + $0x48] sm:$0xff]  ;;  %v9820_v56 = vld [vmem:[#allocation38_spill] sm:$0xff] }
 0x2f2   : > { %v1687_v36 = vpop.permute.xlu1 %1686  ;;  %5334 = vmatprep.mubr.msk.f32.mxu0 %vm2171_vm11, %v2136_v57  ;;  %v1689_v54 = vpop.permute.xlu0 %1688  ;;  %v1910_v7 = vsel %vm414_vm0, %v5610_v41, %v9816_v45  ;;  %v1941_v28 = vsel %vm470_vm2, %v1909_v22, %v9817_v48  ;;  %v5613_v40 = vld [vmem:[#allocation2 + $0x68] sm:$0xff]  ;;  %v9822_v22 = vld [vmem:[#allocation42_spill] sm:$0xff] }
 0x2f3   : > { %v2104_v24 = vsel %vm2100_vm9, %v2071_v19, %v1687_v36  ;;  %v2105_v10 = vsel %vm2100_vm9, %v2072_v50, %v1689_v54  ;;  %v1942_v8 = vsel %vm470_vm2, %v1910_v7, %v9818_v3  ;;  %v1974_v14 = vsel %vm1968_vm4, %v1941_v28, %v7129_v61  ;;  %v9819_v36 = vld [vmem:[#allocation39_spill] sm:$0xff] }
 0x2f4   : > { %1870 = vrot.lane.b32.xlu1 %v879_v55, %s5968_s19  ;;  %v1975_v57 = vsel %vm1968_vm4, %v1942_v8, %v7121_v59  ;;  %v2007_v31 = vsel %vm2001_vm5, %v1974_v14, %v7261_v49  ;;  %v9821_v54 = vld [vmem:[#allocation95_spill] sm:$0xff] }
 0x2f5   : > { %v2008_v26 = vsel %vm2001_vm5, %v1975_v57, %v7253_v27  ;;  %v2040_v15 = vsel %vm2034_vm7, %v2007_v31, %v7387_v4  ;;  %v1911_v4 = vsel %vm414_vm0, %v5611_v5, %v9819_v36  ;;  %v9830_v36 = vld [vmem:[#allocation117_spill] sm:$0xff] }
 0x2f6   : > { %v1815_v23 = vpop.permute.xlu1 %1814  ;;  %v1817_v11 = vpop.permute.xlu0 %1816  ;;  %v2041_v29 = vsel %vm2034_vm7, %v2008_v26, %v7382_v16  ;;  %v2073_v61 = vsel %vm2067_vm8, %v2040_v15, %v7483_v12  ;;  %v5612_v12 = vld [vmem:[#allocation2 + $0x60] sm:$0xff]  ;;  %v1943_v52 = vsel %vm470_vm2, %v1911_v4, %v7005_v38 }
 0x2f7   : > { %v2137_v20 = vsel %vm2133_vm10, %v2104_v24, %v1815_v23  ;;  %v2138_v34 = vsel %vm2133_vm10, %v2105_v10, %v1817_v11  ;;  %v2074_v55 = vsel %vm2067_vm8, %v2041_v29, %v7479_v39  ;;  %v1912_v39 = vsel %vm414_vm0, %v5612_v12, %v9820_v56  ;;  %v5615_v26 = vld [vmem:[#allocation2 + $0x80] sm:$0xff]  ;;  %v9826_v29 = vld [vmem:[#allocation44_spill] sm:$0xff] }
 0x2f8   : > { %5335 = vmatmul.mubr.msk.f32.gmra.mrb[2].mxu0 %vm2171_vm11, %v2137_v20  ;;  %v1944_v33 = vsel %vm470_vm2, %v1912_v39, %v9821_v54  ;;  %v1976_v44 = vsel %vm1968_vm4, %v1943_v52, %v7137_v63  ;;  %v9825_v15 = vld [vmem:[#allocation46_spill] sm:$0xff]  ;;  %v9832_v39 = vld [vmem:[#allocation28_spill] sm:$0xff]  ;;  %v9833_v54 = vld [vmem:[#allocation77_spill] sm:$0xff] }
 0x2f9   : > { %5337 = vmatprep.mubr.msk.f32.mxu0 %vm2171_vm11, %v2138_v34  ;;  %v1977_v19 = vsel %vm1968_vm4, %v1944_v33, %v7131_v53  ;;  %v2009_v50 = vsel %vm2001_vm5, %v1976_v44, %v7269_v18  ;;  %v9823_v34 = vld [vmem:[#allocation40_spill] sm:$0xff]  ;;  %v9834_v44 = vld [vmem:[#allocation75_spill] sm:$0xff] }
 0x2fa   : > { %v1691_v43 = vpop.permute.xlu1 %1690  ;;  %v1693_v1 = vpop.permute.xlu0 %1692  ;;  %v2010_v23 = vsel %vm2001_vm5, %v1977_v19, %v7263_v17  ;;  %v2042_v38 = vsel %vm2034_vm7, %v2009_v50, %v7393_v13  ;;  %v1913_v13 = vsel %vm414_vm0, %v5613_v40, %v9822_v22  ;;  %v9835_v19 = vld [vmem:[#allocation152_spill] sm:$0xff]  ;;  %v5618_v40 = vld [vmem:[#allocation2 + $0xa8] sm:$0xff] }
 0x2fb   : > { %v2106_v59 = vsel %vm2100_vm9, %v2073_v61, %v1691_v43  ;;  %v2107_v49 = vsel %vm2100_vm9, %v2074_v55, %v1693_v1  ;;  %v2043_v10 = vsel %vm2034_vm7, %v2010_v23, %v7389_v32  ;;  %v2075_v63 = vsel %vm2067_vm8, %v2042_v38, %v7489_v62  ;;  %v5614_v62 = vld [vmem:[#allocation2 + $0x78] sm:$0xff]  ;;  %v9824_v43 = vld [vmem:[#allocation150_spill] sm:$0xff]  ;;  %v9838_v22 = vld [vmem:[#allocation48_spill] sm:$0xff] }
 0x2fc   : > { %v2076_v20 = vsel %vm2067_vm8, %v2043_v10, %v7485_v6  ;;  %v1914_v6 = vsel %vm414_vm0, %v5614_v62, %v9823_v34  ;;  %v1945_v41 = vsel %vm470_vm2, %v1913_v13, %v7013_v25  ;;  %v9827_v55 = vld [vmem:[#allocation97_spill] sm:$0xff]  ;;  %v1918_v13 = vsel %vm414_vm0, %v5618_v40, %v9838_v22  ;;  %v9840_v34 = vld [vmem:[#allocation98_spill] sm:$0xff]  ;;  %v5621_v22 = vld [vmem:[#allocation2 + $0xc8] sm:$0xff] }
 0x2fd   : > { %v1946_v45 = vsel %vm470_vm2, %v1914_v6, %v7007_v0  ;;  %v1978_v7 = vsel %vm1968_vm4, %v1945_v41, %v7145_v2  ;;  %v1950_v6 = vsel %vm470_vm2, %v1918_v13, %v9840_v34  ;;  %v9841_v41 = vld [vmem:[#allocation120_spill] sm:$0xff]  ;;  %v9861_v13 = vld [vmem:[#allocation58_spill] sm:$0xff]  ;;  %v5622_v34 = vld [vmem:[#allocation2 + $0xd8] sm:$0xff] }
 0x2fe   : > { %v1819_v60 = vpop.permute.xlu1 %1818  ;;  %v1821_v27 = vpop.permute.xlu0 %1820  ;;  %v1979_v28 = vsel %vm1968_vm4, %v1946_v45, %v7139_v51  ;;  %v2011_v3 = vsel %vm2001_vm5, %v1978_v7, %v7277_v47 }
 0x2ff   : > { %v2139_v35 = vsel %vm2133_vm10, %v2106_v59, %v1819_v60  ;;  %v2140_v16 = vsel %vm2133_vm10, %v2107_v49, %v1821_v27  ;;  %v2012_v14 = vsel %vm2001_vm5, %v1979_v28, %v7271_v46  ;;  %v2044_v25 = vsel %vm2034_vm7, %v2011_v3, %v7399_v21  ;;  %v9828_v60 = vld [vmem:[#allocation96_spill] sm:$0xff] }
 0x300   : > { %5338 = vmatmul.mubr.msk.f32.gmra.mrb[4].mxu0 %vm2171_vm11, %v2139_v35  ;;  %v2045_v0 = vsel %vm2034_vm7, %v2012_v14, %v7395_v37  ;;  %v2077_v2 = vsel %vm2067_vm8, %v2044_v25, %v7495_v42  ;;  %v1915_v21 = vsel %vm414_vm0, %v5615_v26, %v9825_v15  ;;  %v5616_v42 = vld [vmem:[#allocation2 + $0x90] sm:$0xff]  ;;  %v9829_v35 = vld [vmem:[#allocation118_spill] sm:$0xff] }
 0x301   : > { %5340 = vmatprep.mubr.msk.f32.mxu0 %vm2171_vm11, %v2140_v16  ;;  %v2078_v57 = vsel %vm2067_vm8, %v2045_v0, %v9824_v43  ;;  %v1916_v61 = vsel %vm414_vm0, %v5616_v42, %v9826_v29  ;;  %v1947_v59 = vsel %vm470_vm2, %v1915_v21, %v9827_v55  ;;  %v9831_v16 = vld [vmem:[#allocation30_spill] sm:$0xff]  ;;  %v9843_v3 = vld [vmem:[#allocation36_spill] sm:$0xff] }
 0x302   : > { %v1695_v58 = vpop.permute.xlu1 %1694  ;;  %v1697_v24 = vpop.permute.xlu0 %1696  ;;  %v1948_v49 = vsel %vm470_vm2, %v1916_v61, %v9828_v60  ;;  %v1980_v27 = vsel %vm1968_vm4, %v1947_v59, %v9829_v35  ;;  %v9844_v25 = vld [vmem:[#allocation32_spill] sm:$0xff]  ;;  %v9849_v61 = vld [vmem:[#allocation54_spill] sm:$0xff] }
 0x303   : > { %v2108_v53 = vsel %vm2100_vm9, %v2075_v63, %v1695_v58  ;;  %v2109_v18 = vsel %vm2100_vm9, %v2076_v20, %v1697_v24  ;;  %v1981_v4 = vsel %vm1968_vm4, %v1948_v49, %v9830_v36  ;;  %v2013_v12 = vsel %vm2001_vm5, %v1980_v27, %v9831_v16  ;;  %v9836_v24 = vld [vmem:[#allocation151_spill] sm:$0xff]  ;;  %v5619_v29 = vld [vmem:[#allocation2 + $0xb0] sm:$0xff]  ;;  %v5620_v60 = vld [vmem:[#allocation2 + $0xc0] sm:$0xff] }
 0x304   : > { %v2014_v52 = vsel %vm2001_vm5, %v1981_v4, %v9832_v39  ;;  %v2046_v33 = vsel %vm2034_vm7, %v2013_v12, %v9833_v54  ;;  %v1919_v55 = vsel %vm414_vm0, %v5619_v29, %v9849_v61  ;;  %v9850_v49 = vld [vmem:[#allocation52_spill] sm:$0xff]  ;;  %v9851_v27 = vld [vmem:[#allocation101_spill] sm:$0xff]  ;;  %v9853_v16 = vld [vmem:[#allocation122_spill] sm:$0xff] }
 0x305   : > { %v2047_v58 = vsel %vm2034_vm7, %v2014_v52, %v9834_v44  ;;  %v2079_v50 = vsel %vm2067_vm8, %v2046_v33, %v9835_v19  ;;  %v1920_v35 = vsel %vm414_vm0, %v5620_v60, %v9850_v49  ;;  %v9852_v36 = vld [vmem:[#allocation100_spill] sm:$0xff]  ;;  %v9854_v39 = vld [vmem:[#allocation121_spill] sm:$0xff]  ;;  %v9855_v54 = vld [vmem:[#allocation43_spill] sm:$0xff] }
 0x306   : > { %v1823_v11 = vpop.permute.xlu1 %1822  ;;  %v1825_v17 = vpop.permute.xlu0 %1824  ;;  %v2080_v23 = vsel %vm2067_vm8, %v2047_v58, %v9836_v24  ;;  %v1952_v4 = vsel %vm470_vm2, %v1920_v35, %v9852_v36  ;;  %v9856_v58 = vld [vmem:[#allocation41_spill] sm:$0xff]  ;;  %v5623_v49 = vld [vmem:[#allocation2 + $0xe0] sm:$0xff]  ;;  %v5624_v36 = vld [vmem:[#allocation2 + $0xf0] sm:$0xff] }
 0x307   : > { %v2141_v9 = vsel %vm2133_vm10, %v2108_v53, %v1823_v11  ;;  %v2142_v32 = vsel %vm2133_vm10, %v2109_v18, %v1825_v17  ;;  %v5617_v11 = vld [vmem:[#allocation2 + $0x98] sm:$0xff]  ;;  %v9837_v18 = vld [vmem:[#allocation50_spill] sm:$0xff]  ;;  %v1985_v52 = vsel %vm1968_vm4, %v1952_v4, %v9854_v39  ;;  %v9874_v4 = vld [vmem:[#allocation60_spill] sm:$0xff] }
 0x308   : > { %5341 = vmatmul.mubr.msk.f32.gmra.mrb[6].mxu0 %vm2171_vm11, %v2141_v9  ;;  %v1917_v9 = vsel %vm414_vm0, %v5617_v11, %v9837_v18  ;;  %v2018_v19 = vsel %vm2001_vm5, %v1985_v52, %v9856_v58  ;;  %v9873_v35 = vld [vmem:[#allocation62_spill] sm:$0xff]  ;;  %v9876_v39 = vld [vmem:[#allocation104_spill] sm:$0xff]  ;;  %v9878_v58 = vld [vmem:[#allocation125_spill] sm:$0xff] }
 0x309   : > { %5343 = vmatprep.mubr.msk.f32.mxu0 %vm2171_vm11, %v2142_v32  ;;  %v9839_v32 = vld [vmem:[#allocation99_spill] sm:$0xff] }
 0x30a   : > { %v1699_v48 = vpop.permute.xlu1 %1698  ;;  %v1701_v8 = vpop.permute.xlu0 %1700  ;;  %v1949_v62 = vsel %vm470_vm2, %v1917_v9, %v9839_v32  ;;  %v1921_v32 = vsel %vm414_vm0, %v5621_v22, %v9861_v13 }
 0x30b   : > { %v2110_v51 = vsel %vm2100_vm9, %v2077_v2, %v1699_v48  ;;  %v2111_v47 = vsel %vm2100_vm9, %v2078_v57, %v1701_v8  ;;  %v1982_v45 = vsel %vm1968_vm4, %v1949_v62, %v9841_v41  ;;  %v9842_v48 = vld [vmem:[#allocation119_spill] sm:$0xff]  ;;  %v9845_v2 = vld [vmem:[#allocation81_spill] sm:$0xff] }
 0x30c   : > { %v1983_v28 = vsel %vm1968_vm4, %v1950_v6, %v9842_v48  ;;  %v2015_v8 = vsel %vm2001_vm5, %v1982_v45, %v9843_v3  ;;  %v9846_v57 = vld [vmem:[#allocation79_spill] sm:$0xff]  ;;  %v9862_v6 = vld [vmem:[#allocation56_spill] sm:$0xff]  ;;  %v9864_v48 = vld [vmem:[#allocation102_spill] sm:$0xff] }
 0x30d   : > { %v2016_v0 = vsel %vm2001_vm5, %v1983_v28, %v9844_v25  ;;  %v2048_v43 = vsel %vm2034_vm7, %v2015_v8, %v9845_v2  ;;  %v1922_v41 = vsel %vm414_vm0, %v5622_v34, %v9862_v6  ;;  %v9863_v45 = vld [vmem:[#allocation103_spill] sm:$0xff]  ;;  %v9865_v3 = vld [vmem:[#allocation124_spill] sm:$0xff]  ;;  %v5625_v6 = vld [vmem:[#allocation2 + $0xf8] sm:$0xff] }
 0x30e   : > { %v1827_v31 = vpop.permute.xlu1 %1826  ;;  %v1829_v46 = vpop.permute.xlu0 %1828  ;;  %v1954_v28 = vsel %vm470_vm2, %v1922_v41, %v9864_v48  ;;  %v9866_v25 = vld [vmem:[#allocation123_spill] sm:$0xff]  ;;  %v9885_v41 = vld [vmem:[#allocation66_spill] sm:$0xff] }
 0x30f   : > { %v2143_v1 = vsel %vm2133_vm10, %v2110_v51, %v1827_v31  ;;  %v2144_v37 = vsel %vm2133_vm10, %v2111_v47, %v1829_v46  ;;  %v2049_v51 = vsel %vm2034_vm7, %v2016_v0, %v9846_v57  ;;  %v9847_v31 = vld [vmem:[#allocation154_spill] sm:$0xff]  ;;  %v1987_v0 = vsel %vm1968_vm4, %v1954_v28, %v9866_v25  ;;  %v9867_v2 = vld [vmem:[#allocation47_spill] sm:$0xff]  ;;  %v9886_v28 = vld [vmem:[#allocation64_spill] sm:$0xff] }
 0x310   : > { %5344 = vmatmul.mubr.msk.f32.gmra.mrb[8].mxu0 %vm2171_vm11, %v2143_v1  ;;  %v2081_v47 = vsel %vm2067_vm8, %v2048_v43, %v9847_v31  ;;  %v9848_v1 = vld [vmem:[#allocation153_spill] sm:$0xff]  ;;  %v5626_v48 = vld [vmem:[#allocation2 + $0x108] sm:$0xff]  ;;  %v9888_v25 = vld [vmem:[#allocation106_spill] sm:$0xff] }
 0x311   : > { %5346 = vmatprep.mubr.msk.f32.mxu0 %vm2171_vm11, %v2144_v37  ;;  %v2082_v46 = vsel %vm2067_vm8, %v2049_v51, %v9848_v1  ;;  %v9868_v51 = vld [vmem:[#allocation45_spill] sm:$0xff] }
 0x312   : > { %v1703_v5 = vpop.permute.xlu1 %1702  ;;  %v1705_v56 = vpop.permute.xlu0 %1704  ;;  %v2020_v31 = vsel %vm2001_vm5, %v1987_v0, %v9868_v51  ;;  %v9890_v51 = vld [vmem:[#allocation127_spill] sm:$0xff] }
 0x313   : > { %v2112_v38 = vsel %vm2100_vm9, %v2079_v50, %v1703_v5  ;;  %v2113_v63 = vsel %vm2100_vm9, %v2080_v23, %v1705_v56  ;;  %v1951_v5 = vsel %vm470_vm2, %v1919_v55, %v9851_v27  ;;  %v9857_v50 = vld [vmem:[#allocation85_spill] sm:$0xff]  ;;  %v9858_v23 = vld [vmem:[#allocation83_spill] sm:$0xff]  ;;  %v1923_v27 = vsel %vm414_vm0, %v5623_v49, %v9873_v35 }
 0x314   : > { %v1984_v12 = vsel %vm1968_vm4, %v1951_v5, %v9853_v16  ;;  %v1924_v16 = vsel %vm414_vm0, %v5624_v36, %v9874_v4  ;;  %v5627_v4 = vld [vmem:[#allocation2 + $0x110] sm:$0xff] }
 0x315   : > { %v2017_v33 = vsel %vm2001_vm5, %v1984_v12, %v9855_v54  ;;  %v9875_v12 = vld [vmem:[#allocation105_spill] sm:$0xff]  ;;  %v1956_v52 = vsel %vm470_vm2, %v1924_v16, %v9876_v39  ;;  %v9877_v54 = vld [vmem:[#allocation126_spill] sm:$0xff] }
 0x316   : > { %v1831_v10 = vpop.permute.xlu1 %1830  ;;  %v1833_v53 = vpop.permute.xlu0 %1832  ;;  %v2050_v24 = vsel %vm2034_vm7, %v2017_v33, %v9857_v50  ;;  %v9879_v50 = vld [vmem:[#allocation51_spill] sm:$0xff]  ;;  %v9897_v16 = vld [vmem:[#allocation70_spill] sm:$0xff] }
 0x317   : > { %v2145_v20 = vsel %vm2133_vm10, %v2112_v38, %v1831_v10  ;;  %v2146_v17 = vsel %vm2133_vm10, %v2113_v63, %v1833_v53  ;;  %v2051_v38 = vsel %vm2034_vm7, %v2018_v19, %v9858_v23  ;;  %v9859_v10 = vld [vmem:[#allocation156_spill] sm:$0xff]  ;;  %v1989_v19 = vsel %vm1968_vm4, %v1956_v52, %v9878_v58  ;;  %v5628_v39 = vld [vmem:[#allocation2 + $0x120] sm:$0xff] }
 0x318   : > { %5347 = vmatmul.mubr.msk.f32.gmra.mrb[10].mxu0 %vm2171_vm11, %v2145_v20  ;;  %v2083_v63 = vsel %vm2067_vm8, %v2050_v24, %v9859_v10  ;;  %v9860_v20 = vld [vmem:[#allocation155_spill] sm:$0xff]  ;;  %v9898_v52 = vld [vmem:[#allocation68_spill] sm:$0xff] }
 0x319   : > { %5349 = vmatprep.mubr.msk.f32.mxu0 %vm2171_vm11, %v2146_v17  ;;  %v2084_v53 = vsel %vm2067_vm8, %v2051_v38, %v9860_v20  ;;  %v9880_v38 = vld [vmem:[#allocation49_spill] sm:$0xff]  ;;  %v9900_v58 = vld [vmem:[#allocation108_spill] sm:$0xff] }
 0x31a   : > { %v1707_v7 = vpop.permute.xlu1 %1706  ;;  %v1709_v14 = vpop.permute.xlu0 %1708  ;;  %v2022_v10 = vsel %vm2001_vm5, %v1989_v19, %v9880_v38  ;;  %v9902_v38 = vld [vmem:[#allocation129_spill] sm:$0xff] }
 0x31b   : > { %v2114_v26 = vsel %vm2100_vm9, %v2081_v47, %v1707_v7  ;;  %v2115_v21 = vsel %vm2100_vm9, %v2082_v46, %v1709_v14  ;;  %v1953_v7 = vsel %vm470_vm2, %v1921_v32, %v9863_v45  ;;  %v9869_v47 = vld [vmem:[#allocation90_spill] sm:$0xff]  ;;  %v9870_v46 = vld [vmem:[#allocation87_spill] sm:$0xff]  ;;  %v1925_v45 = vsel %vm414_vm0, %v5625_v6, %v9885_v41 }
 0x31c   : > { %v1986_v8 = vsel %vm1968_vm4, %v1953_v7, %v9865_v3  ;;  %v1926_v3 = vsel %vm414_vm0, %v5626_v48, %v9886_v28  ;;  %v5629_v28 = vld [vmem:[#allocation2 + $0x128] sm:$0xff] }
 0x31d   : > { %v2019_v43 = vsel %vm2001_vm5, %v1986_v8, %v9867_v2  ;;  %v9887_v8 = vld [vmem:[#allocation107_spill] sm:$0xff]  ;;  %v1958_v0 = vsel %vm470_vm2, %v1926_v3, %v9888_v25  ;;  %v9889_v2 = vld [vmem:[#allocation128_spill] sm:$0xff]  ;;  %v9909_v3 = vld [vmem:[#allocation74_spill] sm:$0xff] }
 0x31e   : > { %v1835_v15 = vpop.permute.xlu1 %1834  ;;  %v1837_v42 = vpop.permute.xlu0 %1836  ;;  %v2052_v1 = vsel %vm2034_vm7, %v2019_v43, %v9869_v47  ;;  %v9891_v47 = vld [vmem:[#allocation55_spill] sm:$0xff]  ;;  %v5630_v25 = vld [vmem:[#allocation2 + $0x138] sm:$0xff] }
 0x31f   : > { %v2147_v37 = vsel %vm2133_vm10, %v2114_v26, %v1835_v15  ;;  %v2148_v59 = vsel %vm2133_vm10, %v2115_v21, %v1837_v42  ;;  %v2053_v26 = vsel %vm2034_vm7, %v2020_v31, %v9870_v46  ;;  %v9871_v15 = vld [vmem:[#allocation158_spill] sm:$0xff]  ;;  %v1991_v31 = vsel %vm1968_vm4, %v1958_v0, %v9890_v51  ;;  %v9910_v0 = vld [vmem:[#allocation72_spill] sm:$0xff] }
 0x320   : > { %5350 = vmatmul.mubr.msk.f32.gmra.mrb[12].mxu0 %vm2171_vm11, %v2147_v37  ;;  %v2085_v21 = vsel %vm2067_vm8, %v2052_v1, %v9871_v15  ;;  %v9872_v37 = vld [vmem:[#allocation157_spill] sm:$0xff]  ;;  %v9912_v51 = vld [vmem:[#allocation110_spill] sm:$0xff] }
 0x321   : > { %5352 = vmatprep.mubr.msk.f32.mxu0 %vm2171_vm11, %v2148_v59  ;;  %v2086_v42 = vsel %vm2067_vm8, %v2053_v26, %v9872_v37  ;;  %v9892_v26 = vld [vmem:[#allocation53_spill] sm:$0xff] }
 0x322   : > { %v1711_v56 = vpop.permute.xlu1 %1710  ;;  %v1713_v44 = vpop.permute.xlu0 %1712  ;;  %v2024_v15 = vsel %vm2001_vm5, %v1991_v31, %v9892_v26  ;;  %v9914_v26 = vld [vmem:[#allocation131_spill] sm:$0xff] }
 0x323   : > { %v2116_v11 = vsel %vm2100_vm9, %v2083_v63, %v1711_v56  ;;  %v2117_v9 = vsel %vm2100_vm9, %v2084_v53, %v1713_v44  ;;  %v1955_v56 = vsel %vm470_vm2, %v1923_v27, %v9875_v12  ;;  %v9881_v63 = vld [vmem:[#allocation138_spill] sm:$0xff]  ;;  %v9882_v53 = vld [vmem:[#allocation137_spill] sm:$0xff]  ;;  %v1927_v12 = vsel %vm414_vm0, %v5627_v4, %v9897_v16 }
 0x324   : > { %v1988_v33 = vsel %vm1968_vm4, %v1955_v56, %v9877_v54  ;;  %v1928_v54 = vsel %vm414_vm0, %v5628_v39, %v9898_v52 }
 0x325   : > { %v2021_v24 = vsel %vm2001_vm5, %v1988_v33, %v9879_v50  ;;  %v9899_v33 = vld [vmem:[#allocation109_spill] sm:$0xff]  ;;  %v1960_v19 = vsel %vm470_vm2, %v1928_v54, %v9900_v58  ;;  %v9901_v50 = vld [vmem:[#allocation130_spill] sm:$0xff] }
 0x326   : > { %v1839_v18 = vpop.permute.xlu1 %1838  ;;  %v1841_v40 = vpop.permute.xlu0 %1840  ;;  %v2054_v20 = vsel %vm2034_vm7, %v2021_v24, %v9881_v63  ;;  %v9903_v63 = vld [vmem:[#allocation59_spill] sm:$0xff]  ;;  %v2672_v54 = vld [vmem:[#allocation3 + $0x1] sm:$0xff] }
 0x327   : > { %v2149_v17 = vsel %vm2133_vm10, %v2116_v11, %v1839_v18  ;;  %v2150_v62 = vsel %vm2133_vm10, %v2117_v9, %v1841_v40  ;;  %v2055_v11 = vsel %vm2034_vm7, %v2022_v10, %v9882_v53  ;;  %v9883_v18 = vld [vmem:[#allocation160_spill] sm:$0xff]  ;;  %v1993_v10 = vsel %vm1968_vm4, %v1960_v19, %v9902_v38  ;;  %2961 = vrot.lane.b32.xlu0 %v2672_v54, %s5962_s12  ;;  %v9923_v38 = vld [vmem:[#allocation113_spill] sm:$0xff] }
 0x328   : > { %5353 = vmatmul.mubr.msk.f32.gmra.mrb[14].mxu0 %vm2171_vm11, %v2149_v17  ;;  %v2087_v9 = vsel %vm2067_vm8, %v2054_v20, %v9883_v18  ;;  %v9884_v17 = vld [vmem:[#allocation159_spill] sm:$0xff] }
 0x329   : > { %5355 = vmatprep.mubr.msk.f32.mxu0 %vm2171_vm11, %v2150_v62  ;;  %v2088_v40 = vsel %vm2067_vm8, %v2055_v11, %v9884_v17  ;;  %v9904_v11 = vld [vmem:[#allocation57_spill] sm:$0xff] }
 0x32a   : > { %v1715_v14 = vpop.permute.xlu1 %1714  ;;  %v1717_v57 = vpop.permute.xlu0 %1716  ;;  %v2026_v18 = vsel %vm2001_vm5, %v1993_v10, %v9904_v11 }
 0x32b   : > { %v2118_v29 = vsel %vm2100_vm9, %v2085_v21, %v1715_v14  ;;  %v2119_v55 = vsel %vm2100_vm9, %v2086_v42, %v1717_v57  ;;  %v1957_v14 = vsel %vm470_vm2, %v1925_v45, %v9887_v8  ;;  %v9893_v21 = vld [vmem:[#allocation140_spill] sm:$0xff]  ;;  %v9894_v42 = vld [vmem:[#allocation139_spill] sm:$0xff]  ;;  %v1929_v8 = vsel %vm414_vm0, %v5629_v28, %v9909_v3 }
 0x32c   : > { %v1990_v43 = vsel %vm1968_vm4, %v1957_v14, %v9889_v2  ;;  %v1930_v2 = vsel %vm414_vm0, %v5630_v25, %v9910_v0  ;;  %v9932_v28 = vld [vmem:[#allocation167_spill] sm:$0xff] }
 0x32d   : > { %v2023_v1 = vsel %vm2001_vm5, %v1990_v43, %v9891_v47  ;;  %v9911_v43 = vld [vmem:[#allocation111_spill] sm:$0xff]  ;;  %v1962_v31 = vsel %vm470_vm2, %v1930_v2, %v9912_v51  ;;  %v9913_v47 = vld [vmem:[#allocation132_spill] sm:$0xff] }
 0x32e   : > { %v1843_v61 = vpop.permute.xlu1 %1842  ;;  %v1845_v60 = vpop.permute.xlu0 %1844  ;;  %v2056_v37 = vsel %vm2034_vm7, %v2023_v1, %v9893_v21  ;;  %v9915_v21 = vld [vmem:[#allocation63_spill] sm:$0xff] }
 0x32f   : > { %v2151_v59 = vsel %vm2133_vm10, %v2118_v29, %v1843_v61  ;;  %v2152_v5 = vsel %vm2133_vm10, %v2119_v55, %v1845_v60  ;;  %v2057_v29 = vsel %vm2034_vm7, %v2024_v15, %v9894_v42  ;;  %v9895_v61 = vld [vmem:[#allocation162_spill] sm:$0xff]  ;;  %v1995_v15 = vsel %vm1968_vm4, %v1962_v31, %v9914_v26  ;;  %v9935_v26 = vld [vmem:[#allocation115_spill] sm:$0xff] }
 0x330   : > { %5356 = vmatmul.mubr.msk.f32.gmra.mrb[16].mxu0 %vm2171_vm11, %v2151_v59  ;;  %v2089_v55 = vsel %vm2067_vm8, %v2056_v37, %v9895_v61  ;;  %v9896_v59 = vld [vmem:[#allocation161_spill] sm:$0xff] }
 0x331   : > { %5358 = vmatprep.mubr.msk.f32.mxu0 %vm2171_vm11, %v2152_v5  ;;  %v2090_v60 = vsel %vm2067_vm8, %v2057_v29, %v9896_v59  ;;  %v9916_v29 = vld [vmem:[#allocation61_spill] sm:$0xff] }
 0x332   : > { %v1719_v44 = vpop.permute.xlu1 %1718  ;;  %v1721_v23 = vpop.permute.xlu0 %1720  ;;  %v2028_v61 = vsel %vm2001_vm5, %v1995_v15, %v9916_v29 }
 0x333   : > { %v2120_v22 = vsel %vm2100_vm9, %v2087_v9, %v1719_v44  ;;  %v2121_v32 = vsel %vm2100_vm9, %v2088_v40, %v1721_v23  ;;  %v1959_v44 = vsel %vm470_vm2, %v1927_v12, %v9899_v33  ;;  %v9905_v9 = vld [vmem:[#allocation142_spill] sm:$0xff]  ;;  %v9906_v40 = vld [vmem:[#allocation141_spill] sm:$0xff] }
 0x334   : > { %v1992_v24 = vsel %vm1968_vm4, %v1959_v44, %v9901_v50  ;;  %v2673_v12 = vld [vmem:[#allocation3 + $0x9] sm:$0xff]  ;;  %v5632_v50 = vld [vmem:[#allocation2 + $0x150] sm:$0xff] }
 0x335   : > { %v2025_v20 = vsel %vm2001_vm5, %v1992_v24, %v9903_v63  ;;  %2963 = vrot.lane.b32.xlu1 %v2673_v12, %s5962_s12  ;;  %v5631_v33 = vld [vmem:[#allocation2 + $0x140] sm:$0xff]  ;;  %v9922_v24 = vld [vmem:[#allocation76_spill] sm:$0xff] }
 0x336   : > { %v1847_v13 = vpop.permute.xlu1 %1846  ;;  %v1849_v34 = vpop.permute.xlu0 %1848  ;;  %v2058_v17 = vsel %vm2034_vm7, %v2025_v20, %v9905_v9  ;;  %v9921_v44 = vld [vmem:[#allocation78_spill] sm:$0xff]  ;;  %v9924_v63 = vld [vmem:[#allocation112_spill] sm:$0xff]  ;;  %v9926_v9 = vld [vmem:[#allocation133_spill] sm:$0xff] }
 0x337   : > { %v2153_v62 = vsel %vm2133_vm10, %v2120_v22, %v1847_v13  ;;  %v2154_v7 = vsel %vm2133_vm10, %v2121_v32, %v1849_v34  ;;  %v2059_v22 = vsel %vm2034_vm7, %v2026_v18, %v9906_v40  ;;  %v9907_v13 = vld [vmem:[#allocation164_spill] sm:$0xff]  ;;  %v1931_v58 = vsel %vm414_vm0, %v5631_v33, %v9921_v44  ;;  %v9927_v40 = vld [vmem:[#allocation67_spill] sm:$0xff] }
 0x338   : > { %5359 = vmatmul.mubr.msk.f32.gmra.mrb[18].mxu0 %vm2171_vm11, %v2153_v62  ;;  %v2091_v32 = vsel %vm2067_vm8, %v2058_v17, %v9907_v13  ;;  %v9908_v62 = vld [vmem:[#allocation163_spill] sm:$0xff]  ;;  %v1963_v10 = vsel %vm470_vm2, %v1931_v58, %v9923_v38 }
 0x339   : > { %5361 = vmatprep.mubr.msk.f32.mxu0 %vm2171_vm11, %v2154_v7  ;;  %v2092_v34 = vsel %vm2067_vm8, %v2059_v22, %v9908_v62 }
 0x33a   : > { %v1723_v57 = vpop.permute.xlu1 %1722  ;;  %v1725_v46 = vpop.permute.xlu0 %1724 }
 0x33b   : > { %v2122_v49 = vsel %vm2100_vm9, %v2089_v55, %v1723_v57  ;;  %v2123_v27 = vsel %vm2100_vm9, %v2090_v60, %v1725_v46  ;;  %v1961_v57 = vsel %vm470_vm2, %v1929_v8, %v9911_v43  ;;  %v9917_v55 = vld [vmem:[#allocation144_spill] sm:$0xff]  ;;  %v9918_v60 = vld [vmem:[#allocation143_spill] sm:$0xff]  ;;  %v5633_v43 = vld [vmem:[#allocation2 + $0x158] sm:$0xff] }
 0x33c   : > { %v1994_v1 = vsel %vm1968_vm4, %v1961_v57, %v9913_v47  ;;  %v9933_v57 = vld [vmem:[#allocation82_spill] sm:$0xff]  ;;  %v5634_v47 = vld [vmem:[#allocation2 + $0x168] sm:$0xff] }
 0x33d   : > { %v2027_v37 = vsel %vm2001_vm5, %v1994_v1, %v9915_v21  ;;  %v1933_v51 = vsel %vm414_vm0, %v5633_v43, %v9933_v57  ;;  %v9934_v1 = vld [vmem:[#allocation80_spill] sm:$0xff]  ;;  %v9936_v21 = vld [vmem:[#allocation114_spill] sm:$0xff] }
 0x33e   : > { %v1851_v35 = vpop.permute.xlu1 %1850  ;;  %v1853_v36 = vpop.permute.xlu0 %1852  ;;  %v2060_v59 = vsel %vm2034_vm7, %v2027_v37, %v9917_v55  ;;  %v1965_v15 = vsel %vm470_vm2, %v1933_v51, %v9935_v26  ;;  %v9938_v55 = vld [vmem:[#allocation135_spill] sm:$0xff] }
 0x33f   : > { %v2155_v5 = vsel %vm2133_vm10, %v2122_v49, %v1851_v35  ;;  %v2156_v56 = vsel %vm2133_vm10, %v2123_v27, %v1853_v36  ;;  %v2061_v49 = vsel %vm2034_vm7, %v2028_v61, %v9918_v60  ;;  %v9919_v35 = vld [vmem:[#allocation166_spill] sm:$0xff]  ;;  %v9939_v60 = vld [vmem:[#allocation71_spill] sm:$0xff] }
 0x340   : > { %5362 = vmatmul.mubr.msk.f32.gmra.mrb[20].mxu0 %vm2171_vm11, %v2155_v5  ;;  %v2093_v27 = vsel %vm2067_vm8, %v2060_v59, %v9919_v35  ;;  %v9920_v5 = vld [vmem:[#allocation165_spill] sm:$0xff] }
 0x341   : > { %5364 = vmatprep.mubr.msk.f32.mxu0 %vm2171_vm11, %v2156_v56  ;;  %v2094_v36 = vsel %vm2067_vm8, %v2061_v49, %v9920_v5 }
 0x342   : > { %v1727_v23 = vpop.permute.xlu1 %1726  ;;  %v1729_v53 = vpop.permute.xlu0 %1728 }
 0x343   : > { %v2124_v6 = vsel %vm2100_vm9, %v2091_v32, %v1727_v23  ;;  %v2125_v45 = vsel %vm2100_vm9, %v2092_v34, %v1729_v53  ;;  %v1932_v23 = vsel %vm414_vm0, %v5632_v50, %v9922_v24  ;;  %v9925_v53 = vld [vmem:[#allocation134_spill] sm:$0xff]  ;;  %v9928_v32 = vld [vmem:[#allocation65_spill] sm:$0xff]  ;;  %v5635_v24 = vld [vmem:[#allocation2 + $0x170] sm:$0xff] }
 0x344   : > { %v1964_v20 = vsel %vm470_vm2, %v1932_v23, %v9924_v63  ;;  %v1996_v11 = vsel %vm1968_vm4, %v1963_v10, %v9925_v53  ;;  %v9929_v34 = vld [vmem:[#allocation146_spill] sm:$0xff]  ;;  %v9946_v63 = vld [vmem:[#allocation116_spill] sm:$0xff] }
 0x345   : > { %v1997_v17 = vsel %vm1968_vm4, %v1964_v20, %v9926_v9  ;;  %v2029_v22 = vsel %vm2001_vm5, %v1996_v11, %v9927_v40  ;;  %v9945_v23 = vld [vmem:[#allocation86_spill] sm:$0xff]  ;;  %v9948_v9 = vld [vmem:[#allocation73_spill] sm:$0xff] }
 0x346   : > { %v1855_v41 = vpop.permute.xlu1 %1854  ;;  %v1857_v48 = vpop.permute.xlu0 %1856  ;;  %v2030_v62 = vsel %vm2001_vm5, %v1997_v17, %v9928_v32  ;;  %v1935_v38 = vsel %vm414_vm0, %v5635_v24, %v9945_v23  ;;  %v9947_v53 = vld [vmem:[#allocation26_spill] sm:$0xff]  ;;  %v9949_v40 = vld [vmem:[#allocation149_spill] sm:$0xff] }
 0x347   : > { %v2157_v7 = vsel %vm2133_vm10, %v2124_v6, %v1855_v41  ;;  %v2158_v14 = vsel %vm2133_vm10, %v2125_v45, %v1857_v48  ;;  %v2062_v6 = vsel %vm2034_vm7, %v2029_v22, %v9929_v34  ;;  %v9930_v41 = vld [vmem:[#allocation145_spill] sm:$0xff]  ;;  %v1967_v20 = vsel %vm470_vm2, %v1935_v38, %v9946_v63 }
 0x348   : > { %5365 = vmatmul.mubr.msk.f32.gmra.mrb[22].mxu0 %vm2171_vm11, %v2157_v7  ;;  %v2063_v45 = vsel %vm2034_vm7, %v2030_v62, %v9930_v41  ;;  %v9931_v7 = vld [vmem:[#allocation168_spill] sm:$0xff]  ;;  %v2000_v11 = vsel %vm1968_vm4, %v1967_v20, %v9947_v53 }
 0x349   : > { %5367 = vmatprep.mubr.msk.f32.mxu0 %vm2171_vm11, %v2158_v14  ;;  %v2095_v48 = vsel %vm2067_vm8, %v2062_v6, %v9931_v7  ;;  %v2096_v3 = vsel %vm2067_vm8, %v2063_v45, %v9932_v28  ;;  %v2033_v17 = vsel %vm2001_vm5, %v2000_v11, %v9948_v9  ;;  %v8090_v6 = vld [vmem:[#allocation9] ss:$0 sm:$0xff]  ;;  %v8092_v45 = vld [vmem:[#allocation10] ss:$0 sm:$0xff] }
 0x34a   : > { %v1731_v46 = vpop.permute.xlu1 %1730  ;;  %v1733_v42 = vpop.permute.xlu0 %1732  ;;  %v2066_v22 = vsel %vm2034_vm7, %v2033_v17, %v9949_v40 }
 0x34b   : > { %v2126_v4 = vsel %vm2100_vm9, %v2093_v27, %v1731_v46  ;;  %v2127_v56 = vsel %vm2100_vm9, %v2094_v36, %v1733_v42  ;;  %v1934_v46 = vsel %vm414_vm0, %v5634_v47, %v9934_v1  ;;  %v9937_v42 = vld [vmem:[#allocation136_spill] sm:$0xff]  ;;  %v9940_v27 = vld [vmem:[#allocation69_spill] sm:$0xff]  ;;  %vm4222_vm0 = vcmask 588800  }
 0x34c   : > { %v1966_v37 = vsel %vm470_vm2, %v1934_v46, %v9936_v21  ;;  %v1998_v29 = vsel %vm1968_vm4, %v1965_v15, %v9937_v42  ;;  %v9941_v36 = vld [vmem:[#allocation148_spill] sm:$0xff] }
 0x34d   : > { %v1999_v59 = vsel %vm1968_vm4, %v1966_v37, %v9938_v55  ;;  %v2031_v49 = vsel %vm2001_vm5, %v1998_v29, %v9939_v60 }
 0x34e   : > { %v1859_v16 = vpop.permute.xlu1 %1858  ;;  %v1861_v52 = vpop.permute.xlu0 %1860  ;;  %v2032_v5 = vsel %vm2001_vm5, %v1999_v59, %v9940_v27 }
 0x34f   : > { %v2159_v39 = vsel %vm2133_vm10, %v2126_v4, %v1859_v16  ;;  %v2160_v19 = vsel %vm2133_vm10, %v2127_v56, %v1861_v52  ;;  %v2064_v4 = vsel %vm2034_vm7, %v2031_v49, %v9941_v36  ;;  %v9942_v16 = vld [vmem:[#allocation147_spill] sm:$0xff]  ;;  %v9943_v56 = vld [vmem:[#allocation170_spill] sm:$0xff]  ;;  %v9944_v52 = vld [vmem:[#allocation169_spill] sm:$0xff] }
 0x350   : > { %5368 = vmatmul.mubr.msk.f32.gmra.mrb[24].mxu0 %vm2171_vm11, %v2159_v39  ;;  %v2065_v12 = vsel %vm2034_vm7, %v2032_v5, %v9942_v16  ;;  %v2097_v39 = vsel %vm2067_vm8, %v2064_v4, %v9943_v56 }
 0x351   : > { %5370 = vmatprep.mubr.msk.f32.mxu0 %vm2171_vm11, %v2160_v19  ;;  %v2098_v54 = vsel %vm2067_vm8, %v2065_v12, %v9944_v52 }
 0x352   : > { %v1735_v18 = vpop.permute.xlu1 %1734  ;;  %v1737_v13 = vpop.permute.xlu0 %1736 }
 0x353   : > { %v2128_v8 = vsel %vm2100_vm9, %v2095_v48, %v1735_v18  ;;  %v2129_v25 = vsel %vm2100_vm9, %v2096_v3, %v1737_v13  ;;  %v2099_v13 = vsel %vm2067_vm8, %v2066_v22, %v7561_v30 }
 0x356   : > { %v1863_v14 = vpop.permute.xlu1 %1862  ;;  %v1865_v2 = vpop.permute.xlu0 %1864 }
 0x357   : > { %v2161_v0 = vsel %vm2133_vm10, %v2128_v8, %v1863_v14  ;;  %v2162_v31 = vsel %vm2133_vm10, %v2129_v25, %v1865_v2 }
 0x358   : > { %5371 = vmatmul.mubr.msk.f32.gmra.mrb[26].mxu0 %vm2171_vm11, %v2161_v0 }
 0x359   : > { %5373 = vmatprep.mubr.msk.f32.mxu0 %vm2171_vm11, %v2162_v31 }
 0x35a   : > { %v1739_v61 = vpop.permute.xlu1 %1738  ;;  %v1741_v35 = vpop.permute.xlu0 %1740 }
 0x35b   : > { %v2130_v33 = vsel %vm2100_vm9, %v2097_v39, %v1739_v61  ;;  %v2131_v58 = vsel %vm2100_vm9, %v2098_v54, %v1741_v35 }
 0x35e   : > { %v1867_v44 = vpop.permute.xlu1 %1866  ;;  %v1869_v50 = vpop.permute.xlu0 %1868 }
 0x35f   : > { %v2163_v19 = vsel %vm2133_vm10, %v2130_v33, %v1867_v44  ;;  %v2164_v10 = vsel %vm2133_vm10, %v2131_v58, %v1869_v50 }
 0x360   : > { %5374 = vmatmul.mubr.msk.f32.gmra.mrb[28].mxu0 %vm2171_vm11, %v2163_v19 }
 0x361   : > { %5376 = vmatprep.mubr.msk.f32.mxu0 %vm2171_vm11, %v2164_v10 }
 0x362   : > { %v1743_v18 = vpop.permute.xlu1 %1742 }
 0x363   : > { %v2132_v32 = vsel %vm2100_vm9, %v2099_v13, %v1743_v18 }
 0x366   : > { %v1871_v62 = vpop.permute.xlu1 %1870 }
 0x367   : > { %v2165_v34 = vsel %vm2133_vm10, %v2132_v32, %v1871_v62 }
 0x368   : > { %5377 = vmatmul.mubr.msk.f32.gmra.mrb[30].mxu0 %vm2171_vm11, %v2165_v34 }
 0x3c4   : > { %v5333_v41 = vpop.f32.mrb[0].mxu0 }
 0x3c5   : > { %v2505_v7 = vmul.f32 %v5333_v41, %v8090_v6  ;;  %v2338_v48 = vpop.f32.mrb[1].mxu0 }
 0x3c6   : > { %v2504_v28 = vmul.f32 %v8090_v6, %v2338_v48 }
 0x3c7   : > { %v2544_v3 = vadd.f32 %v8092_v45, %v2505_v7 }
 0x3c8   : > { %v2543_v30 = vadd.f32 %v8092_v45, %v2504_v28 }
 0x3c9   : > { %v2576_v8 = vmax.f32 %v2544_v3, 0.0 }
 0x3ca   : > { %v2575_v14 = vmax.f32 %v2543_v30, 0.0 }
 0x3cb   : > { %2609 = vst.msk [vmem:[#allocation3 + $0x21] sm:$0xff] %vm470_vm2, %v2576_v8  ;;  %v5336_v25 = vpop.f32.mrb[2].mxu0 }
 0x3cc   : > { %2608 = vst.msk [vmem:[#allocation3 + $0x19] sm:$0xff] %vm470_vm2, %v2575_v14  ;;  %v2507_v0 = vmul.f32 %v5336_v25, %v8090_v6  ;;  %v2348_v2 = vpop.f32.mrb[3].mxu0 }
 0x3cd   : > { %v2506_v43 = vmul.f32 %v8090_v6, %v2348_v2 }
 0x3ce   : > { %v2546_v57 = vadd.f32 %v8092_v45, %v2507_v0 }
 0x3cf   : > { %v2545_v51 = vadd.f32 %v8092_v45, %v2506_v43 }
 0x3d0   : > { %v2578_v31 = vmax.f32 %v2546_v57, 0.0 }
 0x3d1   : > { %v2577_v47 = vmax.f32 %v2545_v51, 0.0 }
 0x3d2   : > { %2611 = vst.msk [vmem:[#allocation3 + $0x39] sm:$0xff] %vm470_vm2, %v2578_v31  ;;  %v2675_v1 = vld [vmem:[#allocation3 + $0x21] sm:$0xff] }
 0x3d3   : > { %2610 = vst.msk [vmem:[#allocation3 + $0x31] sm:$0xff] %vm470_vm2, %v2577_v47  ;;  %2967 = vrot.lane.b32.xlu1 %v2675_v1, %s5962_s12  ;;  %v5339_v46 = vpop.f32.mrb[4].mxu0  ;;  %v2674_v26 = vld [vmem:[#allocation3 + $0x19] sm:$0xff] }
 0x3d4   : > { %v2509_v15 = vmul.f32 %v5339_v46, %v8090_v6  ;;  %2965 = vrot.lane.b32.xlu0 %v2674_v26, %s5962_s12  ;;  %v2358_v21 = vpop.f32.mrb[5].mxu0 }
 0x3d5   : > { %v2508_v37 = vmul.f32 %v8090_v6, %v2358_v21 }
 0x3d6   : > { %v2548_v42 = vadd.f32 %v8092_v45, %v2509_v15 }
 0x3d7   : > { %v2547_v29 = vadd.f32 %v8092_v45, %v2508_v37 }
 0x3d8   : > { %v2580_v61 = vmax.f32 %v2548_v42, 0.0 }
 0x3d9   : > { %v2579_v55 = vmax.f32 %v2547_v29, 0.0  ;;  %v8112_v59 = vld [vmem:[#allocation3 + $0x39] sm:$0xff] }
 0x3da   : > { %2613 = vst.msk [vmem:[#allocation3 + $0x51] sm:$0xff] %vm470_vm2, %v2580_v61  ;;  %2971 = vrot.lane.b32.xlu1 %v8112_v59, %s5962_s12  ;;  %v8117_v60 = vld [vmem:[#allocation3 + $0x31] sm:$0xff] }
 0x3db   : > { %2612 = vst.msk [vmem:[#allocation3 + $0x49] sm:$0xff] %vm470_vm2, %v2579_v55  ;;  %2969 = vrot.lane.b32.xlu0 %v8117_v60, %s5962_s12  ;;  %v5342_v49 = vpop.f32.mrb[6].mxu0 }
 0x3dc   : > { %v2511_v35 = vmul.f32 %v5342_v49, %v8090_v6  ;;  %v2368_v27 = vpop.f32.mrb[7].mxu0 }
 0x3dd   : > { %v2510_v5 = vmul.f32 %v8090_v6, %v2368_v27 }
 0x3de   : > { %v2550_v36 = vadd.f32 %v8092_v45, %v2511_v35 }
 0x3df   : > { %v2549_v4 = vadd.f32 %v8092_v45, %v2510_v5 }
 0x3e0   : > { %v2582_v16 = vmax.f32 %v2550_v36, 0.0 }
 0x3e1   : > { %v2581_v12 = vmax.f32 %v2549_v4, 0.0  ;;  %v8126_v56 = vld [vmem:[#allocation3 + $0x51] sm:$0xff] }
 0x3e2   : > { %2615 = vst.msk [vmem:[#allocation3 + $0x69] sm:$0xff] %vm470_vm2, %v2582_v16  ;;  %2975 = vrot.lane.b32.xlu1 %v8126_v56, %s5962_s12  ;;  %v8131_v39 = vld [vmem:[#allocation3 + $0x49] sm:$0xff] }
 0x3e3   : > { %2614 = vst.msk [vmem:[#allocation3 + $0x61] sm:$0xff] %vm470_vm2, %v2581_v12  ;;  %2973 = vrot.lane.b32.xlu0 %v8131_v39, %s5962_s12  ;;  %v5345_v52 = vpop.f32.mrb[8].mxu0 }
 0x3e4   : > { %v2513_v54 = vmul.f32 %v5345_v52, %v8090_v6  ;;  %v2378_v33 = vpop.f32.mrb[9].mxu0 }
 0x3e5   : > { %v2512_v44 = vmul.f32 %v8090_v6, %v2378_v33 }
 0x3e6   : > { %v2552_v58 = vadd.f32 %v8092_v45, %v2513_v54 }
 0x3e7   : > { %v2551_v19 = vadd.f32 %v8092_v45, %v2512_v44 }
 0x3e8   : > { %v2584_v50 = vmax.f32 %v2552_v58, 0.0 }
 0x3e9   : > { %v2583_v24 = vmax.f32 %v2551_v19, 0.0  ;;  %v8140_v23 = vld [vmem:[#allocation3 + $0x69] sm:$0xff] }
 0x3ea   : > { %2617 = vst.msk [vmem:[#allocation3 + $0x81] sm:$0xff] %vm470_vm2, %v2584_v50  ;;  %2979 = vrot.lane.b32.xlu1 %v8140_v23, %s5962_s12  ;;  %v8145_v38 = vld [vmem:[#allocation3 + $0x61] sm:$0xff] }
 0x3eb   : > { %2616 = vst.msk [vmem:[#allocation3 + $0x79] sm:$0xff] %vm470_vm2, %v2583_v24  ;;  %2977 = vrot.lane.b32.xlu0 %v8145_v38, %s5962_s12  ;;  %v5348_v10 = vpop.f32.mrb[10].mxu0 }
 0x3ec   : > { %v2515_v63 = vmul.f32 %v5348_v10, %v8090_v6  ;;  %v2388_v20 = vpop.f32.mrb[11].mxu0 }
 0x3ed   : > { %v2514_v53 = vmul.f32 %v8090_v6, %v2388_v20 }
 0x3ee   : > { %v2554_v11 = vadd.f32 %v8092_v45, %v2515_v63 }
 0x3ef   : > { %v2553_v18 = vadd.f32 %v8092_v45, %v2514_v53 }
 0x3f0   : > { %v2586_v9 = vmax.f32 %v2554_v11, 0.0 }
 0x3f1   : > { %v2585_v17 = vmax.f32 %v2553_v18, 0.0  ;;  %v8154_v40 = vld [vmem:[#allocation3 + $0x81] sm:$0xff] }
 0x3f2   : > { %2619 = vst.msk [vmem:[#allocation3 + $0x99] sm:$0xff] %vm470_vm2, %v2586_v9  ;;  %2983 = vrot.lane.b32.xlu1 %v8154_v40, %s5962_s12  ;;  %v8159_v22 = vld [vmem:[#allocation3 + $0x79] sm:$0xff] }
 0x3f3   : > { %2618 = vst.msk [vmem:[#allocation3 + $0x91] sm:$0xff] %vm470_vm2, %v2585_v17  ;;  %2981 = vrot.lane.b32.xlu0 %v8159_v22, %s5962_s12  ;;  %v5351_v13 = vpop.f32.mrb[12].mxu0 }
 0x3f4   : > { %v2517_v32 = vmul.f32 %v5351_v13, %v8090_v6  ;;  %v2398_v62 = vpop.f32.mrb[13].mxu0 }
 0x3f5   : > { %v2516_v34 = vmul.f32 %v8090_v6, %v2398_v62 }
 0x3f6   : > { %v2556_v41 = vadd.f32 %v8092_v45, %v2517_v32 }
 0x3f7   : > { %v2555_v7 = vadd.f32 %v8092_v45, %v2516_v34 }
 0x3f8   : > { %v2588_v48 = vmax.f32 %v2556_v41, 0.0 }
 0x3f9   : > { %v2587_v28 = vmax.f32 %v2555_v7, 0.0  ;;  %v8168_v3 = vld [vmem:[#allocation3 + $0x99] sm:$0xff] }
 0x3fa   : > { %2621 = vst.msk [vmem:[#allocation3 + $0xb1] sm:$0xff] %vm470_vm2, %v2588_v48  ;;  %2987 = vrot.lane.b32.xlu1 %v8168_v3, %s5962_s12  ;;  %v8173_v30 = vld [vmem:[#allocation3 + $0x91] sm:$0xff] }
 0x3fb   : > { %2620 = vst.msk [vmem:[#allocation3 + $0xa9] sm:$0xff] %vm470_vm2, %v2587_v28  ;;  %2985 = vrot.lane.b32.xlu0 %v8173_v30, %s5962_s12  ;;  %v5354_v8 = vpop.f32.mrb[14].mxu0 }
 0x3fc   : > { %v2519_v14 = vmul.f32 %v5354_v8, %v8090_v6  ;;  %v2408_v25 = vpop.f32.mrb[15].mxu0 }
 0x3fd   : > { %v2518_v0 = vmul.f32 %v8090_v6, %v2408_v25 }
 0x3fe   : > { %v2558_v2 = vadd.f32 %v8092_v45, %v2519_v14 }
 0x3ff   : > { %v2557_v43 = vadd.f32 %v8092_v45, %v2518_v0 }
 0x400   : > { %v2590_v57 = vmax.f32 %v2558_v2, 0.0 }
 0x401   : > { %v2589_v51 = vmax.f32 %v2557_v43, 0.0  ;;  %v8182_v31 = vld [vmem:[#allocation3 + $0xb1] sm:$0xff] }
 0x402   : > { %2623 = vst.msk [vmem:[#allocation3 + $0xc9] sm:$0xff] %vm470_vm2, %v2590_v57  ;;  %2991 = vrot.lane.b32.xlu1 %v8182_v31, %s5962_s12  ;;  %v8187_v47 = vld [vmem:[#allocation3 + $0xa9] sm:$0xff] }
 0x403   : > { %2622 = vst.msk [vmem:[#allocation3 + $0xc1] sm:$0xff] %vm470_vm2, %v2589_v51  ;;  %2989 = vrot.lane.b32.xlu0 %v8187_v47, %s5962_s12  ;;  %v5357_v1 = vpop.f32.mrb[16].mxu0 }
 0x404   : > { %v2521_v46 = vmul.f32 %v5357_v1, %v8090_v6  ;;  %v2418_v26 = vpop.f32.mrb[17].mxu0 }
 0x405   : > { %v2520_v15 = vmul.f32 %v8090_v6, %v2418_v26 }
 0x406   : > { %v2560_v21 = vadd.f32 %v8092_v45, %v2521_v46 }
 0x407   : > { %v2559_v37 = vadd.f32 %v8092_v45, %v2520_v15 }
 0x408   : > { %v2592_v42 = vmax.f32 %v2560_v21, 0.0 }
 0x409   : > { %v2591_v29 = vmax.f32 %v2559_v37, 0.0  ;;  %v2689_v61 = vld [vmem:[#allocation3 + $0xc9] sm:$0xff] }
 0x40a   : > { %2625 = vst.msk [vmem:[#allocation3 + $0xe1] sm:$0xff] %vm470_vm2, %v2592_v42  ;;  %2995 = vrot.lane.b32.xlu1 %v2689_v61, %s5962_s12  ;;  %v2688_v55 = vld [vmem:[#allocation3 + $0xc1] sm:$0xff] }
 0x40b   : > { %2624 = vst.msk [vmem:[#allocation3 + $0xd9] sm:$0xff] %vm470_vm2, %v2591_v29  ;;  %2993 = vrot.lane.b32.xlu0 %v2688_v55, %s5962_s12  ;;  %v5360_v49 = vpop.f32.mrb[18].mxu0 }
 0x40c   : > { %v2523_v35 = vmul.f32 %v5360_v49, %v8090_v6  ;;  %v2428_v27 = vpop.f32.mrb[19].mxu0 }
 0x40d   : > { %v2522_v5 = vmul.f32 %v8090_v6, %v2428_v27 }
 0x40e   : > { %v2562_v36 = vadd.f32 %v8092_v45, %v2523_v35 }
 0x40f   : > { %v2561_v4 = vadd.f32 %v8092_v45, %v2522_v5 }
 0x410   : > { %v2594_v16 = vmax.f32 %v2562_v36, 0.0 }
 0x411   : > { %v2593_v12 = vmax.f32 %v2561_v4, 0.0  ;;  %v2691_v52 = vld [vmem:[#allocation3 + $0xe1] sm:$0xff] }
 0x412   : > { %2627 = vst.msk [vmem:[#allocation3 + $0xf9] sm:$0xff] %vm470_vm2, %v2594_v16  ;;  %2999 = vrot.lane.b32.xlu1 %v2691_v52, %s5962_s12  ;;  %v2690_v54 = vld [vmem:[#allocation3 + $0xd9] sm:$0xff] }
 0x413   : > { %2626 = vst.msk [vmem:[#allocation3 + $0xf1] sm:$0xff] %vm470_vm2, %v2593_v12  ;;  %2997 = vrot.lane.b32.xlu0 %v2690_v54, %s5962_s12  ;;  %v5363_v33 = vpop.f32.mrb[20].mxu0 }
 0x414   : > { %v2525_v44 = vmul.f32 %v5363_v33, %v8090_v6  ;;  %v2438_v58 = vpop.f32.mrb[21].mxu0 }
 0x415   : > { %v2524_v19 = vmul.f32 %v8090_v6, %v2438_v58 }
 0x416   : > { %v2564_v50 = vadd.f32 %v8092_v45, %v2525_v44 }
 0x417   : > { %v2563_v24 = vadd.f32 %v8092_v45, %v2524_v19 }
 0x418   : > { %v2596_v10 = vmax.f32 %v2564_v50, 0.0 }
 0x419   : > { %v2595_v63 = vmax.f32 %v2563_v24, 0.0  ;;  %v2693_v20 = vld [vmem:[#allocation3 + $0xf9] sm:$0xff] }
 0x41a   : > { %2629 = vst.msk [vmem:[#allocation3 + $0x111] sm:$0xff] %vm470_vm2, %v2596_v10  ;;  %3003 = vrot.lane.b32.xlu1 %v2693_v20, %s5962_s12  ;;  %v2692_v53 = vld [vmem:[#allocation3 + $0xf1] sm:$0xff] }
 0x41b   : > { %2628 = vst.msk [vmem:[#allocation3 + $0x109] sm:$0xff] %vm470_vm2, %v2595_v63  ;;  %3001 = vrot.lane.b32.xlu0 %v2692_v53, %s5962_s12  ;;  %v5366_v11 = vpop.f32.mrb[22].mxu0 }
 0x41c   : > { %v2527_v18 = vmul.f32 %v5366_v11, %v8090_v6  ;;  %v2448_v9 = vpop.f32.mrb[23].mxu0  ;;  %v2705_v11 = vld [vmem:[#allocation3 + $0xa] sm:$0xff] }
 0x41d   : > { %v2526_v17 = vmul.f32 %v8090_v6, %v2448_v9  ;;  %v8260_v9 = vld [vmem:[#allocation3 + $0x3a] sm:$0xff] }
 0x41e   : > { %v2566_v13 = vadd.f32 %v8092_v45, %v2527_v18  ;;  %v2704_v18 = vld [vmem:[#allocation3 + $0x2] sm:$0xff] }
 0x41f   : > { %v2565_v32 = vadd.f32 %v8092_v45, %v2526_v17  ;;  %v8264_v17 = vld [vmem:[#allocation3 + $0x32] sm:$0xff] }
 0x420   : > { %v2598_v62 = vmax.f32 %v2566_v13, 0.0  ;;  %v8268_v13 = vld [vmem:[#allocation3 + $0x52] sm:$0xff] }
 0x421   : > { %v2597_v34 = vmax.f32 %v2565_v32, 0.0  ;;  %v2695_v41 = vld [vmem:[#allocation3 + $0x111] sm:$0xff] }
 0x422   : > { %2631 = vst.msk [vmem:[#allocation3 + $0x129] sm:$0xff] %vm470_vm2, %v2598_v62  ;;  %3007 = vrot.lane.b32.xlu1 %v2695_v41, %s5962_s12  ;;  %v2694_v7 = vld [vmem:[#allocation3 + $0x109] sm:$0xff] }
 0x423   : > { %2630 = vst.msk [vmem:[#allocation3 + $0x121] sm:$0xff] %vm470_vm2, %v2597_v34  ;;  %3005 = vrot.lane.b32.xlu0 %v2694_v7, %s5962_s12  ;;  %v5369_v48 = vpop.f32.mrb[24].mxu0  ;;  %v8272_v32 = vld [vmem:[#allocation3 + $0x4a] sm:$0xff]  ;;  %v8280_v34 = vld [vmem:[#allocation3 + $0x62] sm:$0xff]  ;;  %v8288_v7 = vld [vmem:[#allocation3 + $0x7a] sm:$0xff] }
 0x424   : > { %v2529_v28 = vmul.f32 %v5369_v48, %v8090_v6  ;;  %v2458_v8 = vpop.f32.mrb[25].mxu0  ;;  %v8276_v62 = vld [vmem:[#allocation3 + $0x6a] sm:$0xff]  ;;  %v8284_v41 = vld [vmem:[#allocation3 + $0x82] sm:$0xff]  ;;  %v8292_v48 = vld [vmem:[#allocation3 + $0x9a] sm:$0xff] }
 0x425   : > { %v2528_v14 = vmul.f32 %v8090_v6, %v2458_v8  ;;  %v8300_v8 = vld [vmem:[#allocation3 + $0xb2] sm:$0xff] }
 0x426   : > { %v2568_v25 = vadd.f32 %v8092_v45, %v2529_v28  ;;  %v8296_v28 = vld [vmem:[#allocation3 + $0x92] sm:$0xff] }
 0x427   : > { %v2567_v0 = vadd.f32 %v8092_v45, %v2528_v14  ;;  %v8304_v14 = vld [vmem:[#allocation3 + $0xaa] sm:$0xff] }
 0x428   : > { %v2600_v2 = vmax.f32 %v2568_v25, 0.0  ;;  %v8308_v25 = vld [vmem:[#allocation3 + $0xca] sm:$0xff] }
 0x429   : > { %v2599_v43 = vmax.f32 %v2567_v0, 0.0  ;;  %v2697_v57 = vld [vmem:[#allocation3 + $0x129] sm:$0xff] }
 0x42a   : > { %2633 = vst.msk [vmem:[#allocation3 + $0x141] sm:$0xff] %vm470_vm2, %v2600_v2  ;;  %3011 = vrot.lane.b32.xlu1 %v2697_v57, %s5962_s12  ;;  %v2696_v51 = vld [vmem:[#allocation3 + $0x121] sm:$0xff] }
 0x42b   : > { %2632 = vst.msk [vmem:[#allocation3 + $0x139] sm:$0xff] %vm470_vm2, %v2599_v43  ;;  %3009 = vrot.lane.b32.xlu0 %v2696_v51, %s5962_s12  ;;  %v5372_v1 = vpop.f32.mrb[26].mxu0  ;;  %v8312_v0 = vld [vmem:[#allocation3 + $0xc2] sm:$0xff]  ;;  %v8320_v43 = vld [vmem:[#allocation3 + $0xda] sm:$0xff]  ;;  %v8328_v51 = vld [vmem:[#allocation3 + $0xf2] sm:$0xff] }
 0x42c   : > { %v2531_v46 = vmul.f32 %v5372_v1, %v8090_v6  ;;  %v2468_v26 = vpop.f32.mrb[27].mxu0  ;;  %v8316_v2 = vld [vmem:[#allocation3 + $0xe2] sm:$0xff]  ;;  %v8324_v57 = vld [vmem:[#allocation3 + $0xfa] sm:$0xff]  ;;  %v2727_v1 = vld [vmem:[#allocation3 + $0x112] sm:$0xff] }
 0x42d   : > { %v2530_v15 = vmul.f32 %v8090_v6, %v2468_v26  ;;  %v2729_v26 = vld [vmem:[#allocation3 + $0x12a] sm:$0xff] }
 0x42e   : > { %v2570_v21 = vadd.f32 %v8092_v45, %v2531_v46  ;;  %v8333_v46 = vld [vmem:[#allocation3 + $0x10a] sm:$0xff] }
 0x42f   : > { %v2569_v37 = vadd.f32 %v8092_v45, %v2530_v15  ;;  %9950 = vst [vmem:[#allocation25_spill] sm:$0xff] %v8333_v46  ;;  %v8337_v15 = vpop.permute.xlu1 %2963 }
 0x430   : > { %v2602_v42 = vmax.f32 %v2570_v21, 0.0  ;;  %9951 = vst [vmem:[#allocation27_spill] sm:$0xff] %v8337_v15  ;;  %v2728_v21 = vld [vmem:[#allocation3 + $0x122] sm:$0xff] }
 0x431   : > { %v2601_v29 = vmax.f32 %v2569_v37, 0.0  ;;  %v2699_v61 = vld [vmem:[#allocation3 + $0x141] sm:$0xff]  ;;  %v8340_v37 = vpop.permute.xlu0 %2961 }
 0x432   : > { %2635 = vst.msk [vmem:[#allocation3 + $0x159] sm:$0xff] %vm470_vm2, %v2602_v42  ;;  %3015 = vrot.lane.b32.xlu1 %v2699_v61, %s5962_s12  ;;  %v2698_v55 = vld [vmem:[#allocation3 + $0x139] sm:$0xff]  ;;  %9952 = vst [vmem:[#allocation29_spill] sm:$0xff] %v8340_v37  ;;  %v2731_v42 = vld [vmem:[#allocation3 + $0x142] sm:$0xff] }
 0x433   : > { %2634 = vst.msk [vmem:[#allocation3 + $0x151] sm:$0xff] %vm470_vm2, %v2601_v29  ;;  %3013 = vrot.lane.b32.xlu0 %v2698_v55, %s5962_s12  ;;  %v5375_v49 = vpop.f32.mrb[28].mxu0  ;;  %v2730_v29 = vld [vmem:[#allocation3 + $0x13a] sm:$0xff]  ;;  %v8435_v15 = vld [vmem:[#allocation3 + $0xa8] sm:$0xff] }
 0x434   : > { %v2533_v35 = vmul.f32 %v5375_v49, %v8090_v6  ;;  %v2478_v27 = vpop.f32.mrb[29].mxu0  ;;  %9968 = vst [vmem:[#allocation42_spill] sm:$0xff] %v8435_v15 }
 0x435   : > { %v2532_v5 = vmul.f32 %v8090_v6, %v2478_v27 }
 0x436   : > { %v2572_v36 = vadd.f32 %v8092_v45, %v2533_v35 }
 0x437   : > { %v2571_v4 = vadd.f32 %v8092_v45, %v2532_v5 }
 0x438   : > { %v2604_v16 = vmax.f32 %v2572_v36, 0.0 }
 0x439   : > { %v2603_v12 = vmax.f32 %v2571_v4, 0.0  ;;  %v2701_v52 = vld [vmem:[#allocation3 + $0x159] sm:$0xff] }
 0x43a   : > { %2637 = vst.msk [vmem:[#allocation3 + $0x171] sm:$0xff] %vm470_vm2, %v2604_v16  ;;  %3019 = vrot.lane.b32.xlu1 %v2701_v52, %s5962_s12  ;;  %v2700_v54 = vld [vmem:[#allocation3 + $0x151] sm:$0xff]  ;;  %v2733_v49 = vld [vmem:[#allocation3 + $0x15a] sm:$0xff] }
 0x43b   : > { %2636 = vst.msk [vmem:[#allocation3 + $0x169] sm:$0xff] %vm470_vm2, %v2603_v12  ;;  %3017 = vrot.lane.b32.xlu0 %v2700_v54, %s5962_s12  ;;  %v5378_v33 = vpop.f32.mrb[30].mxu0  ;;  %v2732_v35 = vld [vmem:[#allocation3 + $0x152] sm:$0xff]  ;;  %v8359_v12 = vld [vmem:[#allocation3 + $0x20] sm:$0xff] }
 0x43c   : > { %v2535_v44 = vmul.f32 %v5378_v33, %v8090_v6  ;;  %v2488_v58 = vpop.f32.mrb[31].mxu0  ;;  %v8363_v54 = vld [vmem:[#allocation3 + $0x18] sm:$0xff] }
 0x43d   : > { %v2534_v19 = vmul.f32 %v8090_v6, %v2488_v58  ;;  %v2707_v6 = vld [vmem:[#allocation3 + $0x22] sm:$0xff] }
 0x43e   : > { %v2574_v50 = vadd.f32 %v8092_v45, %v2535_v44  ;;  %v8371_v44 = vld [vmem:[#allocation3 + $0x38] sm:$0xff] }
 0x43f   : > { %v2573_v24 = vadd.f32 %v8092_v45, %v2534_v19  ;;  %v2706_v45 = vld [vmem:[#allocation3 + $0x1a] sm:$0xff]  ;;  %v8375_v19 = vld [vmem:[#allocation3 + $0x30] sm:$0xff] }
 0x440   : > { %v2606_v10 = vmax.f32 %v2574_v50, 0.0 }
 0x441   : > { %v2605_v63 = vmax.f32 %v2573_v24, 0.0  ;;  %v2703_v20 = vld [vmem:[#allocation3 + $0x171] sm:$0xff] }
 0x442   : > { %2639 = vst.msk [vmem:[#allocation3 + $0x189] sm:$0xff] %vm470_vm2, %v2606_v10  ;;  %3023 = vrot.lane.b32.xlu1 %v2703_v20, %s5962_s12  ;;  %v2702_v53 = vld [vmem:[#allocation3 + $0x169] sm:$0xff]  ;;  %v2735_v36 = vld [vmem:[#allocation3 + $0x172] sm:$0xff] }
 0x443   : > { %2638 = vst.msk [vmem:[#allocation3 + $0x181] sm:$0xff] %vm470_vm2, %v2605_v63  ;;  %3021 = vrot.lane.b32.xlu0 %v2702_v53, %s5962_s12  ;;  %v2734_v4 = vld [vmem:[#allocation3 + $0x16a] sm:$0xff]  ;;  %s406_s12 = scalar_lea.vmem [#allocation16], %s5165_s24 }
 0x444   : > { %v8383_v24 = vld [vmem:[#allocation3 + $0x50] sm:$0xff]  ;;  %v8387_v63 = vld [vmem:[#allocation3 + $0x48] sm:$0xff]  ;;  %s4941_s13 = sshll.u32 %s406_s12, 4  ;;  %s9450_s13 = int_to_ptr.vmem [resolvable:$true] %s4941_s13 }
 0x445   : > { %v8345_v61 = vpop.permute.xlu1 %2967  ;;  %v8395_v53 = vld [vmem:[#allocation3 + $0x68] sm:$0xff] }
 0x446   : > { %3091 = vrot.lane.b32.xlu1 %v2705_v11, %s5964_s21  ;;  %v8347_v55 = vpop.permute.xlu0 %2965 }
 0x447   : > { %3089 = vrot.lane.b32.xlu0 %v2704_v18, %s5964_s21  ;;  %v8399_v18 = vld [vmem:[#allocation3 + $0x60] sm:$0xff] }
 0x44a   : > { %3095 = vrot.lane.b32.xlu1 %v2707_v6, %s5964_s21 }
 0x44b   : > { %3093 = vrot.lane.b32.xlu0 %v2706_v45, %s5964_s21  ;;  %v8407_v45 = vld [vmem:[#allocation3 + $0x80] sm:$0xff] }
 0x44c   : > { %v8351_v27 = vpop.permute.xlu1 %2971 }
 0x44d   : > { %v8353_v5 = vpop.permute.xlu0 %2969 }
 0x44e   : > { %3099 = vrot.lane.b32.xlu1 %v8260_v9, %s5964_s21 }
 0x44f   : > { %3097 = vrot.lane.b32.xlu0 %v8264_v17, %s5964_s21 }
 0x452   : > { %3103 = vrot.lane.b32.xlu1 %v8268_v13, %s5964_s21 }
 0x453   : > { %3101 = vrot.lane.b32.xlu0 %v8272_v32, %s5964_s21 }
 0x454   : > { %v8357_v16 = vpop.permute.xlu1 %2975 }
 0x455   : > { %9953 = vst [vmem:[#allocation35_spill] sm:$0xff] %v8357_v16  ;;  %v8361_v52 = vpop.permute.xlu0 %2973  ;;  %v4218_v16 = vld [vmem:[#allocation12 + $0x28] sm:$0xff] }
 0x456   : > { %3107 = vrot.lane.b32.xlu1 %v8276_v62, %s5964_s21  ;;  %9954 = vst [vmem:[#allocation89_spill] sm:$0xff] %v8361_v52 }
 0x457   : > { %3105 = vrot.lane.b32.xlu0 %v8280_v34, %s5964_s21 }
 0x45a   : > { %3111 = vrot.lane.b32.xlu1 %v8284_v41, %s5964_s21 }
 0x45b   : > { %3109 = vrot.lane.b32.xlu0 %v8288_v7, %s5964_s21 }
 0x45c   : > { %v8369_v33 = vpop.permute.xlu1 %2979 }
 0x45d   : > { %9955 = vst [vmem:[#allocation84_spill] sm:$0xff] %v8369_v33  ;;  %v8373_v58 = vpop.permute.xlu0 %2977  ;;  %v4215_v33 = vld [vmem:[#allocation12 + $0x10] sm:$0xff] }
 0x45e   : > { %3115 = vrot.lane.b32.xlu1 %v8292_v48, %s5964_s21  ;;  %9956 = vst [vmem:[#allocation88_spill] sm:$0xff] %v8373_v58  ;;  %v4216_v58 = vld [vmem:[#allocation12 + $0x18] sm:$0xff] }
 0x45f   : > { %3113 = vrot.lane.b32.xlu0 %v8296_v28, %s5964_s21 }
 0x462   : > { %3119 = vrot.lane.b32.xlu1 %v8300_v8, %s5964_s21 }
 0x463   : > { %3117 = vrot.lane.b32.xlu0 %v8304_v14, %s5964_s21 }
 0x464   : > { %v8381_v50 = vpop.permute.xlu1 %2983 }
 0x465   : > { %9957 = vst [vmem:[#allocation33_spill] sm:$0xff] %v8381_v50  ;;  %v8385_v10 = vpop.permute.xlu0 %2981 }
 0x466   : > { %3123 = vrot.lane.b32.xlu1 %v8308_v25, %s5964_s21  ;;  %9958 = vst [vmem:[#allocation31_spill] sm:$0xff] %v8385_v10  ;;  %v8467_v10 = vld [vmem:[#allocation3 + $0xf8] sm:$0xff] }
 0x467   : > { %3121 = vrot.lane.b32.xlu0 %v8312_v0, %s5964_s21 }
 0x46a   : > { %3127 = vrot.lane.b32.xlu1 %v8316_v2, %s5964_s21 }
 0x46b   : > { %3125 = vrot.lane.b32.xlu0 %v8320_v43, %s5964_s21 }
 0x46c   : > { %v8393_v20 = vpop.permute.xlu1 %2987 }
 0x46d   : > { %9959 = vst [vmem:[#allocation92_spill] sm:$0xff] %v8393_v20  ;;  %v8397_v11 = vpop.permute.xlu0 %2985  ;;  %v8459_v20 = vld [vmem:[#allocation3 + $0xd8] sm:$0xff] }
 0x46e   : > { %3131 = vrot.lane.b32.xlu1 %v8324_v57, %s5964_s21  ;;  %9960 = vst [vmem:[#allocation91_spill] sm:$0xff] %v8397_v11 }
 0x46f   : > { %3129 = vrot.lane.b32.xlu0 %v8328_v51, %s5964_s21 }
 0x472   : > { %3135 = vrot.lane.b32.xlu1 %v2727_v1, %s5964_s21 }
 0x473   : > { %3133 = vrot.lane.b32.xlu0 %v8333_v46, %s5964_s21  ;;  %v4217_v46 = vld [vmem:[#allocation12 + $0x20] sm:$0xff] }
 0x474   : > { %v8405_v6 = vpop.permute.xlu1 %2991  ;;  %v5461_v52 = vpack.c.bf16 %v4218_v16, %v4217_v46 }
 0x475   : > { %9961 = vst [vmem:[#allocation37_spill] sm:$0xff] %v8405_v6  ;;  %v8409_v1 = vpop.permute.xlu0 %2989  ;;  %v8447_v6 = vld [vmem:[#allocation3 + $0xc0] sm:$0xff] }
 0x476   : > { %3139 = vrot.lane.b32.xlu1 %v2729_v26, %s5964_s21  ;;  %9962 = vst [vmem:[#allocation34_spill] sm:$0xff] %v8409_v1  ;;  %v8411_v26 = vld [vmem:[#allocation3 + $0x78] sm:$0xff]  ;;  %9972 = vst [vmem:[#allocation44_spill] sm:$0xff] %v8447_v6 }
 0x477   : > { %3137 = vrot.lane.b32.xlu0 %v2728_v21, %s5964_s21 }
 0x47a   : > { %3143 = vrot.lane.b32.xlu1 %v2731_v42, %s5964_s21  ;;  %v8419_v42 = vld [vmem:[#allocation3 + $0x98] sm:$0xff] }
 0x47b   : > { %3141 = vrot.lane.b32.xlu0 %v2730_v29, %s5964_s21 }
 0x47c   : > { %v8417_v21 = vpop.permute.xlu1 %2995 }
 0x47d   : > { %9963 = vst [vmem:[#allocation94_spill] sm:$0xff] %v8417_v21  ;;  %v8421_v29 = vpop.permute.xlu0 %2993  ;;  %v8443_v21 = vld [vmem:[#allocation3 + $0xc8] sm:$0xff] }
 0x47e   : > { %3147 = vrot.lane.b32.xlu1 %v2733_v49, %s5964_s21  ;;  %9964 = vst [vmem:[#allocation93_spill] sm:$0xff] %v8421_v29  ;;  %v8423_v49 = vld [vmem:[#allocation3 + $0x90] sm:$0xff]  ;;  %9970 = vst [vmem:[#allocation150_spill] sm:$0xff] %v8443_v21 }
 0x47f   : > { %3145 = vrot.lane.b32.xlu0 %v2732_v35, %s5964_s21 }
 0x482   : > { %3151 = vrot.lane.b32.xlu1 %v2735_v36, %s5964_s21  ;;  %v8431_v36 = vld [vmem:[#allocation3 + $0xb0] sm:$0xff] }
 0x483   : > { %3149 = vrot.lane.b32.xlu0 %v2734_v4, %s5964_s21  ;;  %9966 = vst [vmem:[#allocation38_spill] sm:$0xff] %v8431_v36  ;;  %s413_s21 = scalar_lea.vmem [#allocation17], %s5165_s24  ;;  %s5973_s24 = smov [#allocation16]  }
 0x484   : > { %v8429_v35 = vpop.permute.xlu1 %2999  ;;  %s4954_s9 = sshll.u32 %s413_s21, 4  ;;  %s9457_s9 = int_to_ptr.vmem [resolvable:$true] %s4954_s9 }
 0x485   : > { %9965 = vst [vmem:[#allocation39_spill] sm:$0xff] %v8429_v35  ;;  %v8433_v4 = vpop.permute.xlu0 %2997 }
 0x486   : > { %3219 = vrot.lane.b32.xlu1 %v8359_v12, %s5966_s25  ;;  %9967 = vst [vmem:[#allocation95_spill] sm:$0xff] %v8433_v4  ;;  %v8455_v4 = vld [vmem:[#allocation3 + $0xe0] sm:$0xff] }
 0x487   : > { %3217 = vrot.lane.b32.xlu0 %v8363_v54, %s5966_s25 }
 0x48a   : > { %3223 = vrot.lane.b32.xlu1 %v8371_v44, %s5966_s25 }
 0x48b   : > { %3221 = vrot.lane.b32.xlu0 %v8375_v19, %s5966_s25 }
 0x48c   : > { %v8441_v37 = vpop.permute.xlu1 %3003 }
 0x48d   : > { %9969 = vst [vmem:[#allocation40_spill] sm:$0xff] %v8441_v37  ;;  %v8445_v29 = vpop.permute.xlu0 %3001  ;;  %v4213_v37 = vld [vmem:[#allocation12] sm:$0xff] }
 0x48e   : > { %3227 = vrot.lane.b32.xlu1 %v8383_v24, %s5966_s25  ;;  %9971 = vst [vmem:[#allocation46_spill] sm:$0xff] %v8445_v29  ;;  %v4214_v29 = vld [vmem:[#allocation12 + $0x8] sm:$0xff] }
 0x48f   : > { %3225 = vrot.lane.b32.xlu0 %v8387_v63, %s5966_s25  ;;  %v5453_v11 = vpack.c.bf16 %v4214_v29, %v4213_v37  ;;  %v5457_v37 = vpack.c.bf16 %v4216_v58, %v4215_v33 }
 0x491   : > { %5469 = vmatprep.subr.bf16.mxu1 %v5453_v11  ;;  %5454 = vmatprep.subr.bf16.mxu0 %v5453_v11 }
 0x492   : > { %3231 = vrot.lane.b32.xlu1 %v8395_v53, %s5966_s25  ;;  %5474 = vmatpush3.bf16.msra.mxu1 %v5453_v11 }
 0x493   : > { %3229 = vrot.lane.b32.xlu0 %v8399_v18, %s5966_s25  ;;  %5456 = vmatpush3.bf16.msra.mxu0 %v5453_v11  ;;  %v4220_v11 = vld [vmem:[#allocation12 + $0x38] sm:$0xff] }
 0x494   : > { %v8453_v35 = vpop.permute.xlu1 %3007  ;;  %5470 = vmatprep.subr.bf16.mxu1 %v5457_v37  ;;  %5458 = vmatprep.subr.bf16.mxu0 %v5457_v37 }
 0x495   : > { %9973 = vst [vmem:[#allocation97_spill] sm:$0xff] %v8453_v35  ;;  %v8457_v1 = vpop.permute.xlu0 %3005 }
 0x496   : > { %3235 = vrot.lane.b32.xlu1 %v8407_v45, %s5966_s25  ;;  %9974 = vst [vmem:[#allocation96_spill] sm:$0xff] %v8457_v1  ;;  %v8471_v1 = vld [vmem:[#allocation3 + $0xf0] sm:$0xff]  ;;  %5475 = vmatpush3.bf16.msra.mxu1 %v5457_v37 }
 0x497   : > { %3233 = vrot.lane.b32.xlu0 %v8411_v26, %s5966_s25  ;;  %5460 = vmatpush3.bf16.msra.mxu0 %v5457_v37 }
 0x498   : > { %5471 = vmatprep.subr.bf16.mxu1 %v5461_v52  ;;  %5462 = vmatprep.subr.bf16.mxu0 %v5461_v52 }
 0x49a   : > { %3239 = vrot.lane.b32.xlu1 %v8419_v42, %s5966_s25  ;;  %5476 = vmatpush3.bf16.msra.mxu1 %v5461_v52 }
 0x49b   : > { %3237 = vrot.lane.b32.xlu0 %v8423_v49, %s5966_s25  ;;  %5464 = vmatpush3.bf16.msra.mxu0 %v5461_v52 }
 0x49c   : > { %v8465_v50 = vpop.permute.xlu1 %3011 }
 0x49d   : > { %9975 = vst [vmem:[#allocation118_spill] sm:$0xff] %v8465_v50  ;;  %v8469_v35 = vpop.permute.xlu0 %3009 }
 0x49e   : > { %3243 = vrot.lane.b32.xlu1 %v8431_v36, %s5966_s25  ;;  %9976 = vst [vmem:[#allocation117_spill] sm:$0xff] %v8469_v35  ;;  %v8481_v35 = vld [vmem:[#allocation3 + $0x108] sm:$0xff] }
 0x49f   : > { %3241 = vrot.lane.b32.xlu0 %v8435_v15, %s5966_s25 }
 0x4a2   : > { %3247 = vrot.lane.b32.xlu1 %v8443_v21, %s5966_s25 }
 0x4a3   : > { %3245 = vrot.lane.b32.xlu0 %v8447_v6, %s5966_s25 }
 0x4a4   : > { %v8477_v29 = vpop.permute.xlu1 %3015 }
 0x4a5   : > { %9977 = vst [vmem:[#allocation30_spill] sm:$0xff] %v8477_v29  ;;  %v8479_v50 = vpop.permute.xlu0 %3013 }
 0x4a6   : > { %3251 = vrot.lane.b32.xlu1 %v8455_v4, %s5966_s25  ;;  %9978 = vst [vmem:[#allocation28_spill] sm:$0xff] %v8479_v50 }
 0x4a7   : > { %3249 = vrot.lane.b32.xlu0 %v8459_v20, %s5966_s25 }
 0x4aa   : > { %3255 = vrot.lane.b32.xlu1 %v8467_v10, %s5966_s25 }
 0x4ab   : > { %3253 = vrot.lane.b32.xlu0 %v8471_v1, %s5966_s25 }
 0x4ac   : > { %v8487_v33 = vpop.permute.xlu1 %3019 }
 0x4ad   : > { %9979 = vst [vmem:[#allocation77_spill] sm:$0xff] %v8487_v33  ;;  %v8489_v58 = vpop.permute.xlu0 %3017 }
 0x4ae   : > { %3349 = vrot.lane.b32.xlu1 %v8117_v60, %s5968_s19  ;;  %9980 = vst [vmem:[#allocation75_spill] sm:$0xff] %v8489_v58  ;;  %v4219_v60 = vld [vmem:[#allocation12 + $0x30] sm:$0xff] }
 0x4af   : > { %3257 = vrot.lane.b32.xlu0 %v8481_v35, %s5966_s25  ;;  %v5465_v29 = vpack.c.bf16 %v4220_v11, %v4219_v60 }
 0x4b1   : > { %5472 = vmatprep.subr.bf16.mxu1 %v5465_v29  ;;  %5466 = vmatprep.subr.bf16.mxu0 %v5465_v29 }
 0x4b2   : > { %3477 = vrot.lane.b32.xlu1 %v8264_v17, %s5969_s22  ;;  %5477 = vmatpush3.bf16.msra.mxu1 %v5465_v29  ;;  %v4221_v17 = vld [vmem:[#allocation12 + $0x40] sm:$0xff] }
 0x4b3   : > { %3351 = vrot.lane.b32.xlu0 %v8112_v59, %s5968_s19  ;;  %5468 = vmatpush3.bf16.msra.mxu0 %v5465_v29 }
 0x4b4   : > { %v8495_v46 = vpop.permute.xlu1 %3023  ;;  %5473 = vmatprep.subr.mxu1 %v4221_v17  ;;  %5395 = vmatprep.subr.mxu0 %v4221_v17 }
 0x4b5   : > { %9981 = vst [vmem:[#allocation152_spill] sm:$0xff] %v8495_v46  ;;  %v8497_v16 = vpop.permute.xlu0 %3021 }
 0x4b6   : > { %9982 = vst [vmem:[#allocation151_spill] sm:$0xff] %v8497_v16  ;;  %3605 = vrot.lane.b32.xlu1 %v8387_v63, %s5970_s20  ;;  %5478 = vmatpush3.msra.mxu1 %v4221_v17 }
 0x4b7   : > { %3479 = vrot.lane.b32.xlu0 %v8260_v9, %s5969_s22  ;;  %5396 = vmatpush3.msra.mxu0 %v4221_v17 }
 0x4b8   : > { %v8503_v37 = vpop.permute.xlu1 %3091 }
 0x4b9   : > { %9983 = vst [vmem:[#allocation50_spill] sm:$0xff] %v8503_v37  ;;  %v8505_v59 = vpop.permute.xlu0 %3089 }
 0x4ba   : > { %9984 = vst [vmem:[#allocation48_spill] sm:$0xff] %v8505_v59  ;;  %3733 = vrot.lane.b32.xlu1 %v8131_v39, %s5971_s23 }
 0x4bb   : > { %3607 = vrot.lane.b32.xlu0 %v8383_v24, %s5970_s20 }
 0x4bc   : > { %v8511_v52 = vpop.permute.xlu1 %3095 }
 0x4bd   : > { %v8513_v9 = vpop.permute.xlu0 %3093 }
 0x4be   : > { %3735 = vrot.lane.b32.xlu1 %v8126_v56, %s5971_s23 }
 0x4bf   : > { %3353 = vrot.lane.b32.xlu0 %v8131_v39, %s5968_s19 }
 0x4c0   : > { %v8519_v29 = vpop.permute.xlu1 %3099 }
 0x4c1   : > { %v8521_v60 = vpop.permute.xlu0 %3097 }
 0x4c2   : > { %3355 = vrot.lane.b32.xlu1 %v8126_v56, %s5968_s19 }
 0x4c3   : > { %3861 = vrot.lane.b32.xlu0 %v8272_v32, %s5972_s16 }
 0x4c4   : > { %v8527_v11 = vpop.permute.xlu1 %3103 }
 0x4c5   : > { %v8529_v17 = vpop.permute.xlu0 %3101 }
 0x4c6   : > { %3863 = vrot.lane.b32.xlu1 %v8268_v13, %s5972_s16 }
 0x4c7   : > { %3481 = vrot.lane.b32.xlu0 %v8272_v32, %s5969_s22 }
 0x4c8   : > { %v8535_v39 = vpop.permute.xlu1 %3107 }
 0x4c9   : > { %v8537_v46 = vpop.permute.xlu0 %3105 }
 0x4ca   : > { %3609 = vrot.lane.b32.xlu1 %v8399_v18, %s5970_s20 }
 0x4cb   : > { %3483 = vrot.lane.b32.xlu0 %v8268_v13, %s5969_s22 }
 0x4cc   : > { %v8543_v56 = vpop.permute.xlu1 %3111 }
 0x4cd   : > { %v8545_v16 = vpop.permute.xlu0 %3109 }
 0x4ce   : > { %3737 = vrot.lane.b32.xlu1 %v8145_v38, %s5971_s23 }
 0x4cf   : > { %3611 = vrot.lane.b32.xlu0 %v8395_v53, %s5970_s20 }
 0x4d0   : > { %v8551_v32 = vpop.permute.xlu1 %3115 }
 0x4d1   : > { %v8553_v33 = vpop.permute.xlu0 %3113 }
 0x4d2   : > { %3739 = vrot.lane.b32.xlu1 %v8140_v23, %s5971_s23 }
 0x4d3   : > { %3357 = vrot.lane.b32.xlu0 %v8145_v38, %s5968_s19 }
 0x4d4   : > { %v8559_v13 = vpop.permute.xlu1 %3119 }
 0x4d5   : > { %9985 = vst [vmem:[#allocation99_spill] sm:$0xff] %v8559_v13  ;;  %v8561_v58 = vpop.permute.xlu0 %3117  ;;  %v2877_v13 = vld [vmem:[#allocation3 + $0xc1] sm:$0xff] }
 0x4d6   : > { %9986 = vst [vmem:[#allocation98_spill] sm:$0xff] %v8561_v58  ;;  %3359 = vrot.lane.b32.xlu1 %v8140_v23, %s5968_s19  ;;  %v2879_v58 = vld [vmem:[#allocation3 + $0xd9] sm:$0xff] }
 0x4d7   : > { %3865 = vrot.lane.b32.xlu0 %v8280_v34, %s5972_s16 }
 0x4d8   : > { %v8567_v50 = vpop.permute.xlu1 %3123 }
 0x4d9   : > { %9987 = vst [vmem:[#allocation120_spill] sm:$0xff] %v8567_v50  ;;  %v8569_v37 = vpop.permute.xlu0 %3121 }
 0x4da   : > { %9988 = vst [vmem:[#allocation119_spill] sm:$0xff] %v8569_v37  ;;  %3867 = vrot.lane.b32.xlu1 %v8276_v62, %s5972_s16 }
 0x4db   : > { %3485 = vrot.lane.b32.xlu0 %v8280_v34, %s5969_s22 }
 0x4dc   : > { %v8575_v38 = vpop.permute.xlu1 %3127 }
 0x4dd   : > { %9989 = vst [vmem:[#allocation36_spill] sm:$0xff] %v8575_v38  ;;  %v8577_v59 = vpop.permute.xlu0 %3125 }
 0x4de   : > { %9990 = vst [vmem:[#allocation32_spill] sm:$0xff] %v8577_v59  ;;  %3613 = vrot.lane.b32.xlu1 %v8411_v26, %s5970_s20 }
 0x4df   : > { %3487 = vrot.lane.b32.xlu0 %v8276_v62, %s5969_s22 }
 0x4e0   : > { %v8583_v23 = vpop.permute.xlu1 %3131 }
 0x4e1   : > { %9991 = vst [vmem:[#allocation81_spill] sm:$0xff] %v8583_v23  ;;  %v8585_v50 = vpop.permute.xlu0 %3129 }
 0x4e2   : > { %9992 = vst [vmem:[#allocation79_spill] sm:$0xff] %v8585_v50  ;;  %3741 = vrot.lane.b32.xlu1 %v8159_v22, %s5971_s23 }
 0x4e3   : > { %3615 = vrot.lane.b32.xlu0 %v8407_v45, %s5970_s20 }
 0x4e4   : > { %v8591_v34 = vpop.permute.xlu1 %3135 }
 0x4e5   : > { %9993 = vst [vmem:[#allocation154_spill] sm:$0xff] %v8591_v34  ;;  %v8593_v38 = vpop.permute.xlu0 %3133 }
 0x4e6   : > { %9994 = vst [vmem:[#allocation153_spill] sm:$0xff] %v8593_v38  ;;  %3743 = vrot.lane.b32.xlu1 %v8154_v40, %s5971_s23 }
 0x4e7   : > { %3361 = vrot.lane.b32.xlu0 %v8159_v22, %s5968_s19 }
 0x4e8   : > { %v8599_v62 = vpop.permute.xlu1 %3139 }
 0x4e9   : > { %9995 = vst [vmem:[#allocation54_spill] sm:$0xff] %v8599_v62  ;;  %v8601_v23 = vpop.permute.xlu0 %3137 }
 0x4ea   : > { %9996 = vst [vmem:[#allocation52_spill] sm:$0xff] %v8601_v23  ;;  %3363 = vrot.lane.b32.xlu1 %v8154_v40, %s5968_s19 }
 0x4eb   : > { %3869 = vrot.lane.b32.xlu0 %v8288_v7, %s5972_s16 }
 0x4ec   : > { %v8607_v50 = vpop.permute.xlu1 %3143 }
 0x4ed   : > { %9997 = vst [vmem:[#allocation101_spill] sm:$0xff] %v8607_v50  ;;  %v8609_v34 = vpop.permute.xlu0 %3141 }
 0x4ee   : > { %9998 = vst [vmem:[#allocation100_spill] sm:$0xff] %v8609_v34  ;;  %3871 = vrot.lane.b32.xlu1 %v8284_v41, %s5972_s16 }
 0x4ef   : > { %3489 = vrot.lane.b32.xlu0 %v8288_v7, %s5969_s22 }
 0x4f0   : > { %v8615_v22 = vpop.permute.xlu1 %3147 }
 0x4f1   : > { %9999 = vst [vmem:[#allocation122_spill] sm:$0xff] %v8615_v22  ;;  %v8617_v62 = vpop.permute.xlu0 %3145 }
 0x4f2   : > { %10000 = vst [vmem:[#allocation121_spill] sm:$0xff] %v8617_v62  ;;  %3617 = vrot.lane.b32.xlu1 %v8423_v49, %s5970_s20 }
 0x4f3   : > { %3491 = vrot.lane.b32.xlu0 %v8284_v41, %s5969_s22 }
 0x4f4   : > { %v8623_v40 = vpop.permute.xlu1 %3151 }
 0x4f5   : > { %10001 = vst [vmem:[#allocation43_spill] sm:$0xff] %v8623_v40  ;;  %v8625_v50 = vpop.permute.xlu0 %3149 }
 0x4f6   : > { %10002 = vst [vmem:[#allocation41_spill] sm:$0xff] %v8625_v50  ;;  %3745 = vrot.lane.b32.xlu1 %v8173_v30, %s5971_s23 }
 0x4f7   : > { %3619 = vrot.lane.b32.xlu0 %v8419_v42, %s5970_s20 }
 0x4f8   : > { %v8631_v7 = vpop.permute.xlu1 %3219 }
 0x4f9   : > { %10003 = vst [vmem:[#allocation85_spill] sm:$0xff] %v8631_v7  ;;  %v8633_v22 = vpop.permute.xlu0 %3217 }
 0x4fa   : > { %10004 = vst [vmem:[#allocation83_spill] sm:$0xff] %v8633_v22  ;;  %3747 = vrot.lane.b32.xlu1 %v8168_v3, %s5971_s23 }
 0x4fb   : > { %3365 = vrot.lane.b32.xlu0 %v8173_v30, %s5968_s19 }
 0x4fc   : > { %v8639_v41 = vpop.permute.xlu1 %3223 }
 0x4fd   : > { %v3222_v40 = vpop.permute.xlu0 %3221 }
 0x4fe   : > { %3367 = vrot.lane.b32.xlu1 %v8168_v3, %s5968_s19 }
 0x4ff   : > { %3873 = vrot.lane.b32.xlu0 %v8296_v28, %s5972_s16 }
 0x500   : > { %v8645_v50 = vpop.permute.xlu1 %3227 }
 0x501   : > { %v8647_v62 = vpop.permute.xlu0 %3225 }
 0x502   : > { %3875 = vrot.lane.b32.xlu1 %v8292_v48, %s5972_s16 }
 0x503   : > { %3493 = vrot.lane.b32.xlu0 %v8296_v28, %s5969_s22 }
 0x504   : > { %v8653_v30 = vpop.permute.xlu1 %3231 }
 0x505   : > { %v8655_v34 = vpop.permute.xlu0 %3229 }
 0x506   : > { %3621 = vrot.lane.b32.xlu1 %v8435_v15, %s5970_s20 }
 0x507   : > { %3495 = vrot.lane.b32.xlu0 %v8292_v48, %s5969_s22 }
 0x508   : > { %v8661_v3 = vpop.permute.xlu1 %3235 }
 0x509   : > { %v8663_v23 = vpop.permute.xlu0 %3233 }
 0x50a   : > { %3749 = vrot.lane.b32.xlu1 %v8187_v47, %s5971_s23 }
 0x50b   : > { %3623 = vrot.lane.b32.xlu0 %v8431_v36, %s5970_s20 }
 0x50c   : > { %v8669_v28 = vpop.permute.xlu1 %3239 }
 0x50d   : > { %v8671_v7 = vpop.permute.xlu0 %3237 }
 0x50e   : > { %3751 = vrot.lane.b32.xlu1 %v8182_v31, %s5971_s23 }
 0x50f   : > { %3369 = vrot.lane.b32.xlu0 %v8187_v47, %s5968_s19 }
 0x510   : > { %v8677_v48 = vpop.permute.xlu1 %3243 }
 0x511   : > { %v8679_v38 = vpop.permute.xlu0 %3241 }
 0x512   : > { %3371 = vrot.lane.b32.xlu1 %v8182_v31, %s5968_s19 }
 0x513   : > { %3877 = vrot.lane.b32.xlu0 %v8304_v14, %s5972_s16 }
 0x514   : > { %v8685_v22 = vpop.permute.xlu1 %3247 }
 0x515   : > { %10005 = vst [vmem:[#allocation156_spill] sm:$0xff] %v8685_v22  ;;  %v8687_v59 = vpop.permute.xlu0 %3245 }
 0x516   : > { %10006 = vst [vmem:[#allocation155_spill] sm:$0xff] %v8687_v59  ;;  %3879 = vrot.lane.b32.xlu1 %v8300_v8, %s5972_s16 }
 0x517   : > { %3497 = vrot.lane.b32.xlu0 %v8304_v14, %s5969_s22 }
 0x518   : > { %v8693_v47 = vpop.permute.xlu1 %3251 }
 0x519   : > { %10007 = vst [vmem:[#allocation58_spill] sm:$0xff] %v8693_v47  ;;  %v8695_v37 = vpop.permute.xlu0 %3249 }
 0x51a   : > { %10008 = vst [vmem:[#allocation56_spill] sm:$0xff] %v8695_v37  ;;  %3625 = vrot.lane.b32.xlu1 %v8447_v6, %s5970_s20  ;;  %v2878_v37 = vld [vmem:[#allocation3 + $0xc9] sm:$0xff] }
 0x51b   : > { %3499 = vrot.lane.b32.xlu0 %v8300_v8, %s5969_s22 }
 0x51c   : > { %v8701_v31 = vpop.permute.xlu1 %3255 }
 0x51d   : > { %10009 = vst [vmem:[#allocation103_spill] sm:$0xff] %v8701_v31  ;;  %v8703_v22 = vpop.permute.xlu0 %3253 }
 0x51e   : > { %10010 = vst [vmem:[#allocation102_spill] sm:$0xff] %v8703_v22  ;;  %3753 = vrot.lane.b32.xlu1 %v2877_v13, %s5971_s23 }
 0x51f   : > { %3627 = vrot.lane.b32.xlu0 %v8443_v21, %s5970_s20 }
 0x520   : > { %v3350_v14 = vpop.permute.xlu1 %3349 }
 0x521   : > { %v8708_v47 = vpop.permute.xlu0 %3257 }
 0x522   : > { %10011 = vst [vmem:[#allocation124_spill] sm:$0xff] %v8708_v47  ;;  %3755 = vrot.lane.b32.xlu1 %v2878_v37, %s5971_s23 }
 0x523   : > { %3373 = vrot.lane.b32.xlu0 %v2877_v13, %s5968_s19 }
 0x524   : > { %v3478_v6 = vpop.permute.xlu1 %3477 }
 0x525   : > { %v3352_v8 = vpop.permute.xlu0 %3351 }
 0x526   : > { %3375 = vrot.lane.b32.xlu1 %v2878_v37, %s5968_s19  ;;  %v3955_v37 = vsel %vm470_vm2, %v8363_v54, %v8347_v55 }
 0x527   : > { %3881 = vrot.lane.b32.xlu0 %v8312_v0, %s5972_s16  ;;  %v3987_v13 = vsel %vm2001_vm5, %v3955_v37, %v8513_v9 }
 0x528   : > { %v3606_v31 = vpop.permute.xlu1 %3605  ;;  %v4019_v59 = vsel %vm2067_vm8, %v3987_v13, %v3222_v40 }
 0x529   : > { %v3480_v22 = vpop.permute.xlu0 %3479  ;;  %v4051_v15 = vsel %vm2133_vm10, %v4019_v59, %v3350_v14  ;;  %v2880_v14 = vld [vmem:[#allocation3 + $0xe1] sm:$0xff] }
 0x52a   : > { %3883 = vrot.lane.b32.xlu1 %v8308_v25, %s5972_s16  ;;  %v4084_v55 = vsel %vm4081_vm12, %v4051_v15, %v3478_v6 }
 0x52b   : > { %3501 = vrot.lane.b32.xlu0 %v8312_v0, %s5969_s22  ;;  %v4117_v9 = vsel %vm4114_vm13, %v4084_v55, %v3606_v31 }
 0x52c   : > { %v3734_v47 = vpop.permute.xlu1 %3733 }
 0x52d   : > { %v3608_v21 = vpop.permute.xlu0 %3607  ;;  %v4150_v59 = vsel %vm4147_vm14, %v4117_v9, %v3734_v47 }
 0x52e   : > { %3629 = vrot.lane.b32.xlu1 %v8459_v20, %s5970_s20  ;;  %v3956_v20 = vsel %vm470_vm2, %v8359_v12, %v8345_v61 }
 0x52f   : > { %3503 = vrot.lane.b32.xlu0 %v8308_v25, %s5969_s22  ;;  %v3988_v25 = vsel %vm2001_vm5, %v3956_v20, %v8511_v52 }
 0x530   : > { %v3736_v36 = vpop.permute.xlu1 %3735  ;;  %v4020_v54 = vsel %vm2067_vm8, %v3988_v25, %v8639_v41  ;;  %v2881_v25 = vld [vmem:[#allocation3 + $0xf1] sm:$0xff] }
 0x531   : > { %v3354_v0 = vpop.permute.xlu0 %3353  ;;  %v4052_v12 = vsel %vm2133_vm10, %v4020_v54, %v3352_v8  ;;  %v2882_v54 = vld [vmem:[#allocation3 + $0xf9] sm:$0xff] }
 0x532   : > { %3757 = vrot.lane.b32.xlu1 %v2879_v58, %s5971_s23  ;;  %v4085_v52 = vsel %vm4081_vm12, %v4052_v12, %v3480_v22 }
 0x533   : > { %3631 = vrot.lane.b32.xlu0 %v8455_v4, %s5970_s20  ;;  %v4118_v6 = vsel %vm4114_vm13, %v4085_v52, %v3608_v21 }
 0x534   : > { %v3356_v61 = vpop.permute.xlu1 %3355  ;;  %v4151_v4 = vsel %vm4147_vm14, %v4118_v6, %v3736_v36  ;;  %v10012_v6 = vld [vmem:[#allocation89_spill] sm:$0xff] }
 0x535   : > { %v3862_v40 = vpop.permute.xlu0 %3861 }
 0x536   : > { %3759 = vrot.lane.b32.xlu1 %v2880_v14, %s5971_s23  ;;  %v4183_v15 = vsel %vm4180_vm15, %v4150_v59, %v3862_v40 }
 0x537   : > { %3377 = vrot.lane.b32.xlu0 %v2879_v58, %s5968_s19  ;;  %5400 = vmatprep.mubr.msk.f32.mxu1 %vm4222_vm0, %v4183_v15  ;;  %v3957_v58 = vsel %vm470_vm2, %v8375_v19, %v8353_v5 }
 0x538   : > { %v3864_v41 = vpop.permute.xlu1 %3863  ;;  %v3989_v37 = vsel %vm2001_vm5, %v3957_v58, %v8521_v60 }
 0x539   : > { %v4184_v31 = vsel %vm4180_vm15, %v4151_v4, %v3864_v41  ;;  %v3482_v47 = vpop.permute.xlu0 %3481  ;;  %v4021_v20 = vsel %vm2067_vm8, %v3989_v37, %v8647_v62  ;;  %v3959_v4 = vsel %vm470_vm2, %v8387_v63, %v10012_v6 }
 0x53a   : > { %3379 = vrot.lane.b32.xlu1 %v2880_v14, %s5968_s19  ;;  %5401 = vmatmul.mubr.msk.f32.vlgmr.msra.gmra.mrb[0].mxu1 %vm4222_vm0, %v4184_v31  ;;  %v4053_v55 = vsel %vm2133_vm10, %v4021_v20, %v3354_v0  ;;  %v3991_v41 = vsel %vm2001_vm5, %v3959_v4, %v8529_v17  ;;  %v2885_v4 = vld [vmem:[#allocation3 + $0x121] sm:$0xff] }
 0x53b   : > { %3885 = vrot.lane.b32.xlu0 %v8320_v43, %s5972_s16  ;;  %v4086_v5 = vsel %vm4081_vm12, %v4053_v55, %v3482_v47  ;;  %v4023_v47 = vsel %vm2067_vm8, %v3991_v41, %v8655_v34  ;;  %v8873_v41 = vld [vmem:[#allocation3 + $0x128] sm:$0xff] }
 0x53c   : > { %v3610_v22 = vpop.permute.xlu1 %3609 }
 0x53d   : > { %v3484_v8 = vpop.permute.xlu0 %3483  ;;  %v4119_v60 = vsel %vm4114_vm13, %v4086_v5, %v3610_v22  ;;  %v2883_v22 = vld [vmem:[#allocation3 + $0x109] sm:$0xff]  ;;  %v2884_v5 = vld [vmem:[#allocation3 + $0x111] sm:$0xff] }
 0x53e   : > { %3887 = vrot.lane.b32.xlu1 %v8316_v2, %s5972_s16 }
 0x53f   : > { %3505 = vrot.lane.b32.xlu0 %v8320_v43, %s5969_s22 }
 0x540   : > { %v3738_v21 = vpop.permute.xlu1 %3737 }
 0x541   : > { %v3612_v36 = vpop.permute.xlu0 %3611 }
 0x542   : > { %3633 = vrot.lane.b32.xlu1 %v8471_v1, %s5970_s20  ;;  %v3958_v1 = vsel %vm470_vm2, %v8371_v44, %v8351_v27  ;;  %v4152_v44 = vsel %vm4147_vm14, %v4119_v60, %v3738_v21  ;;  %v8816_v21 = vld [vmem:[#allocation3 + $0x110] sm:$0xff] }
 0x543   : > { %3507 = vrot.lane.b32.xlu0 %v8316_v2, %s5969_s22  ;;  %v3990_v2 = vsel %vm2001_vm5, %v3958_v1, %v8519_v29 }
 0x544   : > { %v3740_v13 = vpop.permute.xlu1 %3739  ;;  %v4022_v19 = vsel %vm2067_vm8, %v3990_v2, %v8645_v50  ;;  %v10014_v2 = vld [vmem:[#allocation25_spill] sm:$0xff] }
 0x545   : > { %v3358_v43 = vpop.permute.xlu0 %3357  ;;  %v4054_v27 = vsel %vm2133_vm10, %v4022_v19, %v3356_v61 }
 0x546   : > { %3761 = vrot.lane.b32.xlu1 %v2881_v25, %s5971_s23  ;;  %v4087_v9 = vsel %vm4081_vm12, %v4054_v27, %v3484_v8  ;;  %v10013_v8 = vld [vmem:[#allocation35_spill] sm:$0xff]  ;;  %v4055_v63 = vsel %vm2133_vm10, %v4023_v47, %v3358_v43 }
 0x547   : > { %3635 = vrot.lane.b32.xlu0 %v8467_v10, %s5970_s20  ;;  %v4120_v10 = vsel %vm4114_vm13, %v4087_v9, %v3612_v36 }
 0x548   : > { %v3360_v62 = vpop.permute.xlu1 %3359  ;;  %v4153_v50 = vsel %vm4147_vm14, %v4120_v10, %v3740_v13  ;;  %v8853_v10 = vld [vmem:[#allocation3 + $0x120] sm:$0xff] }
 0x549   : > { %v3866_v0 = vpop.permute.xlu0 %3865 }
 0x54a   : > { %v4185_v29 = vsel %vm4180_vm15, %v4152_v44, %v3866_v0  ;;  %3763 = vrot.lane.b32.xlu1 %v2882_v54, %s5971_s23  ;;  %v2821_v44 = vld [vmem:[#allocation3 + $0x112] sm:$0xff]  ;;  %v10015_v0 = vld [vmem:[#allocation88_spill] sm:$0xff] }
 0x54b   : > { %3381 = vrot.lane.b32.xlu0 %v2881_v25, %s5968_s19  ;;  %5403 = vmatprep.mubr.msk.f32.mxu1 %vm4222_vm0, %v4185_v29 }
 0x54c   : > { %v3868_v12 = vpop.permute.xlu1 %3867 }
 0x54d   : > { %v4186_v61 = vsel %vm4180_vm15, %v4153_v50, %v3868_v12  ;;  %v3486_v59 = vpop.permute.xlu0 %3485 }
 0x54e   : > { %3383 = vrot.lane.b32.xlu1 %v2882_v54, %s5968_s19  ;;  %5404 = vmatmul.mubr.msk.f32.gmra.mrb[2].mxu1 %vm4222_vm0, %v4186_v61  ;;  %v4088_v17 = vsel %vm4081_vm12, %v4055_v63, %v3486_v59  ;;  %v3961_v54 = vsel %vm470_vm2, %v8399_v18, %v10015_v0  ;;  %v10016_v61 = vld [vmem:[#allocation84_spill] sm:$0xff] }
 0x54f   : > { %3889 = vrot.lane.b32.xlu0 %v8328_v51, %s5972_s16  ;;  %v3993_v9 = vsel %vm2001_vm5, %v3961_v54, %v8537_v46  ;;  %v3962_v59 = vsel %vm470_vm2, %v8395_v53, %v10016_v61  ;;  %v8924_v61 = vld [vmem:[#allocation3 + $0x138] sm:$0xff] }
 0x550   : > { %v3614_v40 = vpop.permute.xlu1 %3613  ;;  %v4025_v50 = vsel %vm2067_vm8, %v3993_v9, %v8663_v23  ;;  %v3994_v18 = vsel %vm2001_vm5, %v3962_v59, %v8535_v39 }
 0x551   : > { %v3488_v14 = vpop.permute.xlu0 %3487  ;;  %v4121_v36 = vsel %vm4114_vm13, %v4088_v17, %v3614_v40  ;;  %v4026_v23 = vsel %vm2067_vm8, %v3994_v18, %v8661_v3  ;;  %v2886_v17 = vld [vmem:[#allocation3 + $0x129] sm:$0xff] }
 0x552   : > { %3891 = vrot.lane.b32.xlu1 %v8324_v57, %s5972_s16 }
 0x553   : > { %3509 = vrot.lane.b32.xlu0 %v8328_v51, %s5969_s22 }
 0x554   : > { %v3742_v52 = vpop.permute.xlu1 %3741 }
 0x555   : > { %v3616_v15 = vpop.permute.xlu0 %3615  ;;  %v4154_v37 = vsel %vm4147_vm14, %v4121_v36, %v3742_v52 }
 0x556   : > { %3637 = vrot.lane.b32.xlu1 %v8481_v35, %s5970_s20  ;;  %v3960_v35 = vsel %vm470_vm2, %v8383_v24, %v10013_v8 }
 0x557   : > { %3511 = vrot.lane.b32.xlu0 %v8324_v57, %s5969_s22  ;;  %v3992_v57 = vsel %vm2001_vm5, %v3960_v35, %v8527_v11  ;;  %v2768_v35 = vld [vmem:[#allocation3 + $0x19] sm:$0xff] }
 0x558   : > { %v3744_v31 = vpop.permute.xlu1 %3743  ;;  %v4024_v34 = vsel %vm2067_vm8, %v3992_v57, %v8653_v30 }
 0x559   : > { %v3362_v51 = vpop.permute.xlu0 %3361  ;;  %v4056_v58 = vsel %vm2133_vm10, %v4024_v34, %v3360_v62 }
 0x55a   : > { %3765 = vrot.lane.b32.xlu1 %v2883_v22, %s5971_s23  ;;  %v4089_v20 = vsel %vm4081_vm12, %v4056_v58, %v3488_v14  ;;  %v4057_v40 = vsel %vm2133_vm10, %v4025_v50, %v3362_v51  ;;  %v2917_v58 = vld [vmem:[#allocation3 + $0x122] sm:$0xff] }
 0x55b   : > { %3639 = vrot.lane.b32.xlu0 %v8816_v21, %s5970_s20  ;;  %v4122_v43 = vsel %vm4114_vm13, %v4089_v20, %v3616_v15  ;;  %v2801_v50 = vld [vmem:[#allocation3 + $0x22] sm:$0xff] }
 0x55c   : > { %v3364_v24 = vpop.permute.xlu1 %3363  ;;  %v4155_v30 = vsel %vm4147_vm14, %v4122_v43, %v3744_v31 }
 0x55d   : > { %v3870_v13 = vpop.permute.xlu0 %3869  ;;  %v4058_v53 = vsel %vm2133_vm10, %v4026_v23, %v3364_v24  ;;  %v2769_v24 = vld [vmem:[#allocation3 + $0x21] sm:$0xff]  ;;  %v2834_v23 = vld [vmem:[#allocation3 + $0x38] sm:$0xff] }
 0x55e   : > { %v4187_v11 = vsel %vm4180_vm15, %v4154_v37, %v3870_v13  ;;  %3385 = vrot.lane.b32.xlu1 %v2883_v22, %s5968_s19  ;;  %v10017_v37 = vld [vmem:[#allocation31_spill] sm:$0xff] }
 0x55f   : > { %3259 = vrot.lane.b32.xlu0 %v8816_v21, %s5966_s25  ;;  %5406 = vmatprep.mubr.msk.f32.mxu1 %vm4222_vm0, %v4187_v11  ;;  %v3963_v13 = vsel %vm470_vm2, %v8411_v26, %v10017_v37 }
 0x560   : > { %v3872_v25 = vpop.permute.xlu1 %3871  ;;  %v3995_v20 = vsel %vm2001_vm5, %v3963_v13, %v8545_v16  ;;  %v2866_v13 = vld [vmem:[#allocation3 + $0x39] sm:$0xff] }
 0x561   : > { %v4188_v1 = vsel %vm4180_vm15, %v4155_v30, %v3872_v25  ;;  %v3490_v55 = vpop.permute.xlu0 %3489  ;;  %v4027_v43 = vsel %vm2067_vm8, %v3995_v20, %v8671_v7  ;;  %v2800_v25 = vld [vmem:[#allocation3 + $0x1a] sm:$0xff] }
 0x562   : > { %3893 = vrot.lane.b32.xlu1 %v10014_v2, %s5972_s16  ;;  %5407 = vmatmul.mubr.msk.f32.gmra.mrb[4].mxu1 %vm4222_vm0, %v4188_v1  ;;  %v4090_v46 = vsel %vm4081_vm12, %v4057_v40, %v3490_v55  ;;  %v10018_v1 = vld [vmem:[#allocation33_spill] sm:$0xff]  ;;  %v2833_v40 = vld [vmem:[#allocation3 + $0x30] sm:$0xff] }
 0x563   : > { %3767 = vrot.lane.b32.xlu0 %v2884_v5, %s5971_s23  ;;  %v3964_v55 = vsel %vm470_vm2, %v8407_v45, %v10018_v1 }
 0x564   : > { %v3618_v19 = vpop.permute.xlu1 %3617  ;;  %v3996_v26 = vsel %vm2001_vm5, %v3964_v55, %v8543_v56  ;;  %v2919_v55 = vld [vmem:[#allocation3 + $0x13a] sm:$0xff] }
 0x565   : > { %v3492_v60 = vpop.permute.xlu0 %3491  ;;  %v4123_v14 = vsel %vm4114_vm13, %v4090_v46, %v3618_v19  ;;  %v4028_v16 = vsel %vm2067_vm8, %v3996_v26, %v8669_v28  ;;  %v10022_v26 = vld [vmem:[#allocation42_spill] sm:$0xff] }
 0x566   : > { %3513 = vrot.lane.b32.xlu1 %v10014_v2, %s5969_s22  ;;  %v4091_v39 = vsel %vm4081_vm12, %v4058_v53, %v3492_v60 }
 0x567   : > { %3387 = vrot.lane.b32.xlu0 %v2884_v5, %s5968_s19 }
 0x568   : > { %v3746_v62 = vpop.permute.xlu1 %3745 }
 0x569   : > { %v3620_v27 = vpop.permute.xlu0 %3619  ;;  %v4156_v15 = vsel %vm4147_vm14, %v4123_v14, %v3746_v62  ;;  %v2760_v14 = vld [vmem:[#allocation3 + $0x138] sm:$0xff] }
 0x56a   : > { %3515 = vrot.lane.b32.xlu1 %v2821_v44, %s5969_s22  ;;  %v4124_v47 = vsel %vm4114_vm13, %v4091_v39, %v3620_v27  ;;  %v2918_v27 = vld [vmem:[#allocation3 + $0x12a] sm:$0xff] }
 0x56b   : > { %3895 = vrot.lane.b32.xlu0 %v2821_v44, %s5972_s16 }
 0x56c   : > { %v3748_v29 = vpop.permute.xlu1 %3747 }
 0x56d   : > { %v3366_v12 = vpop.permute.xlu0 %3365  ;;  %v4157_v3 = vsel %vm4147_vm14, %v4124_v47, %v3748_v29  ;;  %v10020_v47 = vld [vmem:[#allocation92_spill] sm:$0xff] }
 0x56e   : > { %3261 = vrot.lane.b32.xlu1 %v8853_v10, %s5966_s25  ;;  %v4059_v2 = vsel %vm2133_vm10, %v4027_v43, %v3366_v12  ;;  %v2897_v43 = vld [vmem:[#allocation3 + $0x32] sm:$0xff] }
 0x56f   : > { %3641 = vrot.lane.b32.xlu0 %v8853_v10, %s5970_s20 }
 0x570   : > { %v3368_v52 = vpop.permute.xlu1 %3367 }
 0x571   : > { %v3874_v6 = vpop.permute.xlu0 %3873  ;;  %v4060_v60 = vsel %vm2133_vm10, %v4028_v16, %v3368_v52  ;;  %v10019_v52 = vld [vmem:[#allocation91_spill] sm:$0xff]  ;;  %v10023_v16 = vld [vmem:[#allocation98_spill] sm:$0xff] }
 0x572   : > { %v4189_v31 = vsel %vm4180_vm15, %v4156_v15, %v3874_v6  ;;  %3769 = vrot.lane.b32.xlu1 %v2885_v4, %s5971_s23  ;;  %v3965_v53 = vsel %vm470_vm2, %v8423_v49, %v10019_v52  ;;  %v2856_v49 = vld [vmem:[#allocation3 + $0x140] sm:$0xff] }
 0x573   : > { %3643 = vrot.lane.b32.xlu0 %v8873_v41, %s5970_s20  ;;  %5409 = vmatprep.mubr.msk.f32.mxu1 %vm4222_vm0, %v4189_v31  ;;  %v3997_v15 = vsel %vm2001_vm5, %v3965_v53, %v8553_v33  ;;  %v2865_v31 = vld [vmem:[#allocation3 + $0x31] sm:$0xff] }
 0x574   : > { %v3876_v51 = vpop.permute.xlu1 %3875 }
 0x575   : > { %v4190_v22 = vsel %vm4180_vm15, %v4157_v3, %v3876_v51  ;;  %v3494_v8 = vpop.permute.xlu0 %3493  ;;  %v3966_v3 = vsel %vm470_vm2, %v8419_v42, %v10020_v47  ;;  %v2762_v47 = vld [vmem:[#allocation3 + $0x150] sm:$0xff] }
 0x576   : > { %3345 = vrot.lane.b32.xlu1 %v2768_v35, %s5968_s19  ;;  %5410 = vmatmul.mubr.msk.f32.gmra.mrb[6].mxu1 %vm4222_vm0, %v4190_v22  ;;  %v4092_v5 = vsel %vm4081_vm12, %v4059_v2, %v3494_v8  ;;  %v3998_v22 = vsel %vm2001_vm5, %v3966_v3, %v8551_v32  ;;  %v2887_v32 = vld [vmem:[#allocation3 + $0x139] sm:$0xff]  ;;  %v10021_v2 = vld [vmem:[#allocation34_spill] sm:$0xff] }
 0x577   : > { %3263 = vrot.lane.b32.xlu0 %v8873_v41, %s5966_s25 }
 0x578   : > { %v3622_v63 = vpop.permute.xlu1 %3621 }
 0x579   : > { %v3496_v57 = vpop.permute.xlu0 %3495  ;;  %v4125_v7 = vsel %vm4114_vm13, %v4092_v5, %v3622_v63  ;;  %v3967_v5 = vsel %vm470_vm2, %v10022_v26, %v10021_v2 }
 0x57a   : > { %3771 = vrot.lane.b32.xlu1 %v2886_v17, %s5971_s23  ;;  %v4093_v44 = vsel %vm4081_vm12, %v4060_v60, %v3496_v57  ;;  %v10024_v60 = vld [vmem:[#allocation155_spill] sm:$0xff] }
 0x57b   : > { %3389 = vrot.lane.b32.xlu0 %v2885_v4, %s5968_s19  ;;  %v4029_v4 = vsel %vm2067_vm8, %v3997_v15, %v8679_v38  ;;  %v4030_v38 = vsel %vm2067_vm8, %v3998_v22, %v8677_v48  ;;  %v2858_v22 = vld [vmem:[#allocation3 + $0x158] sm:$0xff] }
 0x57c   : > { %v3750_v34 = vpop.permute.xlu1 %3749 }
 0x57d   : > { %v3624_v36 = vpop.permute.xlu0 %3623  ;;  %v4158_v45 = vsel %vm4147_vm14, %v4125_v7, %v3750_v34  ;;  %v3999_v7 = vsel %vm2001_vm5, %v3967_v5, %v10023_v16 }
 0x57e   : > { %3347 = vrot.lane.b32.xlu1 %v2769_v24, %s5968_s19  ;;  %v4126_v0 = vsel %vm4114_vm13, %v4093_v44, %v3624_v36  ;;  %v10025_v44 = vld [vmem:[#allocation37_spill] sm:$0xff] }
 0x57f   : > { %3897 = vrot.lane.b32.xlu0 %v2917_v58, %s5972_s16 }
 0x580   : > { %v3752_v11 = vpop.permute.xlu1 %3751 }
 0x581   : > { %v3370_v30 = vpop.permute.xlu0 %3369  ;;  %v4159_v28 = vsel %vm4147_vm14, %v4126_v0, %v3752_v11 }
 0x582   : > { %3473 = vrot.lane.b32.xlu1 %v2800_v25, %s5969_s22  ;;  %v4061_v51 = vsel %vm2133_vm10, %v4029_v4, %v3370_v30  ;;  %v2888_v30 = vld [vmem:[#allocation3 + $0x141] sm:$0xff] }
 0x583   : > { %3391 = vrot.lane.b32.xlu0 %v2886_v17, %s5968_s19 }
 0x584   : > { %v3372_v19 = vpop.permute.xlu1 %3371 }
 0x585   : > { %v3878_v62 = vpop.permute.xlu0 %3877  ;;  %v4062_v42 = vsel %vm2133_vm10, %v4030_v38, %v3372_v19 }
 0x586   : > { %v4191_v56 = vsel %vm4180_vm15, %v4158_v45, %v3878_v62  ;;  %3899 = vrot.lane.b32.xlu1 %v2918_v27, %s5972_s16  ;;  %v4031_v45 = vsel %vm2067_vm8, %v3999_v7, %v10024_v60 }
 0x587   : > { %3517 = vrot.lane.b32.xlu0 %v2917_v58, %s5969_s22  ;;  %5412 = vmatprep.mubr.msk.f32.mxu1 %vm4222_vm0, %v4191_v56  ;;  %v10026_v56 = vld [vmem:[#allocation38_spill] sm:$0xff] }
 0x588   : > { %v3880_v54 = vpop.permute.xlu1 %3879  ;;  %v3968_v0 = vsel %vm470_vm2, %v10026_v56, %v10025_v44  ;;  %v2827_v56 = vld [vmem:[#allocation3 + $0x15a] sm:$0xff] }
 0x589   : > { %v4192_v9 = vsel %vm4180_vm15, %v4159_v28, %v3880_v54  ;;  %v3498_v29 = vpop.permute.xlu0 %3497  ;;  %v10027_v54 = vld [vmem:[#allocation99_spill] sm:$0xff] }
 0x58a   : > { %3519 = vrot.lane.b32.xlu1 %v2918_v27, %s5969_s22  ;;  %5413 = vmatmul.mubr.msk.f32.gmra.mrb[8].mxu1 %vm4222_vm0, %v4192_v9  ;;  %v4094_v33 = vsel %vm4081_vm12, %v4061_v51, %v3498_v29  ;;  %v2898_v27 = vld [vmem:[#allocation3 + $0x3a] sm:$0xff]  ;;  %v4000_v9 = vsel %vm2001_vm5, %v3968_v0, %v10027_v54  ;;  %v2764_v54 = vld [vmem:[#allocation3 + $0x168] sm:$0xff] }
 0x58b   : > { %3475 = vrot.lane.b32.xlu0 %v2801_v50, %s5969_s22  ;;  %v10028_v50 = vld [vmem:[#allocation156_spill] sm:$0xff] }
 0x58c   : > { %v3626_v12 = vpop.permute.xlu1 %3625 }
 0x58d   : > { %v3500_v59 = vpop.permute.xlu0 %3499  ;;  %v4127_v8 = vsel %vm4114_vm13, %v4094_v33, %v3626_v12  ;;  %v4032_v12 = vsel %vm2067_vm8, %v4000_v9, %v10028_v50  ;;  %v2891_v50 = vld [vmem:[#allocation3 + $0x169] sm:$0xff] }
 0x58e   : > { %3645 = vrot.lane.b32.xlu1 %v8924_v61, %s5970_s20  ;;  %v4095_v17 = vsel %vm4081_vm12, %v4062_v42, %v3500_v59 }
 0x58f   : > { %3601 = vrot.lane.b32.xlu0 %v2833_v40, %s5970_s20 }
 0x590   : > { %v3754_v18 = vpop.permute.xlu1 %3753 }
 0x591   : > { %v3628_v46 = vpop.permute.xlu0 %3627  ;;  %v4160_v63 = vsel %vm4147_vm14, %v4127_v8, %v3754_v18  ;;  %v10029_v8 = vld [vmem:[#allocation93_spill] sm:$0xff] }
 0x592   : > { %3603 = vrot.lane.b32.xlu1 %v2834_v23, %s5970_s20  ;;  %v4128_v36 = vsel %vm4114_vm13, %v4095_v17, %v3628_v46 }
 0x593   : > { %3265 = vrot.lane.b32.xlu0 %v2760_v14, %s5966_s25  ;;  %v2825_v14 = vld [vmem:[#allocation3 + $0x142] sm:$0xff] }
 0x594   : > { %v3756_v6 = vpop.permute.xlu1 %3755 }
 0x595   : > { %v3374_v39 = vpop.permute.xlu0 %3373  ;;  %v4161_v48 = vsel %vm4147_vm14, %v4128_v36, %v3756_v6 }
 0x596   : > { %3729 = vrot.lane.b32.xlu1 %v2865_v31, %s5971_s23  ;;  %v4063_v28 = vsel %vm2133_vm10, %v4031_v45, %v3374_v39 }
 0x597   : > { %3647 = vrot.lane.b32.xlu0 %v2856_v49, %s5970_s20 }
 0x598   : > { %v3376_v35 = vpop.permute.xlu1 %3375 }
 0x599   : > { %v3882_v57 = vpop.permute.xlu0 %3881  ;;  %v4064_v18 = vsel %vm2133_vm10, %v4032_v12, %v3376_v35  ;;  %v10030_v35 = vld [vmem:[#allocation44_spill] sm:$0xff]  ;;  %v5636_v12 = vld [vmem:[#allocation3 + $0xd8] sm:$0xff] }
 0x59a   : > { %v4193_v34 = vsel %vm4180_vm15, %v4160_v63, %v3882_v57  ;;  %3267 = vrot.lane.b32.xlu1 %v2856_v49, %s5966_s25  ;;  %v2889_v49 = vld [vmem:[#allocation3 + $0x151] sm:$0xff]  ;;  %v3969_v42 = vsel %vm470_vm2, %v10030_v35, %v10029_v8  ;;  %v10041_v35 = vld [vmem:[#allocation36_spill] sm:$0xff] }
 0x59b   : > { %3773 = vrot.lane.b32.xlu0 %v2887_v32, %s5971_s23  ;;  %5415 = vmatprep.mubr.msk.f32.mxu1 %vm4222_vm0, %v4193_v34  ;;  %v10031_v63 = vld [vmem:[#allocation119_spill] sm:$0xff]  ;;  %v10032_v34 = vld [vmem:[#allocation56_spill] sm:$0xff] }
 0x59c   : > { %v3884_v24 = vpop.permute.xlu1 %3883  ;;  %v4001_v57 = vsel %vm2001_vm5, %v3969_v42, %v10031_v63 }
 0x59d   : > { %v4194_v58 = vsel %vm4180_vm15, %v4161_v48, %v3884_v24  ;;  %v3502_v37 = vpop.permute.xlu0 %3501  ;;  %v2921_v48 = vld [vmem:[#allocation3 + $0x152] sm:$0xff] }
 0x59e   : > { %3731 = vrot.lane.b32.xlu1 %v2866_v13, %s5971_s23  ;;  %5416 = vmatmul.mubr.msk.f32.gmra.mrb[10].mxu1 %vm4222_vm0, %v4194_v58  ;;  %v4096_v29 = vsel %vm4081_vm12, %v4063_v28, %v3502_v37  ;;  %v10033_v24 = vld [vmem:[#allocation94_spill] sm:$0xff] }
 0x59f   : > { %3393 = vrot.lane.b32.xlu0 %v2887_v32, %s5968_s19  ;;  %v4033_v32 = vsel %vm2067_vm8, %v4001_v57, %v10032_v34  ;;  %v10034_v58 = vld [vmem:[#allocation150_spill] sm:$0xff]  ;;  %v10042_v57 = vld [vmem:[#allocation103_spill] sm:$0xff] }
 0x5a0   : > { %v3630_v20 = vpop.permute.xlu1 %3629  ;;  %v3970_v37 = vsel %vm470_vm2, %v10034_v58, %v10033_v24 }
 0x5a1   : > { %v3504_v11 = vpop.permute.xlu0 %3503  ;;  %v4129_v59 = vsel %vm4114_vm13, %v4096_v29, %v3630_v20  ;;  %v2890_v20 = vld [vmem:[#allocation3 + $0x159] sm:$0xff] }
 0x5a2   : > { %3857 = vrot.lane.b32.xlu1 %v2897_v43, %s5972_s16  ;;  %v4097_v52 = vsel %vm4081_vm12, %v4064_v18, %v3504_v11  ;;  %v10035_v11 = vld [vmem:[#allocation120_spill] sm:$0xff]  ;;  %v2860_v18 = vld [vmem:[#allocation3 + $0x170] sm:$0xff] }
 0x5a3   : > { %3775 = vrot.lane.b32.xlu0 %v2888_v30, %s5971_s23  ;;  %v4002_v43 = vsel %vm2001_vm5, %v3970_v37, %v10035_v11 }
 0x5a4   : > { %v3758_v25 = vpop.permute.xlu1 %3757 }
 0x5a5   : > { %v3632_v1 = vpop.permute.xlu0 %3631  ;;  %v4162_v46 = vsel %vm4147_vm14, %v4129_v59, %v3758_v25  ;;  %v10036_v25 = vld [vmem:[#allocation58_spill] sm:$0xff]  ;;  %v10037_v59 = vld [vmem:[#allocation95_spill] sm:$0xff] }
 0x5a6   : > { %3395 = vrot.lane.b32.xlu1 %v2888_v30, %s5968_s19  ;;  %v4130_v15 = vsel %vm4114_vm13, %v4097_v52, %v3632_v1  ;;  %v4034_v1 = vsel %vm2067_vm8, %v4002_v43, %v10036_v25 }
 0x5a7   : > { %3901 = vrot.lane.b32.xlu0 %v2919_v55, %s5972_s16 }
 0x5a8   : > { %v3760_v19 = vpop.permute.xlu1 %3759 }
 0x5a9   : > { %v3378_v62 = vpop.permute.xlu0 %3377  ;;  %v4163_v6 = vsel %vm4147_vm14, %v4130_v15, %v3760_v19 }
 0x5aa   : > { %3859 = vrot.lane.b32.xlu1 %v2898_v27, %s5972_s16  ;;  %v4065_v13 = vsel %vm2133_vm10, %v4033_v32, %v3378_v62 }
 0x5ab   : > { %3521 = vrot.lane.b32.xlu0 %v2919_v55, %s5969_s22 }
 0x5ac   : > { %v3380_v40 = vpop.permute.xlu1 %3379 }
 0x5ad   : > { %v3886_v23 = vpop.permute.xlu0 %3885  ;;  %v4066_v26 = vsel %vm2133_vm10, %v4034_v1, %v3380_v40  ;;  %v3971_v40 = vsel %vm470_vm2, %v5636_v12, %v10037_v59 }
 0x5ae   : > { %v4195_v53 = vsel %vm4180_vm15, %v4162_v46, %v3886_v23  ;;  %3523 = vrot.lane.b32.xlu1 %v2825_v14, %s5969_s22  ;;  %v10038_v46 = vld [vmem:[#allocation32_spill] sm:$0xff] }
 0x5af   : > { %3903 = vrot.lane.b32.xlu0 %v2825_v14, %s5972_s16  ;;  %5418 = vmatprep.mubr.msk.f32.mxu1 %vm4222_vm0, %v4195_v53  ;;  %v4003_v23 = vsel %vm2001_vm5, %v3971_v40, %v10038_v46  ;;  %v10039_v14 = vld [vmem:[#allocation102_spill] sm:$0xff]  ;;  %v5639_v40 = vld [vmem:[#allocation3 + $0xf8] sm:$0xff] }
 0x5b0   : > { %v3888_v4 = vpop.permute.xlu1 %3887  ;;  %v4035_v52 = vsel %vm2067_vm8, %v4003_v23, %v10039_v14  ;;  %v10047_v14 = vld [vmem:[#allocation81_spill] sm:$0xff] }
 0x5b1   : > { %v4196_v39 = vsel %vm4180_vm15, %v4163_v6, %v3888_v4  ;;  %v3506_v31 = vpop.permute.xlu0 %3505 }
 0x5b2   : > { %3269 = vrot.lane.b32.xlu1 %v2762_v47, %s5966_s25  ;;  %5419 = vmatmul.mubr.msk.f32.gmra.mrb[12].mxu1 %vm4222_vm0, %v4196_v39  ;;  %v4098_v30 = vsel %vm4081_vm12, %v4065_v13, %v3506_v31  ;;  %v2829_v13 = vld [vmem:[#allocation3 + $0x172] sm:$0xff] }
 0x5b3   : > { %3649 = vrot.lane.b32.xlu0 %v2762_v47, %s5970_s20 }
 0x5b4   : > { %v3634_v3 = vpop.permute.xlu1 %3633 }
 0x5b5   : > { %v3508_v51 = vpop.permute.xlu0 %3507  ;;  %v4131_v55 = vsel %vm4114_vm13, %v4098_v30, %v3634_v3  ;;  %v2766_v30 = vld [vmem:[#allocation3 + $0x180] sm:$0xff] }
 0x5b6   : > { %3777 = vrot.lane.b32.xlu1 %v2889_v49, %s5971_s23  ;;  %v4099_v7 = vsel %vm4081_vm12, %v4066_v26, %v3508_v51 }
 0x5b7   : > { %3651 = vrot.lane.b32.xlu0 %v2858_v22, %s5970_s20 }
 0x5b8   : > { %v3762_v33 = vpop.permute.xlu1 %3761 }
 0x5b9   : > { %v3636_v38 = vpop.permute.xlu0 %3635  ;;  %v4164_v5 = vsel %vm4147_vm14, %v4131_v55, %v3762_v33  ;;  %v5637_v33 = vld [vmem:[#allocation3 + $0xe0] sm:$0xff] }
 0x5ba   : > { %3397 = vrot.lane.b32.xlu1 %v2889_v49, %s5968_s19  ;;  %v4132_v60 = vsel %vm4114_vm13, %v4099_v7, %v3636_v38  ;;  %v2923_v49 = vld [vmem:[#allocation3 + $0x16a] sm:$0xff]  ;;  %v10040_v38 = vld [vmem:[#allocation39_spill] sm:$0xff]  ;;  %v2893_v55 = vld [vmem:[#allocation3 + $0x181] sm:$0xff] }
 0x5bb   : > { %3271 = vrot.lane.b32.xlu0 %v2858_v22, %s5966_s25  ;;  %v2892_v22 = vld [vmem:[#allocation3 + $0x171] sm:$0xff]  ;;  %v3972_v8 = vsel %vm470_vm2, %v5637_v33, %v10040_v38 }
 0x5bc   : > { %v3764_v17 = vpop.permute.xlu1 %3763  ;;  %v4004_v42 = vsel %vm2001_vm5, %v3972_v8, %v10041_v35  ;;  %v10043_v7 = vld [vmem:[#allocation46_spill] sm:$0xff]  ;;  %v2863_v33 = vld [vmem:[#allocation3 + $0x198] sm:$0xff]  ;;  %v2896_v8 = vld [vmem:[#allocation3 + $0x1a1] sm:$0xff] }
 0x5bd   : > { %v3382_v36 = vpop.permute.xlu0 %3381  ;;  %v4165_v45 = vsel %vm4147_vm14, %v4132_v60, %v3764_v17  ;;  %v4036_v17 = vsel %vm2067_vm8, %v4004_v42, %v10042_v57  ;;  %v10044_v60 = vld [vmem:[#allocation79_spill] sm:$0xff]  ;;  %v2928_v57 = vld [vmem:[#allocation3 + $0x1a2] sm:$0xff] }
 0x5be   : > { %3905 = vrot.lane.b32.xlu1 %v2921_v48, %s5972_s16  ;;  %v4067_v15 = vsel %vm2133_vm10, %v4035_v52, %v3382_v36  ;;  %v2895_v42 = vld [vmem:[#allocation3 + $0x199] sm:$0xff] }
 0x5bf   : > { %3779 = vrot.lane.b32.xlu0 %v2890_v20, %s5971_s23 }
 0x5c0   : > { %v3384_v2 = vpop.permute.xlu1 %3383 }
 0x5c1   : > { %v3890_v16 = vpop.permute.xlu0 %3889  ;;  %v4068_v32 = vsel %vm2133_vm10, %v4036_v17, %v3384_v2  ;;  %v2862_v2 = vld [vmem:[#allocation3 + $0x188] sm:$0xff] }
 0x5c2   : > { %v4197_v19 = vsel %vm4180_vm15, %v4164_v5, %v3890_v16  ;;  %3525 = vrot.lane.b32.xlu1 %v2921_v48, %s5969_s22  ;;  %v5638_v16 = vld [vmem:[#allocation3 + $0xf0] sm:$0xff] }
 0x5c3   : > { %3399 = vrot.lane.b32.xlu0 %v2890_v20, %s5968_s19  ;;  %5421 = vmatprep.mubr.msk.f32.mxu1 %vm4222_vm0, %v4197_v19  ;;  %v3973_v19 = vsel %vm470_vm2, %v5638_v16, %v10043_v7  ;;  %v10049_v7 = vld [vmem:[#allocation48_spill] sm:$0xff] }
 0x5c4   : > { %v3892_v62 = vpop.permute.xlu1 %3891 }
 0x5c5   : > { %v4198_v27 = vsel %vm4180_vm15, %v4165_v45, %v3892_v62  ;;  %v3510_v44 = vpop.permute.xlu0 %3509  ;;  %v4005_v45 = vsel %vm2001_vm5, %v3973_v19, %v10044_v60 }
 0x5c6   : > { %3527 = vrot.lane.b32.xlu1 %v2827_v56, %s5969_s22  ;;  %5422 = vmatmul.mubr.msk.f32.gmra.mrb[14].mxu1 %vm4222_vm0, %v4198_v27  ;;  %v4100_v4 = vsel %vm4081_vm12, %v4067_v15, %v3510_v44  ;;  %v10045_v27 = vld [vmem:[#allocation124_spill] sm:$0xff] }
 0x5c7   : > { %3907 = vrot.lane.b32.xlu0 %v2827_v56, %s5972_s16  ;;  %v4037_v44 = vsel %vm2067_vm8, %v4005_v45, %v10045_v27  ;;  %v10050_v45 = vld [vmem:[#allocation83_spill] sm:$0xff] }
 0x5c8   : > { %v3638_v0 = vpop.permute.xlu1 %3637 }
 0x5c9   : > { %v3512_v28 = vpop.permute.xlu0 %3511  ;;  %v4133_v39 = vsel %vm4114_vm13, %v4100_v4, %v3638_v0  ;;  %v2925_v0 = vld [vmem:[#allocation3 + $0x182] sm:$0xff] }
 0x5ca   : > { %3273 = vrot.lane.b32.xlu1 %v2764_v54, %s5966_s25  ;;  %v4101_v36 = vsel %vm4081_vm12, %v4068_v32, %v3512_v28 }
 0x5cb   : > { %3653 = vrot.lane.b32.xlu0 %v2764_v54, %s5970_s20  ;;  %v2894_v54 = vld [vmem:[#allocation3 + $0x189] sm:$0xff] }
 0x5cc   : > { %v3766_v9 = vpop.permute.xlu1 %3765 }
 0x5cd   : > { %v3640_v29 = vpop.permute.xlu0 %3639  ;;  %v4166_v31 = vsel %vm4147_vm14, %v4133_v39, %v3766_v9 }
 0x5ce   : > { %3781 = vrot.lane.b32.xlu1 %v2891_v50, %s5971_s23  ;;  %v4134_v48 = vsel %vm4114_vm13, %v4101_v36, %v3640_v29 }
 0x5cf   : > { %3655 = vrot.lane.b32.xlu0 %v2860_v18, %s5970_s20 }
 0x5d0   : > { %v3386_v53 = vpop.permute.xlu1 %3385 }
 0x5d1   : > { %v9046_v6 = vpop.permute.xlu0 %3259  ;;  %v4069_v28 = vsel %vm2133_vm10, %v4037_v44, %v3386_v53 }
 0x5d2   : > { %3401 = vrot.lane.b32.xlu1 %v2891_v50, %s5968_s19 }
 0x5d3   : > { %3275 = vrot.lane.b32.xlu0 %v2860_v18, %s5966_s25  ;;  %v10046_v18 = vld [vmem:[#allocation40_spill] sm:$0xff] }
 0x5d4   : > { %v3894_v47 = vpop.permute.xlu1 %3893  ;;  %v3974_v46 = vsel %vm470_vm2, %v5639_v40, %v10046_v18  ;;  %v10051_v40 = vld [vmem:[#allocation96_spill] sm:$0xff] }
 0x5d5   : > { %v4199_v3 = vsel %vm4180_vm15, %v4166_v31, %v3894_v47  ;;  %v3768_v51 = vpop.permute.xlu0 %3767  ;;  %v4006_v52 = vsel %vm2001_vm5, %v3974_v46, %v10047_v14  ;;  %v2831_v31 = vld [vmem:[#allocation3 + $0x18a] sm:$0xff] }
 0x5d6   : > { %3909 = vrot.lane.b32.xlu1 %v2923_v49, %s5972_s16  ;;  %5424 = vmatprep.mubr.msk.f32.mxu1 %vm4222_vm0, %v4199_v3  ;;  %v4167_v58 = vsel %vm4147_vm14, %v4134_v48, %v3768_v51  ;;  %v4038_v53 = vsel %vm2067_vm8, %v4006_v52, %v9046_v6  ;;  %v2864_v51 = vld [vmem:[#allocation3 + $0x1a0] sm:$0xff]  ;;  %v10052_v14 = vld [vmem:[#allocation153_spill] sm:$0xff] }
 0x5d7   : > { %3783 = vrot.lane.b32.xlu0 %v2892_v22, %s5971_s23 }
 0x5d8   : > { %v3514_v63 = vpop.permute.xlu1 %3513 }
 0x5d9   : > { %v3388_v34 = vpop.permute.xlu0 %3387  ;;  %v4102_v9 = vsel %vm4081_vm12, %v4069_v28, %v3514_v63 }
 0x5da   : > { %3529 = vrot.lane.b32.xlu1 %v2923_v49, %s5969_s22  ;;  %v4070_v4 = vsel %vm2133_vm10, %v4038_v53, %v3388_v34  ;;  %v2927_v34 = vld [vmem:[#allocation3 + $0x19a] sm:$0xff] }
 0x5db   : > { %3403 = vrot.lane.b32.xlu0 %v2892_v22, %s5968_s19 }
 0x5dc   : > { %v3516_v24 = vpop.permute.xlu1 %3515 }
 0x5dd   : > { %v3896_v37 = vpop.permute.xlu0 %3895  ;;  %v4103_v47 = vsel %vm4081_vm12, %v4070_v4, %v3516_v24 }
 0x5de   : > { %v4200_v20 = vsel %vm4180_vm15, %v4167_v58, %v3896_v37  ;;  %3531 = vrot.lane.b32.xlu1 %v2829_v13, %s5969_s22  ;;  %v2640_v37 = vld [vmem:[#allocation3] sm:$0xff] }
 0x5df   : > { %3911 = vrot.lane.b32.xlu0 %v2829_v13, %s5972_s16  ;;  %5425 = vmatmul.mubr.msk.f32.gmra.mrb[16].mxu1 %vm4222_vm0, %v4200_v20  ;;  %v9131_v13 = vld [vmem:[#allocation13] ss:$0 sm:$0xff] }
 0x5e0   : > { %v9073_v11 = vpop.permute.xlu1 %3261 }
 0x5e1   : > { %v3642_v43 = vpop.permute.xlu0 %3641 }
 0x5e2   : > { %3277 = vrot.lane.b32.xlu1 %v2766_v30, %s5966_s25  ;;  %v4135_v29 = vsel %vm4114_vm13, %v4102_v9, %v3642_v43 }
 0x5e3   : > { %3657 = vrot.lane.b32.xlu0 %v2766_v30, %s5970_s20  ;;  %v9135_v30 = vld [vmem:[#allocation15] ss:$0 sm:$0xff] }
 0x5e4   : > { %v3770_v25 = vpop.permute.xlu1 %3769 }
 0x5e5   : > { %v3644_v1 = vpop.permute.xlu0 %3643  ;;  %v4168_v12 = vsel %vm4147_vm14, %v4135_v29, %v3770_v25 }
 0x5e6   : > { %3785 = vrot.lane.b32.xlu1 %v2893_v55, %s5971_s23  ;;  %v4136_v3 = vsel %vm4114_vm13, %v4103_v47, %v3644_v1  ;;  %v10048_v1 = vld [vmem:[#allocation29_spill] sm:$0xff]  ;;  %v10053_v47 = vld [vmem:[#allocation27_spill] sm:$0xff] }
 0x5e7   : > { %3659 = vrot.lane.b32.xlu0 %v2862_v2, %s5970_s20 }
 0x5e8   : > { %v9079_v26 = vpop.permute.xlu1 %3345 }
 0x5e9   : > { %v9081_v5 = vpop.permute.xlu0 %3263 }
 0x5ea   : > { %3405 = vrot.lane.b32.xlu1 %v2893_v55, %s5968_s19  ;;  %v3953_v55 = vsel %vm470_vm2, %v2640_v37, %v10048_v1  ;;  %v10056_v37 = vld [vmem:[#allocation97_spill] sm:$0xff] }
 0x5eb   : > { %3279 = vrot.lane.b32.xlu0 %v2862_v2, %s5966_s25  ;;  %v3985_v19 = vsel %vm2001_vm5, %v3953_v55, %v10049_v7  ;;  %s5843_s25 = sshll.u32 %s5973_s24, 4  ;;  %s5844_s25 = int_to_ptr.vmem [resolvable:$false] %s5843_s25 }
 0x5ec   : > { %v3772_v62 = vpop.permute.xlu1 %3771  ;;  %s5845_s26 = scalar_lea.vmem %s5844_s25, 256  ;;  %p5846_p1 = scmp.lt.s32.totalorder %s9450_s13, %s5844_s25 }
 0x5ed   : > { %v9091_v56 = vpop.permute.xlu0 %3389  ;;  %v4169_v49 = vsel %vm4147_vm14, %v4136_v3, %v3772_v62  ;;  %v4017_v62 = vsel %vm2067_vm8, %v3985_v19, %v10050_v45 }
 0x5ee   : > { %3913 = vrot.lane.b32.xlu1 %v2925_v0, %s5972_s16 }
 0x5ef   : > { %3787 = vrot.lane.b32.xlu0 %v2894_v54, %s5971_s23 }
 0x5f0   : > { %v9098_v50 = vpop.permute.xlu1 %3347 }
 0x5f1   : > { %v3898_v59 = vpop.permute.xlu0 %3897 }
 0x5f2   : > { %v4201_v23 = vsel %vm4180_vm15, %v4168_v12, %v3898_v59  ;;  %3533 = vrot.lane.b32.xlu1 %v2925_v0, %s5969_s22  ;;  %v4049_v0 = vsel %vm2133_vm10, %v4017_v62, %v9079_v26  ;;  %v2641_v12 = vld [vmem:[#allocation3 + $0x8] sm:$0xff] }
 0x5f3   : > { %5427 = vmatprep.mubr.msk.f32.mxu1 %vm4222_vm0, %v4201_v23  ;;  %3407 = vrot.lane.b32.xlu0 %v2894_v54, %s5968_s19  ;;  %v5640_v59 = vld [vmem:[#allocation3 + $0x108] sm:$0xff]  ;;  %v3954_v3 = vsel %vm470_vm2, %v2641_v12, %v10053_v47  ;;  %s9448_s19 = scalar_lea.hbm %s9530_s7, %s5238_s1 }
 0x5f4   : > { %v3474_v15 = vpop.permute.xlu1 %3473  ;;  %v3975_v18 = vsel %vm470_vm2, %v5640_v59, %v10051_v40  ;;  %v10058_v59 = vld [vmem:[#allocation117_spill] sm:$0xff] }
 0x5f5   : > { %v9112_v39 = vpop.permute.xlu0 %3391  ;;  %v4082_v9 = vsel %vm4081_vm12, %v4049_v0, %v3474_v15  ;;  %v4007_v52 = vsel %vm2001_vm5, %v3975_v18, %v10052_v14  ;;  %v3977_v40 = vsel %vm470_vm2, %v8853_v10, %v10058_v59  ;;  %v10059_v18 = vld [vmem:[#allocation52_spill] sm:$0xff] }
 0x5f6   : > { %3535 = vrot.lane.b32.xlu1 %v2831_v31, %s5969_s22  ;;  %v4039_v15 = vsel %vm2067_vm8, %v4007_v52, %v9073_v11 }
 0x5f7   : > { %3915 = vrot.lane.b32.xlu0 %v2831_v31, %s5972_s16 }
 0x5f8   : > { %v3900_v22 = vpop.permute.xlu1 %3899 }
 0x5f9   : > { %v4202_v6 = vsel %vm4180_vm15, %v4169_v49, %v3900_v22  ;;  %v3518_v38 = vpop.permute.xlu0 %3517  ;;  %v10054_v49 = vld [vmem:[#allocation50_spill] sm:$0xff] }
 0x5fa   : > { %5428 = vmatmul.mubr.msk.f32.gmra.mrb[18].mxu1 %vm4222_vm0, %v4202_v6  ;;  %3663 = vrot.lane.b32.xlu1 %v2864_v51, %s5970_s20  ;;  %v4071_v51 = vsel %vm2133_vm10, %v4039_v15, %v9091_v56  ;;  %v3986_v22 = vsel %vm2001_vm5, %v3954_v3, %v10054_v49  ;;  %v10055_v6 = vld [vmem:[#allocation85_spill] sm:$0xff]  ;;  %v10060_v3 = vld [vmem:[#allocation118_spill] sm:$0xff] }
 0x5fb   : > { %3661 = vrot.lane.b32.xlu0 %v2863_v33, %s5970_s20  ;;  %v4104_v33 = vsel %vm4081_vm12, %v4071_v51, %v3518_v38  ;;  %v4018_v11 = vsel %vm2067_vm8, %v3986_v22, %v10055_v6  ;;  %v3976_v38 = vsel %vm470_vm2, %v8816_v21, %v10056_v37  ;;  %v10061_v51 = vld [vmem:[#allocation54_spill] sm:$0xff] }
 0x5fc   : > { %v9123_v35 = vpop.permute.xlu1 %3519 }
 0x5fd   : > { %v3476_v63 = vpop.permute.xlu0 %3475 }
 0x5fe   : > { %3791 = vrot.lane.b32.xlu1 %v2896_v8, %s5971_s23 }
 0x5ff   : > { %3789 = vrot.lane.b32.xlu0 %v2895_v42, %s5971_s23  ;;  %s4923_s23 = scalar_lea.sflag [#allocation6], %s6286_s14 }
 0x600   : > { %v3646_v17 = vpop.permute.xlu1 %3645 }
 0x601   : > { %v3602_v32 = vpop.permute.xlu0 %3601  ;;  %v4137_v8 = vsel %vm4114_vm13, %v4104_v33, %v3646_v17  ;;  %v10057_v17 = vld [vmem:[#allocation154_spill] sm:$0xff] }
 0x602   : > { %3919 = vrot.lane.b32.xlu1 %v2928_v57, %s5972_s16  ;;  %v4115_v46 = vsel %vm4114_vm13, %v4082_v9, %v3602_v32  ;;  %v4050_v57 = vsel %vm2133_vm10, %v4018_v11, %v9098_v50  ;;  %v4008_v1 = vsel %vm2001_vm5, %v3976_v38, %v10057_v17 }
 0x603   : > { %3917 = vrot.lane.b32.xlu0 %v2927_v34, %s5972_s16  ;;  %v4083_v56 = vsel %vm4081_vm12, %v4050_v57, %v3476_v63  ;;  %s5839_s16 = scalar_lea.vmem %s9450_s13, 128 }
 0x604   : > { %v3604_v36 = vpop.permute.xlu1 %3603  ;;  %p5840_p6 = scmp.ne.s32.totalorder %s9450_s13, %s5839_s16  ;;  %p5847_p3 = scmp.lt.s32.totalorder %s5845_s26, %s5839_s16 }
 0x605   : > { %v9129_v48 = vpop.permute.xlu0 %3265 }
 0x606   : > { %p5841_p12 = pnand %p5840_p6, %p10074_p9  ;;  %p5848_p2 = por %p5847_p3, %p5846_p1 }
 0x608   : > { %v3730_v24 = vpop.permute.xlu1 %3729  ;;  %p5842_p13 = pneg %p5841_p12 }
 0x609   : > { %v3648_v58 = vpop.permute.xlu0 %3647  ;;  %v4148_v26 = vsel %vm4147_vm14, %v4115_v46, %v3730_v24  ;;  %v4009_v46 = vsel %vm2001_vm5, %v3977_v40, %v10059_v18 }
 0x60a   : > { %p5849_p8 = pnand %p5848_p2, %p5842_p13 }
 0x60c   : > { %v9133_v20 = vpop.permute.xlu1 %3267 }
 0x60d   : > { %v5402_v43 = vpop.f32.mrb[0].mxu1  ;;  %v3774_v25 = vpop.permute.xlu0 %3773 }
 0x60e   : > { %v4554_v2 = vmul.f32 %v5402_v43, %v9131_v13  ;;  %v4395_v16 = vpop.f32.mrb[1].mxu1  ;;  %v4170_v34 = vsel %vm4147_vm14, %v4137_v8, %v3774_v25  ;;  %v4116_v43 = vsel %vm4114_vm13, %v4083_v56, %v3604_v36  ;;  %v4040_v25 = vsel %vm2067_vm8, %v4008_v1, %v9081_v5 }
 0x60f   : > { %v4553_v60 = vmul.f32 %v9131_v13, %v4395_v16  ;;  %v4072_v16 = vsel %vm2133_vm10, %v4040_v25, %v9112_v39 }
 0x610   : > { %v4593_v27 = vadd.f32 %v9135_v30, %v4554_v2  ;;  %v3732_v44 = vpop.permute.xlu1 %3731  ;;  %v4105_v21 = vsel %vm4081_vm12, %v4072_v16, %v9123_v35  ;;  %v10063_v16 = vld [vmem:[#allocation100_spill] sm:$0xff] }
 0x611   : > { %v4592_v28 = vadd.f32 %v9135_v30, %v4553_v60  ;;  %v9149_v54 = vpop.permute.xlu0 %3393  ;;  %v4149_v50 = vsel %vm4147_vm14, %v4116_v43, %v3732_v44  ;;  %v4138_v36 = vsel %vm4114_vm13, %v4105_v21, %v3648_v58 }
 0x612   : > { %v4625_v29 = vmax.f32 %v4593_v27, 0.0 }
 0x613   : > { %v4624_v23 = vmax.f32 %v4592_v28, 0.0 }
 0x614   : > { %4657 = vst.msk [vmem:[#allocation3 + $0x39] sm:$0xff] %vm470_vm2, %v4625_v29  ;;  %v3858_v53 = vpop.permute.xlu1 %3857 }
 0x615   : > { %4656 = vst.msk [vmem:[#allocation3 + $0x31] sm:$0xff] %vm470_vm2, %v4624_v23  ;;  %v4181_v4 = vsel %vm4180_vm15, %v4148_v26, %v3858_v53  ;;  %v3776_v31 = vpop.permute.xlu0 %3775  ;;  %v4041_v23 = vsel %vm2067_vm8, %v4009_v46, %v9129_v48  ;;  %v3978_v48 = vsel %vm470_vm2, %v8873_v41, %v10060_v3 }
 0x616   : > { %5397 = vmatprep.mubr.msk.f32.mxu0 %vm4222_vm0, %v4181_v4  ;;  %v4171_v19 = vsel %vm4147_vm14, %v4138_v36, %v3776_v31  ;;  %v4073_v52 = vsel %vm2133_vm10, %v4041_v23, %v9149_v54  ;;  %v4010_v54 = vsel %vm2001_vm5, %v3978_v48, %v10061_v51 }
 0x617   : > { %v4042_v22 = vsel %vm2067_vm8, %v4010_v54, %v9133_v20 }
 0x618   : > { %v3396_v42 = vpop.permute.xlu1 %3395 }
 0x619   : > { %v3902_v32 = vpop.permute.xlu0 %3901  ;;  %v4074_v11 = vsel %vm2133_vm10, %v4042_v22, %v3396_v42 }
 0x61a   : > { %v4203_v24 = vsel %vm4180_vm15, %v4170_v34, %v3902_v32 }
 0x61b   : > { %5430 = vmatprep.mubr.msk.f32.mxu1 %vm4222_vm0, %v4203_v24 }
 0x61c   : > { %v3860_v55 = vpop.permute.xlu1 %3859 }
 0x61d   : > { %v4182_v63 = vsel %vm4180_vm15, %v4149_v50, %v3860_v55  ;;  %v3522_v2 = vpop.permute.xlu0 %3521 }
 0x61e   : > { %5398 = vmatmul.mubr.msk.f32.vlgmr.msra.gmra.mrb[32].mxu0 %vm4222_vm0, %v4182_v63  ;;  %v4106_v53 = vsel %vm4081_vm12, %v4073_v52, %v3522_v2  ;;  %v10062_v63 = vld [vmem:[#allocation28_spill] sm:$0xff] }
 0x61f   : > { %v3979_v2 = vsel %vm470_vm2, %v8924_v61, %v10062_v63  ;;  %v2669_v63 = vld [vmem:[#allocation3 + $0x158] sm:$0xff] }
 0x620   : > { %v3524_v7 = vpop.permute.xlu1 %3523  ;;  %v4011_v21 = vsel %vm2001_vm5, %v3979_v2, %v10063_v16  ;;  %v10068_v16 = vld [vmem:[#allocation77_spill] sm:$0xff] }
 0x621   : > { %v5405_v60 = vpop.f32.mrb[2].mxu1  ;;  %v3904_v45 = vpop.permute.xlu0 %3903  ;;  %v4107_v34 = vsel %vm4081_vm12, %v4074_v11, %v3524_v7  ;;  %v10067_v11 = vld [vmem:[#allocation121_spill] sm:$0xff] }
 0x622   : > { %v4556_v5 = vmul.f32 %v5405_v60, %v9131_v13  ;;  %v4204_v62 = vsel %vm4180_vm15, %v4171_v19, %v3904_v45  ;;  %v4405_v27 = vpop.f32.mrb[3].mxu1 }
 0x623   : > { %v4555_v44 = vmul.f32 %v9131_v13, %v4405_v27  ;;  %5431 = vmatmul.mubr.msk.f32.gmra.mrb[20].mxu1 %vm4222_vm0, %v4204_v62 }
 0x624   : > { %v4595_v39 = vadd.f32 %v9135_v30, %v4556_v5  ;;  %v3270_v0 = vpop.permute.xlu1 %3269 }
 0x625   : > { %v4594_v35 = vadd.f32 %v9135_v30, %v4555_v44  ;;  %v3650_v58 = vpop.permute.xlu0 %3649  ;;  %v4043_v36 = vsel %vm2067_vm8, %v4011_v21, %v3270_v0  ;;  %v3982_v21 = vsel %vm470_vm2, %v2669_v63, %v10068_v16 }
 0x626   : > { %v4627_v28 = vmax.f32 %v4595_v39, 0.0  ;;  %v4139_v15 = vsel %vm4114_vm13, %v4106_v53, %v3650_v58 }
 0x627   : > { %v4626_v9 = vmax.f32 %v4594_v35, 0.0  ;;  %v2667_v35 = vld [vmem:[#allocation3 + $0x140] sm:$0xff] }
 0x628   : > { %4659 = vst.msk [vmem:[#allocation3 + $0x51] sm:$0xff] %vm470_vm2, %v4627_v28  ;;  %v3778_v29 = vpop.permute.xlu1 %3777  ;;  %v10064_v28 = vld [vmem:[#allocation30_spill] sm:$0xff] }
 0x629   : > { %4658 = vst.msk [vmem:[#allocation3 + $0x49] sm:$0xff] %vm470_vm2, %v4626_v9  ;;  %v3652_v12 = vpop.permute.xlu0 %3651  ;;  %v4172_v4 = vsel %vm4147_vm14, %v4139_v15, %v3778_v29  ;;  %v3980_v9 = vsel %vm470_vm2, %v2667_v35, %v10064_v28 }
 0x62a   : > { %v4140_v41 = vsel %vm4114_vm13, %v4107_v34, %v3652_v12  ;;  %v10065_v12 = vld [vmem:[#allocation101_spill] sm:$0xff] }
 0x62b   : > { %v4012_v59 = vsel %vm2001_vm5, %v3980_v9, %v10065_v12  ;;  %v10070_v12 = vld [vmem:[#allocation151_spill] sm:$0xff] }
 0x62c   : > { %v3398_v14 = vpop.permute.xlu1 %3397 }
 0x62d   : > { %v3272_v26 = vpop.permute.xlu0 %3271  ;;  %v4075_v19 = vsel %vm2133_vm10, %v4043_v36, %v3398_v14 }
 0x62e   : > { %v4044_v46 = vsel %vm2067_vm8, %v4012_v59, %v3272_v26 }
 0x630   : > { %v3906_v31 = vpop.permute.xlu1 %3905 }
 0x631   : > { %v4205_v10 = vsel %vm4180_vm15, %v4172_v4, %v3906_v31  ;;  %v3780_v47 = vpop.permute.xlu0 %3779 }
 0x632   : > { %5433 = vmatprep.mubr.msk.f32.mxu1 %vm4222_vm0, %v4205_v10  ;;  %v4173_v37 = vsel %vm4147_vm14, %v4140_v41, %v3780_v47 }
 0x634   : > { %v3526_v49 = vpop.permute.xlu1 %3525 }
 0x635   : > { %v5408_v33 = vpop.f32.mrb[4].mxu1  ;;  %v3400_v6 = vpop.permute.xlu0 %3399  ;;  %v4108_v45 = vsel %vm4081_vm12, %v4075_v19, %v3526_v49  ;;  %v2668_v49 = vld [vmem:[#allocation3 + $0x150] sm:$0xff] }
 0x636   : > { %v4558_v8 = vmul.f32 %v5408_v33, %v9131_v13  ;;  %v4415_v57 = vpop.f32.mrb[5].mxu1  ;;  %v4076_v52 = vsel %vm2133_vm10, %v4044_v46, %v3400_v6  ;;  %v10066_v33 = vld [vmem:[#allocation75_spill] sm:$0xff]  ;;  %v10072_v46 = vld [vmem:[#allocation41_spill] sm:$0xff] }
 0x637   : > { %v4557_v32 = vmul.f32 %v9131_v13, %v4415_v57  ;;  %v3981_v6 = vsel %vm470_vm2, %v2668_v49, %v10066_v33 }
 0x638   : > { %v4597_v56 = vadd.f32 %v9135_v30, %v4558_v8  ;;  %v3528_v24 = vpop.permute.xlu1 %3527  ;;  %v4013_v8 = vsel %vm2001_vm5, %v3981_v6, %v10067_v11 }
 0x639   : > { %v4596_v20 = vadd.f32 %v9135_v30, %v4557_v32  ;;  %v3908_v38 = vpop.permute.xlu0 %3907  ;;  %v4109_v15 = vsel %vm4081_vm12, %v4076_v52, %v3528_v24  ;;  %v10073_v52 = vld [vmem:[#allocation43_spill] sm:$0xff] }
 0x63a   : > { %v4629_v43 = vmax.f32 %v4597_v56, 0.0  ;;  %v4206_v42 = vsel %vm4180_vm15, %v4173_v37, %v3908_v38 }
 0x63b   : > { %v4628_v17 = vmax.f32 %v4596_v20, 0.0  ;;  %5434 = vmatmul.mubr.msk.f32.gmra.mrb[22].mxu1 %vm4222_vm0, %v4206_v42 }
 0x63c   : > { %4661 = vst.msk [vmem:[#allocation3 + $0x69] sm:$0xff] %vm470_vm2, %v4629_v43  ;;  %v3274_v1 = vpop.permute.xlu1 %3273 }
 0x63d   : > { %4660 = vst.msk [vmem:[#allocation3 + $0x61] sm:$0xff] %vm470_vm2, %v4628_v17  ;;  %v3654_v50 = vpop.permute.xlu0 %3653  ;;  %v4045_v57 = vsel %vm2067_vm8, %v4013_v8, %v3274_v1 }
 0x63e   : > { %v4141_v5 = vsel %vm4114_vm13, %v4108_v45, %v3654_v50 }
 0x640   : > { %v3782_v55 = vpop.permute.xlu1 %3781 }
 0x641   : > { %v3656_v25 = vpop.permute.xlu0 %3655  ;;  %v4174_v62 = vsel %vm4147_vm14, %v4141_v5, %v3782_v55 }
 0x642   : > { %v4142_v31 = vsel %vm4114_vm13, %v4109_v15, %v3656_v25 }
 0x644   : > { %v3402_v7 = vpop.permute.xlu1 %3401 }
 0x645   : > { %v9245_v60 = vpop.permute.xlu0 %3275  ;;  %v4077_v32 = vsel %vm2133_vm10, %v4045_v57, %v3402_v7  ;;  %v10069_v7 = vld [vmem:[#allocation122_spill] sm:$0xff] }
 0x646   : > { %v4014_v19 = vsel %vm2001_vm5, %v3982_v21, %v10069_v7 }
 0x647   : > { %v4046_v5 = vsel %vm2067_vm8, %v4014_v19, %v9245_v60  ;;  %v2670_v60 = vld [vmem:[#allocation3 + $0x168] sm:$0xff] }
 0x648   : > { %v3910_v27 = vpop.permute.xlu1 %3909  ;;  %v3983_v59 = vsel %vm470_vm2, %v2670_v60, %v10070_v12 }
 0x649   : > { %v4207_v44 = vsel %vm4180_vm15, %v4174_v62, %v3910_v27  ;;  %v5411_v61 = vpop.f32.mrb[6].mxu1  ;;  %v3784_v39 = vpop.permute.xlu0 %3783 }
 0x64a   : > { %v4560_v58 = vmul.f32 %v5411_v61, %v9131_v13  ;;  %v4425_v0 = vpop.f32.mrb[7].mxu1  ;;  %5436 = vmatprep.mubr.msk.f32.mxu1 %vm4222_vm0, %v4207_v44  ;;  %v4175_v47 = vsel %vm4147_vm14, %v4142_v31, %v3784_v39 }
 0x64b   : > { %v4559_v29 = vmul.f32 %v9131_v13, %v4425_v0 }
 0x64c   : > { %v4599_v40 = vadd.f32 %v9135_v30, %v4560_v58  ;;  %v3530_v18 = vpop.permute.xlu1 %3529 }
 0x64d   : > { %v4598_v23 = vadd.f32 %v9135_v30, %v4559_v29  ;;  %v3404_v14 = vpop.permute.xlu0 %3403  ;;  %v4110_v24 = vsel %vm4081_vm12, %v4077_v32, %v3530_v18  ;;  %v2671_v29 = vld [vmem:[#allocation3 + $0x170] sm:$0xff] }
 0x64e   : > { %v4631_v53 = vmax.f32 %v4599_v40, 0.0  ;;  %v4078_v27 = vsel %vm2133_vm10, %v4046_v5, %v3404_v14  ;;  %v10071_v40 = vld [vmem:[#allocation152_spill] sm:$0xff] }
 0x64f   : > { %v4630_v4 = vmax.f32 %v4598_v23, 0.0  ;;  %v3984_v18 = vsel %vm470_vm2, %v2671_v29, %v10071_v40  ;;  %v4015_v23 = vsel %vm2001_vm5, %v3983_v59, %v10072_v46 }
 0x650   : > { %4663 = vst.msk [vmem:[#allocation3 + $0x81] sm:$0xff] %vm470_vm2, %v4631_v53  ;;  %v3532_v10 = vpop.permute.xlu1 %3531  ;;  %v4016_v53 = vsel %vm2001_vm5, %v3984_v18, %v10073_v52  ;;  %v4686_v18 = vlaneseq }
 0x651   : > { %4662 = vst.msk [vmem:[#allocation3 + $0x79] sm:$0xff] %vm470_vm2, %v4630_v4  ;;  %v3912_v3 = vpop.permute.xlu0 %3911  ;;  %v4111_v44 = vsel %vm4081_vm12, %v4078_v27, %v3532_v10 }
 0x652   : > { %v4208_v26 = vsel %vm4180_vm15, %v4175_v47, %v3912_v3 }
 0x653   : > { %5437 = vmatmul.mubr.msk.f32.gmra.mrb[24].mxu1 %vm4222_vm0, %v4208_v26 }
 0x654   : > { %v3278_v48 = vpop.permute.xlu1 %3277 }
 0x655   : > { %v3658_v51 = vpop.permute.xlu0 %3657  ;;  %v4047_v15 = vsel %vm2067_vm8, %v4015_v23, %v3278_v48 }
 0x656   : > { %v4143_v38 = vsel %vm4114_vm13, %v4110_v24, %v3658_v51 }
 0x658   : > { %v3786_v54 = vpop.permute.xlu1 %3785 }
 0x659   : > { %v3660_v22 = vpop.permute.xlu0 %3659  ;;  %v4176_v42 = vsel %vm4147_vm14, %v4143_v38, %v3786_v54 }
 0x65a   : > { %v4144_v61 = vsel %vm4114_vm13, %v4111_v44, %v3660_v22 }
 0x65c   : > { %v3406_v34 = vpop.permute.xlu1 %3405 }
 0x65d   : > { %v5414_v41 = vpop.f32.mrb[8].mxu1  ;;  %v3280_v56 = vpop.permute.xlu0 %3279  ;;  %v4079_v10 = vsel %vm2133_vm10, %v4047_v15, %v3406_v34  ;;  %v4687_v15 = vshrl.u32 %v4686_v18, 7 }
 0x65e   : > { %v4562_v37 = vmul.f32 %v5414_v41, %v9131_v13  ;;  %v4435_v20 = vpop.f32.mrb[9].mxu1  ;;  %v4048_v47 = vsel %vm2067_vm8, %v4016_v53, %v3280_v56 }
 0x65f   : > { %v4561_v43 = vmul.f32 %v9131_v13, %v4435_v20 }
 0x660   : > { %v4601_v17 = vadd.f32 %v9135_v30, %v4562_v37  ;;  %v3914_v50 = vpop.permute.xlu1 %3913 }
 0x661   : > { %v4600_v1 = vadd.f32 %v9135_v30, %v4561_v43  ;;  %v4209_v55 = vsel %vm4180_vm15, %v4176_v42, %v3914_v50  ;;  %v3788_v25 = vpop.permute.xlu0 %3787 }
 0x662   : > { %v4633_v2 = vmax.f32 %v4601_v17, 0.0  ;;  %5439 = vmatprep.mubr.msk.f32.mxu1 %vm4222_vm0, %v4209_v55  ;;  %v4177_v35 = vsel %vm4147_vm14, %v4144_v61, %v3788_v25 }
 0x663   : > { %v4632_v36 = vmax.f32 %v4600_v1, 0.0 }
 0x664   : > { %4665 = vst.msk [vmem:[#allocation3 + $0x99] sm:$0xff] %vm470_vm2, %v4633_v2  ;;  %v3534_v45 = vpop.permute.xlu1 %3533 }
 0x665   : > { %4664 = vst.msk [vmem:[#allocation3 + $0x91] sm:$0xff] %vm470_vm2, %v4632_v36  ;;  %v3408_v62 = vpop.permute.xlu0 %3407  ;;  %v4112_v51 = vsel %vm4081_vm12, %v4079_v10, %v3534_v45 }
 0x666   : > { %v4080_v54 = vsel %vm2133_vm10, %v4048_v47, %v3408_v62 }
 0x668   : > { %v3536_v39 = vpop.permute.xlu1 %3535 }
 0x669   : > { %v3916_v58 = vpop.permute.xlu0 %3915  ;;  %v4113_v22 = vsel %vm4081_vm12, %v4080_v54, %v3536_v39  ;;  %v9359_v54 = vmul.u32 2, %v4687_v15 }
 0x66a   : > { %v4210_v0 = vsel %vm4180_vm15, %v4177_v35, %v3916_v58 }
 0x66b   : > { %5440 = vmatmul.mubr.msk.f32.gmra.mrb[26].mxu1 %vm4222_vm0, %v4210_v0  ;;  %v4779_v15 = vadd.s32 112, %v9359_v54 }
 0x66c   : > { %v3664_v28 = vpop.permute.xlu1 %3663 }
 0x66d   : > { %v3662_v9 = vpop.permute.xlu0 %3661  ;;  %v4146_v11 = vsel %vm4114_vm13, %v4113_v22, %v3664_v28  ;;  %v4691_v22 = vld [vmem:[#allocation3 + $0x49] ss:$2 sm:$0xff] }
 0x66e   : > { %v4145_v33 = vsel %vm4114_vm13, %v4112_v51, %v3662_v9 }
 0x670   : > { %v3792_v14 = vpop.permute.xlu1 %3791 }
 0x671   : > { %v5417_v4 = vpop.f32.mrb[10].mxu1  ;;  %v3790_v31 = vpop.permute.xlu0 %3789  ;;  %v4179_v32 = vsel %vm4147_vm14, %v4146_v11, %v3792_v14  ;;  %v9364_v11 = vadd.s32 1, %v9359_v54 }
 0x672   : > { %v4564_v3 = vmul.f32 %v5417_v4, %v9131_v13  ;;  %v4445_v26 = vpop.f32.mrb[11].mxu1  ;;  %v4178_v8 = vsel %vm4147_vm14, %v4145_v33, %v3790_v31  ;;  %v4715_v33 = vld [vmem:[#allocation3 + $0x4a] ss:$2 sm:$0xff] }
 0x673   : > { %v4563_v49 = vmul.f32 %v9131_v13, %v4445_v26  ;;  %vm4737_vm1 = vcmp.gt.f32.partialorder %v4715_v33, %v4691_v22 }
 0x674   : > { %v4603_v48 = vadd.f32 %v9135_v30, %v4564_v3  ;;  %v3920_v6 = vpop.permute.xlu1 %3919 }
 0x675   : > { %v4602_v57 = vadd.f32 %v9135_v30, %v4563_v49  ;;  %v3918_v34 = vpop.permute.xlu0 %3917  ;;  %v4212_v37 = vsel %vm4180_vm15, %v4179_v32, %v3920_v6 }
 0x676   : > { %v4635_v41 = vmax.f32 %v4603_v48, 0.0  ;;  %v4211_v56 = vsel %vm4180_vm15, %v4178_v8, %v3918_v34  ;;  %v4763_v8 = vld [vmem:[#allocation3 + $0x61] ss:$2 sm:$0xff]  ;;  %v4717_v34 = vld [vmem:[#allocation3 + $0x7a] ss:$2 sm:$0xff] }
 0x677   : > { %v4634_v24 = vmax.f32 %v4602_v57, 0.0  ;;  %5442 = vmatprep.mubr.msk.f32.mxu1 %vm4222_vm0, %v4211_v56  ;;  %v4693_v57 = vld [vmem:[#allocation3 + $0x79] ss:$2 sm:$0xff]  ;;  %v4776_v56 = vadd.s32 16, %v9359_v54 }
 0x678   : > { %4667 = vst.msk [vmem:[#allocation3 + $0xb1] sm:$0xff] %vm470_vm2, %v4635_v41  ;;  %5443 = vmatmul.mubr.msk.f32.gmra.mrb[28].mxu1 %vm4222_vm0, %v4212_v37  ;;  %v4761_v37 = vld [vmem:[#allocation3 + $0x31] ss:$2 sm:$0xff]  ;;  %vm4738_vm5 = vcmp.gt.f32.partialorder %v4717_v34, %v4693_v57 }
 0x679   : > { %4666 = vst.msk [vmem:[#allocation3 + $0xa9] sm:$0xff] %vm470_vm2, %v4634_v24  ;;  %v4745_v24 = vsel %vm4737_vm1, %v4715_v33, %v4691_v22  ;;  %v4732_v33 = vadd.s32 128, %v9364_v11 }
 0x67a   : > { %vm4785_vm4 = vcmp.gt.f32.partialorder %v4763_v8, %v4745_v24 }
 0x685   : > { %v5420_v20 = vpop.f32.mrb[12].mxu1 }
 0x686   : > { %v4566_v38 = vmul.f32 %v5420_v20, %v9131_v13  ;;  %v4455_v43 = vpop.f32.mrb[13].mxu1  ;;  %v4705_v20 = vadd.s32 32, %v9359_v54 }
 0x687   : > { %v4565_v42 = vmul.f32 %v9131_v13, %v4455_v43 }
 0x688   : > { %v4605_v17 = vadd.f32 %v9135_v30, %v4566_v38  ;;  %v4765_v38 = vld [vmem:[#allocation3 + $0x91] ss:$2 sm:$0xff] }
 0x689   : > { %v4604_v50 = vadd.f32 %v9135_v30, %v4565_v42 }
 0x68a   : > { %v4637_v1 = vmax.f32 %v4605_v17, 0.0  ;;  %v4824_v17 = vadd.s32 16, %v9364_v11 }
 0x68b   : > { %v4636_v55 = vmax.f32 %v4604_v50, 0.0  ;;  %v4729_v50 = vadd.s32 32, %v9364_v11 }
 0x68c   : > { %4669 = vst.msk [vmem:[#allocation3 + $0xc9] sm:$0xff] %vm470_vm2, %v4637_v1  ;;  %v4695_v1 = vld [vmem:[#allocation3 + $0xa9] ss:$2 sm:$0xff] }
 0x68d   : > { %4668 = vst.msk [vmem:[#allocation3 + $0xc1] sm:$0xff] %vm470_vm2, %v4636_v55  ;;  %v4719_v55 = vld [vmem:[#allocation3 + $0xaa] ss:$2 sm:$0xff] }
 0x68e   : > { %vm4739_vm9 = vcmp.gt.f32.partialorder %v4719_v55, %v4695_v1 }
 0x699   : > { %v5423_v25 = vpop.f32.mrb[14].mxu1 }
 0x69a   : > { %v4568_v63 = vmul.f32 %v5423_v25, %v9131_v13  ;;  %v4465_v2 = vpop.f32.mrb[15].mxu1  ;;  %v4777_v25 = vadd.s32 48, %v9359_v54 }
 0x69b   : > { %v4567_v16 = vmul.f32 %v9131_v13, %v4465_v2  ;;  %v4706_v2 = vadd.s32 64, %v9359_v54 }
 0x69c   : > { %v4607_v21 = vadd.f32 %v9135_v30, %v4568_v63  ;;  %v4825_v63 = vadd.s32 48, %v9364_v11 }
 0x69d   : > { %v4606_v36 = vadd.f32 %v9135_v30, %v4567_v16 }
 0x69e   : > { %v4639_v7 = vmax.f32 %v4607_v21, 0.0  ;;  %v4809_v21 = vld [vmem:[#allocation3 + $0x32] ss:$2 sm:$0xff] }
 0x69f   : > { %v4638_v19 = vmax.f32 %v4606_v36, 0.0 }
 0x6a0   : > { %4671 = vst.msk [vmem:[#allocation3 + $0xe1] sm:$0xff] %vm470_vm2, %v4639_v7  ;;  %v4793_v7 = vsel %vm4785_vm4, %v4763_v8, %v4745_v24 }
 0x6a1   : > { %4670 = vst.msk [vmem:[#allocation3 + $0xd9] sm:$0xff] %vm470_vm2, %v4638_v19  ;;  %v4746_v19 = vsel %vm4738_vm5, %v4717_v34, %v4693_v57  ;;  %v4780_v34 = vadd.s32 144, %v9359_v54 }
 0x6a2   : > { %vm4786_vm8 = vcmp.gt.f32.partialorder %v4765_v38, %v4746_v19 }
 0x6b2   : > { %v5426_v45 = vpop.f32.mrb[16].mxu1 }
 0x6b3   : > { %v4570_v5 = vmul.f32 %v5426_v45, %v9131_v13  ;;  %v4475_v62 = vpop.f32.mrb[17].mxu1  ;;  %v4811_v45 = vld [vmem:[#allocation3 + $0x62] ss:$2 sm:$0xff] }
 0x6b4   : > { %v4569_v27 = vmul.f32 %v9131_v13, %v4475_v62  ;;  %vm4833_vm10 = vcmp.gt.f32.partialorder %v4811_v45, %v4793_v7 }
 0x6b5   : > { %v4609_v44 = vadd.f32 %v9135_v30, %v4570_v5  ;;  %v4730_v5 = vadd.s32 64, %v9364_v11 }
 0x6b6   : > { %v4608_v61 = vadd.f32 %v9135_v30, %v4569_v27 }
 0x6b7   : > { %v4641_v39 = vmax.f32 %v4609_v44, 0.0  ;;  %v4753_v44 = vsel %vm4737_vm1, %v4729_v50, %v4705_v20  ;;  %v4709_v20 = vadd.s32 160, %v9359_v54 }
 0x6b8   : > { %v4640_v35 = vmax.f32 %v4608_v61, 0.0  ;;  %v4767_v61 = vld [vmem:[#allocation3 + $0xc1] ss:$2 sm:$0xff] }
 0x6b9   : > { %4673 = vst.msk [vmem:[#allocation3 + $0xf9] sm:$0xff] %vm470_vm2, %v4641_v39  ;;  %v4697_v39 = vld [vmem:[#allocation3 + $0xd9] ss:$2 sm:$0xff] }
 0x6ba   : > { %4672 = vst.msk [vmem:[#allocation3 + $0xf1] sm:$0xff] %vm470_vm2, %v4640_v35  ;;  %v4721_v35 = vld [vmem:[#allocation3 + $0xda] ss:$2 sm:$0xff] }
 0x6bb   : > { %vm4740_vm12 = vcmp.gt.f32.partialorder %v4721_v35, %v4697_v39 }
 0x6c1   : > { %v4817_v50 = vld [vmem:[#allocation3 + $0xf2] ss:$2 sm:$0xff] }
 0x6cd   : > { %v5429_v58 = vpop.f32.mrb[18].mxu1 }
 0x6ce   : > { %v4572_v0 = vmul.f32 %v5429_v58, %v9131_v13  ;;  %v4485_v28 = vpop.f32.mrb[19].mxu1  ;;  %v4801_v58 = vsel %vm4785_vm4, %v4777_v25, %v4753_v44 }
 0x6cf   : > { %v4571_v9 = vmul.f32 %v9131_v13, %v4485_v28  ;;  %v4794_v28 = vsel %vm4786_vm8, %v4765_v38, %v4746_v19  ;;  %v4849_v18 = vsel %vm4833_vm10, %v4825_v63, %v4801_v58  ;;  %v4733_v38 = vadd.s32 160, %v9364_v11 }
 0x6d0   : > { %v4611_v60 = vadd.f32 %v9135_v30, %v4572_v0  ;;  %v4778_v0 = vadd.s32 80, %v9359_v54  ;;  %v4781_v63 = vadd.s32 176, %v9359_v54 }
 0x6d1   : > { %v4610_v29 = vadd.f32 %v9135_v30, %v4571_v9  ;;  %v4826_v9 = vadd.s32 80, %v9364_v11 }
 0x6d2   : > { %v4643_v12 = vmax.f32 %v4611_v60, 0.0  ;;  %v4747_v60 = vsel %vm4739_vm9, %v4719_v55, %v4695_v1 }
 0x6d3   : > { %v4642_v59 = vmax.f32 %v4610_v29, 0.0  ;;  %v4813_v29 = vld [vmem:[#allocation3 + $0x92] ss:$2 sm:$0xff]  ;;  %vm4787_vm11 = vcmp.gt.f32.partialorder %v4767_v61, %v4747_v60 }
 0x6d4   : > { %4675 = vst.msk [vmem:[#allocation3 + $0x111] sm:$0xff] %vm470_vm2, %v4643_v12  ;;  %v4707_v12 = vadd.s32 96, %v9359_v54  ;;  %vm4834_vm13 = vcmp.gt.f32.partialorder %v4813_v29, %v4794_v28 }
 0x6d5   : > { %4674 = vst.msk [vmem:[#allocation3 + $0x109] sm:$0xff] %vm470_vm2, %v4642_v59  ;;  %v4731_v59 = vadd.s32 96, %v9364_v11 }
 0x6d7   : > { %v4755_v22 = vsel %vm4739_vm9, %v4731_v59, %v4707_v12  ;;  %v4710_v12 = vadd.s32 192, %v9359_v54  ;;  %v4734_v59 = vadd.s32 192, %v9364_v11 }
 0x6d8   : > { %v4803_v57 = vsel %vm4787_vm11, %v4779_v15, %v4755_v22 }
 0x6f1   : > { %v5399_v40 = vpop.f32.mrb[32].mxu0 }
 0x6f2   : > { %v4552_v46 = vmul.f32 %v5399_v40, %v9131_v13  ;;  %v4385_v23 = vpop.f32.mrb[33].mxu0  ;;  %v4841_v40 = vsel %vm4833_vm10, %v4811_v45, %v4793_v7  ;;  %v4829_v45 = vadd.s32 176, %v9364_v11 }
 0x6f3   : > { %v4551_v14 = vmul.f32 %v9131_v13, %v4385_v23  ;;  %v4769_v23 = vld [vmem:[#allocation3 + $0xf1] ss:$2 sm:$0xff] }
 0x6f4   : > { %v4591_v52 = vadd.f32 %v9135_v30, %v4552_v46  ;;  %v4754_v46 = vsel %vm4738_vm5, %v4730_v5, %v4706_v2 }
 0x6f5   : > { %v4590_v53 = vadd.f32 %v9135_v30, %v4551_v14  ;;  %v4699_v14 = vld [vmem:[#allocation3 + $0x109] ss:$2 sm:$0xff] }
 0x6f6   : > { %v4623_v4 = vmax.f32 %v4591_v52, 0.0  ;;  %v5432_v31 = vpop.f32.mrb[20].mxu1  ;;  %v4723_v52 = vld [vmem:[#allocation3 + $0x10a] ss:$2 sm:$0xff] }
 0x6f7   : > { %v4622_v10 = vmax.f32 %v4590_v53, 0.0  ;;  %v4574_v47 = vmul.f32 %v5432_v31, %v9131_v13  ;;  %v4495_v3 = vpop.f32.mrb[21].mxu1  ;;  %v4802_v53 = vsel %vm4786_vm8, %v4778_v0, %v4754_v46  ;;  %v4748_v31 = vsel %vm4740_vm12, %v4721_v35, %v4697_v39 }
 0x6f8   : > { %4655 = vst.msk [vmem:[#allocation3 + $0x21] sm:$0xff] %vm470_vm2, %v4623_v4  ;;  %v4573_v26 = vmul.f32 %v9131_v13, %v4495_v3  ;;  %v4795_v4 = vsel %vm4787_vm11, %v4767_v61, %v4747_v60  ;;  %vm4788_vm14 = vcmp.gt.f32.partialorder %v4769_v23, %v4748_v31  ;;  %vm4741_vm0 = vcmp.gt.f32.partialorder %v4723_v52, %v4699_v14 }
 0x6f9   : > { %4654 = vst.msk [vmem:[#allocation3 + $0x19] sm:$0xff] %vm470_vm2, %v4622_v10  ;;  %v4613_v51 = vadd.f32 %v9135_v30, %v4574_v47  ;;  %v4827_v10 = vadd.s32 112, %v9364_v11  ;;  %v4708_v47 = vadd.s32 128, %v9359_v54  ;;  %v4749_v24 = vsel %vm4741_vm0, %v4723_v52, %v4699_v14 }
 0x6fa   : > { %v4612_v49 = vadd.f32 %v9135_v30, %v4573_v26  ;;  %v4842_v26 = vsel %vm4834_vm13, %v4813_v29, %v4794_v28  ;;  %v4757_v19 = vsel %vm4741_vm0, %v4733_v38, %v4709_v20  ;;  %v4711_v20 = vadd.s32 224, %v9359_v54 }
 0x6fb   : > { %v4645_v48 = vmax.f32 %v4613_v51, 0.0  ;;  %v4850_v51 = vsel %vm4834_vm13, %v4826_v9, %v4802_v53  ;;  %v4756_v1 = vsel %vm4740_vm12, %v4732_v33, %v4708_v47  ;;  %v4735_v38 = vadd.s32 224, %v9364_v11 }
 0x6fc   : > { %v4644_v6 = vmax.f32 %v4612_v49, 0.0  ;;  %v4815_v49 = vld [vmem:[#allocation3 + $0xc2] ss:$2 sm:$0xff]  ;;  %v4804_v25 = vsel %vm4788_vm14, %v4780_v34, %v4756_v1 }
 0x6fd   : > { %4677 = vst.msk [vmem:[#allocation3 + $0x129] sm:$0xff] %vm470_vm2, %v4645_v48  ;;  %vm4835_vm1 = vcmp.gt.f32.partialorder %v4815_v49, %v4795_v4 }
 0x6fe   : > { %4676 = vst.msk [vmem:[#allocation3 + $0x121] sm:$0xff] %vm470_vm2, %v4644_v6 }
 0x700   : > { %v4689_v32 = vld [vmem:[#allocation3 + $0x19] ss:$2 sm:$0xff]  ;;  %v4713_v41 = vld [vmem:[#allocation3 + $0x1a] ss:$2 sm:$0xff] }
 0x701   : > { %vm4736_vm3 = vcmp.gt.f32.partialorder %v4713_v41, %v4689_v32 }
 0x702   : > { %v4744_v43 = vsel %vm4736_vm3, %v4713_v41, %v4689_v32  ;;  %v4752_v42 = vsel %vm4736_vm3, %v9364_v11, %v9359_v54  ;;  %v4796_v41 = vsel %vm4788_vm14, %v4769_v23, %v4748_v31  ;;  %v4830_v23 = vadd.s32 208, %v9364_v11 }
 0x703   : > { %vm4784_vm6 = vcmp.gt.f32.partialorder %v4761_v37, %v4744_v43  ;;  %vm4836_vm4 = vcmp.gt.f32.partialorder %v4817_v50, %v4796_v41 }
 0x704   : > { %v4792_v16 = vsel %vm4784_vm6, %v4761_v37, %v4744_v43  ;;  %v4800_v36 = vsel %vm4784_vm6, %v4776_v56, %v4752_v42  ;;  %v4828_v56 = vadd.s32 144, %v9364_v11  ;;  %v4843_v42 = vsel %vm4835_vm1, %v4815_v49, %v4795_v4 }
 0x705   : > { %vm4832_vm7 = vcmp.gt.f32.partialorder %v4809_v21, %v4792_v16  ;;  %v4771_v48 = vld [vmem:[#allocation3 + $0x121] ss:$2 sm:$0xff]  ;;  %v4819_v7 = vld [vmem:[#allocation3 + $0x122] ss:$2 sm:$0xff] }
 0x706   : > { %v4840_v62 = vsel %vm4832_vm7, %v4809_v21, %v4792_v16  ;;  %v4848_v27 = vsel %vm4832_vm7, %v4824_v17, %v4800_v36  ;;  %vm4789_vm3 = vcmp.gt.f32.partialorder %v4771_v48, %v4749_v24  ;;  %v4851_v17 = vsel %vm4835_vm1, %v4827_v10, %v4803_v57 }
 0x707   : > { %4856 = vxpose.xlu0.b32.start [1/8] (short) (narrow) %v4840_v62, 8  ;;  %4889 = vxpose.xlu1.b32.start [1/8] (short) (narrow) %v4848_v27, 8  ;;  %v4797_v16 = vsel %vm4789_vm3, %v4771_v48, %v4749_v24  ;;  %v4844_v21 = vsel %vm4836_vm4, %v4817_v50, %v4796_v41  ;;  %v4852_v36 = vsel %vm4836_vm4, %v4828_v56, %v4804_v25 }
 0x708   : > { %vm4837_vm5 = vcmp.gt.f32.partialorder %v4819_v7, %v4797_v16  ;;  %v4805_v5 = vsel %vm4789_vm3, %v4781_v63, %v4757_v19 }
 0x709   : > { %v4845_v62 = vsel %vm4837_vm5, %v4819_v7, %v4797_v16  ;;  %v4853_v27 = vsel %vm4837_vm5, %v4829_v45, %v4805_v5 }
 0x70b   : > { %4857 = vxpose.xlu0.b32.cont [2/8] (short) (narrow) %v4841_v40, 8  ;;  %4890 = vxpose.xlu1.b32.cont [2/8] (short) (narrow) %v4849_v18, 8  ;;  %v4782_v40 = vadd.s32 208, %v9359_v54 }
 0x70e   : > { %v5435_v3 = vpop.f32.mrb[22].mxu1 }
 0x70f   : > { %v4576_v6 = vmul.f32 %v5435_v3, %v9131_v13  ;;  %v4505_v8 = vpop.f32.mrb[23].mxu1  ;;  %4858 = vxpose.xlu0.b32.cont [3/8] (short) (narrow) %v4842_v26, 8  ;;  %4891 = vxpose.xlu1.b32.cont [3/8] (short) (narrow) %v4850_v51, 8 }
 0x710   : > { %v4575_v32 = vmul.f32 %v9131_v13, %v4505_v8 }
 0x711   : > { %v4615_v37 = vadd.f32 %v9135_v30, %v4576_v6 }
 0x712   : > { %v4614_v43 = vadd.f32 %v9135_v30, %v4575_v32 }
 0x713   : > { %v4647_v55 = vmax.f32 %v4615_v37, 0.0  ;;  %4859 = vxpose.xlu0.b32.cont [4/8] (short) (narrow) %v4843_v42, 8  ;;  %4892 = vxpose.xlu1.b32.cont [4/8] (short) (narrow) %v4851_v17, 8 }
 0x714   : > { %v4646_v2 = vmax.f32 %v4614_v43, 0.0 }
 0x715   : > { %4679 = vst.msk [vmem:[#allocation3 + $0x141] sm:$0xff] %vm470_vm2, %v4647_v55 }
 0x716   : > { %4678 = vst.msk [vmem:[#allocation3 + $0x139] sm:$0xff] %vm470_vm2, %v4646_v2 }
 0x717   : > { %4860 = vxpose.xlu0.b32.cont [5/8] (short) (narrow) %v4844_v21, 8  ;;  %4893 = vxpose.xlu1.b32.cont [5/8] (short) (narrow) %v4852_v36, 8 }
 0x71b   : > { %4861 = vxpose.xlu0.b32.cont [6/8] (short) (narrow) %v4845_v62, 8  ;;  %4894 = vxpose.xlu1.b32.cont [6/8] (short) (narrow) %v4853_v27, 8 }
 0x71d   : > { %v4701_v60 = vld [vmem:[#allocation3 + $0x139] ss:$2 sm:$0xff]  ;;  %v4725_v29 = vld [vmem:[#allocation3 + $0x13a] ss:$2 sm:$0xff] }
 0x71e   : > { %vm4742_vm6 = vcmp.gt.f32.partialorder %v4725_v29, %v4701_v60 }
 0x71f   : > { %v4750_v18 = vsel %vm4742_vm6, %v4725_v29, %v4701_v60  ;;  %v4758_v14 = vsel %vm4742_vm6, %v4734_v59, %v4710_v12 }
 0x726   : > { %v5438_v44 = vpop.f32.mrb[24].mxu1 }
 0x727   : > { %v4578_v61 = vmul.f32 %v5438_v44, %v9131_v13  ;;  %v4515_v39 = vpop.f32.mrb[25].mxu1 }
 0x728   : > { %v4577_v35 = vmul.f32 %v9131_v13, %v4515_v39 }
 0x729   : > { %v4617_v58 = vadd.f32 %v9135_v30, %v4578_v61 }
 0x72a   : > { %v4616_v0 = vadd.f32 %v9135_v30, %v4577_v35 }
 0x72b   : > { %v4649_v28 = vmax.f32 %v4617_v58, 0.0 }
 0x72c   : > { %v4648_v9 = vmax.f32 %v4616_v0, 0.0 }
 0x72d   : > { %4681 = vst.msk [vmem:[#allocation3 + $0x159] sm:$0xff] %vm470_vm2, %v4649_v28 }
 0x72e   : > { %4680 = vst.msk [vmem:[#allocation3 + $0x151] sm:$0xff] %vm470_vm2, %v4648_v9 }
 0x735   : > { %v4773_v46 = vld [vmem:[#allocation3 + $0x151] ss:$2 sm:$0xff]  ;;  %v4821_v53 = vld [vmem:[#allocation3 + $0x152] ss:$2 sm:$0xff] }
 0x736   : > { %vm4790_vm7 = vcmp.gt.f32.partialorder %v4773_v46, %v4750_v18 }
 0x737   : > { %v4798_v52 = vsel %vm4790_vm7, %v4773_v46, %v4750_v18  ;;  %v4806_v15 = vsel %vm4790_vm7, %v4782_v40, %v4758_v14 }
 0x738   : > { %vm4838_vm8 = vcmp.gt.f32.partialorder %v4821_v53, %v4798_v52 }
 0x739   : > { %v4846_v4 = vsel %vm4838_vm8, %v4821_v53, %v4798_v52  ;;  %v4854_v31 = vsel %vm4838_vm8, %v4830_v23, %v4806_v15 }
 0x73a   : > { %4862 = vxpose.xlu0.b32.cont [7/8] (short) (narrow) %v4846_v4, 8  ;;  %4895 = vxpose.xlu1.b32.cont [7/8] (short) (narrow) %v4854_v31, 8 }
 0x73e   : > { %v5441_v10 = vpop.f32.mrb[26].mxu1 }
 0x73f   : > { %v4580_v47 = vmul.f32 %v5441_v10, %v9131_v13  ;;  %v4525_v3 = vpop.f32.mrb[27].mxu1 }
 0x740   : > { %v4579_v26 = vmul.f32 %v9131_v13, %v4525_v3 }
 0x741   : > { %v4619_v51 = vadd.f32 %v9135_v30, %v4580_v47 }
 0x742   : > { %v4618_v49 = vadd.f32 %v9135_v30, %v4579_v26 }
 0x743   : > { %v4651_v22 = vmax.f32 %v4619_v51, 0.0 }
 0x744   : > { %v4650_v33 = vmax.f32 %v4618_v49, 0.0 }
 0x745   : > { %4683 = vst.msk [vmem:[#allocation3 + $0x171] sm:$0xff] %vm470_vm2, %v4651_v22 }
 0x746   : > { %4682 = vst.msk [vmem:[#allocation3 + $0x169] sm:$0xff] %vm470_vm2, %v4650_v33 }
 0x74b   : > { %v5444_v48 = vpop.f32.mrb[28].mxu1 }
 0x74c   : > { %v4582_v6 = vmul.f32 %v5444_v48, %v9131_v13  ;;  %v4535_v8 = vpop.f32.mrb[29].mxu1 }
 0x74d   : > { %v4581_v57 = vmul.f32 %v9131_v13, %v4535_v8  ;;  %v4703_v24 = vld [vmem:[#allocation3 + $0x169] ss:$2 sm:$0xff]  ;;  %v4727_v37 = vld [vmem:[#allocation3 + $0x16a] ss:$2 sm:$0xff]  ;;  %v4783_v13 = vadd.s32 240, %v9359_v54 }
 0x74e   : > { %v4621_v34 = vadd.f32 %v9135_v30, %v4582_v6  ;;  %vm4743_vm9 = vcmp.gt.f32.partialorder %v4727_v37, %v4703_v24 }
 0x74f   : > { %v4620_v32 = vadd.f32 %v9135_v30, %v4581_v57  ;;  %v4751_v43 = vsel %vm4743_vm9, %v4727_v37, %v4703_v24  ;;  %v4831_v30 = vadd.s32 240, %v9364_v11  ;;  %v4759_v17 = vsel %vm4743_vm9, %v4735_v38, %v4711_v20 }
 0x750   : > { %v4653_v41 = vmax.f32 %v4621_v34, 0.0 }
 0x751   : > { %v4652_v56 = vmax.f32 %v4620_v32, 0.0 }
 0x752   : > { %4685 = vst.msk [vmem:[#allocation3 + $0x189] sm:$0xff] %vm470_vm2, %v4653_v41 }
 0x753   : > { %4684 = vst.msk [vmem:[#allocation3 + $0x181] sm:$0xff] %vm470_vm2, %v4652_v56 }
 0x75a   : > { %v4775_v42 = vld [vmem:[#allocation3 + $0x181] ss:$2 sm:$0xff]  ;;  %v4823_v55 = vld [vmem:[#allocation3 + $0x182] ss:$2 sm:$0xff] }
 0x75b   : > { %vm4791_vm10 = vcmp.gt.f32.partialorder %v4775_v42, %v4751_v43 }
 0x75c   : > { %v4799_v50 = vsel %vm4791_vm10, %v4775_v42, %v4751_v43  ;;  %v4807_v1 = vsel %vm4791_vm10, %v4783_v13, %v4759_v17 }
 0x75d   : > { %vm4839_vm2 = vcmp.gt.f32.partialorder %v4823_v55, %v4799_v50 }
 0x75e   : > { %v4855_v25 = vsel %vm4839_vm2, %v4831_v30, %v4807_v1  ;;  %v4847_v63 = vsel %vm4839_vm2, %v4823_v55, %v4799_v50 }
 0x75f   : > { %4896 = vxpose.xlu1.b32.end [8/8] (short) (narrow) %v4855_v25, 8  ;;  %4863 = vxpose.xlu0.b32.end [8/8] (short) (narrow) %v4847_v63, 8 }
 0x7c3   : > { %v4905_v54 = vpop.trf.xlu1  ;;  %v4872_v11 = vpop.trf.xlu0 }
 0x7c4   : > { %4921 = vst.msk [vmem:[%s413_s21] sm:$0xff] %vm4180_vm15, %v4905_v54  ;;  %4888 = vst.msk [vmem:[%s406_s12] sm:$0xff] %vm4180_vm15, %v4872_v11 }
 0x7c5   : > { %5852 = shalt.err (!%p5849_p8)
}
 0x7c6   : > { %s5853_s1 = scalar_lea.hbm %s9448_s19, 128  ;;  %s5857_s22 = scalar_lea.hbm %s9530_s7, 256 }
 0x7c7   : > { %p5854_p4 = scmp.ne.s32.totalorder %s9448_s19, %s5853_s1  ;;  %p5858_p0 = scmp.lt.u32.totalorder %s9448_s19, %s9530_s7 }
 0x7c8   : > { %p5859_p5 = scmp.lt.u32.totalorder %s5857_s22, %s5853_s1  ;;  %p5861_p6 = scmp.lt.u32.totalorder %s5853_s1, %s9448_s19 }
 0x7c9   : > { %p5855_p10 = pnand %p5854_p4, %p10074_p9 }
 0x7ca   : > { %p5860_p7 = por %p5859_p5, %p5858_p0 }
 0x7cb   : > { %p5856_p11 = pneg %p5855_p10 }
 0x7cc   : > { %p5862_p12 = por %p5861_p6, %p5860_p7 }
 0x7ce   : > { %p5863_p13 = pnand %p5862_p12, %p5856_p11 }
 0x7d0   : > { %5866 = shalt.err (!%p5863_p13)
}
 0x7d1   : > { %5505 = dma.vmem_to_hbm [thread:$0]  (%p10074_p9), %s9450_s13, 128, %s9448_s19, %s4923_s23  }
 0x7d2   : > { %s4928_s16 = scalar_lea.sflag [#allocation18], %s6286_s14  ;;  %s5867_s25 = scalar_lea.vmem %s9457_s9, 128 }
 0x7d3   : > { %p5868_p1 = scmp.ne.s32.totalorder %s9457_s9, %s5867_s25  ;;  %s5974_s26 = smov [#allocation17]  }
 0x7d4   : > { %s5871_s1 = sshll.u32 %s5974_s26, 4  ;;  %s5872_s1 = int_to_ptr.vmem [resolvable:$false] %s5871_s1 }
 0x7d5   : > { %p5869_p3 = pnand %p5868_p1, %p10074_p9  ;;  %s5873_s12 = scalar_lea.vmem %s5872_s1, 256 }
 0x7d6   : > { %p5874_p8 = scmp.lt.s32.totalorder %s9457_s9, %s5872_s1  ;;  %p5875_p4 = scmp.lt.s32.totalorder %s5873_s12, %s5867_s25 }
 0x7d7   : > { %p5870_p2 = pneg %p5869_p3 }
 0x7d8   : > { %p5876_p10 = por %p5875_p4, %p5874_p8 }
 0x7da   : > { %p5877_p11 = pnand %p5876_p10, %p5870_p2 }
 0x7dc   : > { %5880 = shalt.err (!%p5877_p11)
}
 0x7dd   : > { %s5881_s14 = scalar_lea.hbm %s9455_s11, 128  ;;  %s5885_s23 = scalar_lea.hbm %s9531_s8, 256 }
 0x7de   : > { %p5882_p0 = scmp.ne.s32.totalorder %s9455_s11, %s5881_s14  ;;  %p5886_p6 = scmp.lt.u32.totalorder %s9455_s11, %s9531_s8 }
 0x7df   : > { %p5887_p12 = scmp.lt.u32.totalorder %s5885_s23, %s5881_s14  ;;  %p5889_p1 = scmp.lt.u32.totalorder %s5881_s14, %s9455_s11 }
 0x7e0   : > { %p5883_p5 = pnand %p5882_p0, %p10074_p9 }
 0x7e1   : > { %p5888_p13 = por %p5887_p12, %p5886_p6 }
 0x7e2   : > { %p5884_p7 = pneg %p5883_p5 }
 0x7e3   : > { %p5890_p3 = por %p5889_p1, %p5888_p13 }
 0x7e5   : > { %p5891_p2 = pnand %p5890_p3, %p5884_p7 }
 0x7e7   : > { %5894 = shalt.err (!%p5891_p2)
}
 0x7e8   : > { %5506 = dma.vmem_to_hbm [thread:$0]  (%p10074_p9), %s9457_s9, 128, %s9455_s11, %s4928_s16  }
 0x7e9 PF: > { %s4966_s20 = sand.u32 1, %s5937_s27   ;;  %p10075_p8 = scmp.ne.s32.totalorder %s9587_s17, 0 }
 0x7ea   : > { %p10076_p4 = scmp.ge.s32.totalorder %s5949_s30, 2  ;;  %s4967_s24 = scalar_lea.sflag [#allocation6], %s4966_s20 }
 0x7ec   : > { %p5533_p10 = pnand %p10076_p4, %p10075_p8 }
 0x7ee   : > { %5928 = dma.done.wait (!%p5533_p10), %s4967_s24, 128  }
 0x7ef   : > { %5930 = vsyncadd (!%p5533_p10), %s4967_s24, 4294967168  ;;  %s4976_s25 = scalar_lea.sflag [#allocation18], %s4966_s20 }
 0x7f0   : > { %5932 = dma.done.wait (!%p5533_p10), %s4976_s25, 128  }
 0x7f1   : > { %5934 = vsyncadd (!%p5533_p10), %s4976_s25, 4294967168  ;;  %p28_p9 = scmp.ge.s32.totalorder %s6204_s15, 4   ;;  %s10077_s27 = smov %s5941_s28 }
 0x7f2   : > { %s10078_s28 = smov %s5945_s29  ;;  %s10079_s29 = smov %s6215_s10 }
 0x7f3   : > { %s10080_s30 = smov %s6204_s15  ;;  %30 = sbr.rel (!%p28_p9) target bundleno = 12 (0xc), region = 170 }
 0x7fa   :  { %4981 = vsyncpa [#allocation5], 1 }
 0x7fb   :  { %4983 = vsyncpa [#allocation5 + $0x1], 1 }
 0x7fc   :  { %4984 = vsyncpa [#allocation8], 1 }
 0x7fd   :  { %4985 = vsyncpa [#allocation11], 1 }
 0x7fe   :  { %4986 = vsyncpa [#allocation14], 1 }
 0x7ff   :  { %4987 = vsyncpa [#allocation6], 1 }
 0x800   :  { %4989 = vsyncpa [#allocation6 + $0x1], 1 }
 0x801   :  { %4990 = vsyncpa [#allocation18], 1 }
 0x802   :  { %4992 = vsyncpa [#allocation18 + $0x1], 1 }

</bundles_post_ra>
